<compile_context>
chip_gen: v7x
topology: tpu7x:2x2x1
jax: 0.10.0
libtpu: 0.0.40
codegen_flags: <defaults>
</compile_context>

<pallas_src>
import functools

import jax
import jax.numpy as jnp
from jax.experimental import pallas as pl
from jax.experimental.pallas import tpu as pltpu


def _round_up(x, m):
    return (x + m - 1) // m * m


def _quantize_per_col(w):
    """Symmetric per-output-channel int8 quantization -> (q_int8, scale_f32)."""
    maxabs = jnp.max(jnp.abs(w), axis=0)
    scale = jnp.where(maxabs > 0, maxabs / 127.0, 1.0).astype(jnp.float32)
    q = jnp.clip(jnp.round(w / scale), -127, 127).astype(jnp.int8)
    return q, scale


# ----------------------------- Pallas kernel -------------------------------

def _deep_mlp_kernel(dims, bias_offsets,
                     audio_ref, text_ref, bs_ref,
                     w0a_hbm, w0b_hbm, w1_hbm, tail_hbm,
                     out_ref,
                     w0a_v, w0b_v, w1_v, tail_v, sem):
    """Fused forward: (audio, text) -> (Linear+ReLU) x 5 -> Linear.

    dims          : padded output width of every layer (static tuple of ints).
    bias_offsets  : lane offset of layer i inside the packed bias/scale rows.
    bs_ref        : (2, sum(dims)) fp32; row 0 = biases, row 1 = dequant scales.
    w*_hbm        : int8 (or bf16) weights left in HBM (memory_space=pl.ANY).
    w*_v          : matching VMEM scratch buffers, filled by manual async copies.
    """
    n_layers = len(dims)

    # Issue every weight DMA up front.  W0a/W0b are started first so the copies
    # the kernel immediately blocks on head the DMA queue; layer-i compute then
    # overlaps the streaming of all later layers.
    c0a = pltpu.make_async_copy(w0a_hbm, w0a_v, sem.at[0]); c0a.start()
    c0b = pltpu.make_async_copy(w0b_hbm, w0b_v, sem.at[1]); c0b.start()
    c1 = pltpu.make_async_copy(w1_hbm, w1_v, sem.at[2]); c1.start()
    ct = pltpu.make_async_copy(tail_hbm, tail_v, sem.at[3]); ct.start()

    def bias(i):
        off = bias_offsets[i]
        return bs_ref[0:1, off:off + dims[i]]

    def scale(i):
        off = bias_offsets[i]
        return bs_ref[1:2, off:off + dims[i]]

    # Layer 0: cat(audio, text) @ W0 == audio @ W0a + text @ W0b (no lane concat).
    # int8 -> bf16 upcast on the VPU; dequant scale applied to the small
    # (batch, out) accumulator, not the big weight tile.
    c0a.wait()
    acc = jnp.dot(audio_ref[...].astype(jnp.bfloat16),
                  w0a_v[...].astype(jnp.bfloat16),
                  preferred_element_type=jnp.float32)
    c0b.wait()
    acc = acc + jnp.dot(text_ref[...].astype(jnp.bfloat16),
                        w0b_v[...].astype(jnp.bfloat16),
                        preferred_element_type=jnp.float32)
    x = jnp.maximum(acc * scale(0) + bias(0), 0.0)

    # Layer 1.
    c1.wait()
    acc = jnp.dot(x.astype(jnp.bfloat16), w1_v[...].astype(jnp.bfloat16),
                  preferred_element_type=jnp.float32)
    x = jnp.maximum(acc * scale(1) + bias(1), 0.0)

    # Tail layers 2..n-1 read static row-blocks out of the single packed slab.
    ct.wait()
    row = 0
    for i in range(2, n_layers):
        in_d, out_d = dims[i - 1], dims[i]
        w = tail_v[row:row + in_d, 0:out_d].astype(jnp.bfloat16)
        row += in_d
        acc = jnp.dot(x.astype(jnp.bfloat16), w, preferred_element_type=jnp.float32)
        x = acc * scale(i) + bias(i)
        if i < n_layers - 1:                     # classifier head: no ReLU
            x = jnp.maximum(x, 0.0)

    out_ref[...] = x.astype(out_ref.dtype)       # padded-to-128 lane-dense store


# ------------------------------ host wrapper --------------------------------

def deep_mlp_forward(audio_vec, text_vec, weights, biases, *, quantize=True):
    """Fused DeepMLP forward with a single pallas_call.

    weights[i]: (in_i, out_i) float array (transposed vs. PyTorch's (out, in)).
    biases[i]:  (out_i,) float array.
    quantize:   weight-only int8 streaming (default) or bf16 streaming.
    """
    n_layers = len(weights)
    assert n_layers >= 3, "expects at least 3 linear layers"
    batch, audio_dim = audio_vec.shape
    num_classes = int(weights[-1].shape[1])

    in0 = int(weights[0].shape[0])
    out_dims = [int(w.shape[1]) for w in weights]
    p_out = [_round_up(d, 128) for d in out_dims]          # lane-aligned widths
    p_in = [in0] + p_out[:-1]

    # Pad every weight to (p_in, p_out) with zeros (padded activation columns are
    # exactly 0), then quantize per output channel (padded cols: scale=1, q=0).
    q_w, scales = [], []
    for i, w in enumerate(weights):
        pw = jnp.pad(w.astype(jnp.float32),
                     ((0, p_in[i] - w.shape[0]), (0, p_out[i] - w.shape[1])))
        if quantize:
            q, s = _quantize_per_col(pw)
        else:
            q, s = pw.astype(jnp.bfloat16), jnp.ones((p_out[i],), jnp.float32)
        q_w.append(q)
        scales.append(s)
    w_dtype = q_w[0].dtype

    # DMA plan: W0 split into audio/text halves, W1 alone, all remaining tiny
    # layers row-stacked into ONE slab  =>  4 weight DMAs total.
    w0a = q_w[0][:audio_dim, :]
    w0b = q_w[0][audio_dim:, :]
    w1 = q_w[1]
    tail_cols = max(p_out[2:])
    tail = jnp.concatenate(
        [jnp.pad(q_w[i], ((0, 0), (0, tail_cols - q_w[i].shape[1])))
         for i in range(2, n_layers)], axis=0)

    # Pack all biases (row 0) and dequant scales (row 1) into one lane-aligned
    # fp32 array -> a single small DMA.
    bias_offsets, b_rows, off = [], [], 0
    for i in range(n_layers):
        bias_offsets.append(off)
        b_rows.append(jnp.pad(biases[i].astype(jnp.float32),
                              (0, p_out[i] - out_dims[i])))
        off += p_out[i]
    bs_packed = jnp.stack([jnp.concatenate(b_rows), jnp.concatenate(scales)])

    w_bytes = sum(int(a.size) * a.dtype.itemsize for a in (w0a, w0b, w1, tail))
    flops = 2 * batch * sum(p_in[i] * p_out[i] for i in range(n_layers))
    bytes_accessed = (audio_vec.size * audio_vec.dtype.itemsize
                      + text_vec.size * text_vec.dtype.itemsize
                      + int(bs_packed.size) * 4 + w_bytes + batch * p_out[-1] * 4)

    vmem = pl.BlockSpec(memory_space=pltpu.MemorySpace.VMEM)
    hbm = pl.BlockSpec(memory_space=pl.ANY)
    kernel = functools.partial(_deep_mlp_kernel, tuple(p_out), tuple(bias_offsets))

    out_padded = pl.pallas_call(
        kernel,
        out_shape=jax.ShapeDtypeStruct((batch, p_out[-1]), jnp.float32),
        in_specs=[vmem, vmem, vmem, hbm, hbm, hbm, hbm],
        out_specs=vmem,
        scratch_shapes=[
            pltpu.VMEM(w0a.shape, w_dtype),
            pltpu.VMEM(w0b.shape, w_dtype),
            pltpu.VMEM(w1.shape, w_dtype),
            pltpu.VMEM(tail.shape, w_dtype),
            pltpu.SemaphoreType.DMA((4,)),
        ],
        compiler_params=pltpu.CompilerParams(vmem_limit_bytes=12 << 20),
        cost_estimate=pl.CostEstimate(flops=flops, transcendentals=0,
                                      bytes_accessed=bytes_accessed),
    )(audio_vec, text_vec, bs_packed, w0a, w0b, w1, tail)

    return out_padded[:, :num_classes]


# ------------------------- parameter construction --------------------------

def init_params(key, audio_dim, text_dim, hidden_dims, num_classes):
    """Deterministic init mimicking nn.Linear default (U(-1/sqrt(fan_in), ...))."""
    dims = [audio_dim + text_dim] + list(hidden_dims) + [num_classes]
    weights, biases = [], []
    for i in range(len(dims) - 1):
        fan_in, fan_out = dims[i], dims[i + 1]
        key, kw, kb = jax.random.split(key, 3)
        bound = 1.0 / (fan_in ** 0.5)
        # Stored as (in, out): transpose of PyTorch's (out, in) layout.
        w = jax.random.uniform(kw, (fan_in, fan_out), jnp.float32, -bound, bound)
        b = jax.random.uniform(kb, (fan_out,), jnp.float32, -bound, bound)
        weights.append(w)
        biases.append(b)
    return weights, biases


def reference_forward(audio_vec, text_vec, weights, biases, *, quantize=True):
    """Pure-JAX reference mirroring the kernel's weight representation
    (int8 per-channel quant + bf16 MXU inputs + fp32 accumulation, eval mode)."""
    x = jnp.concatenate([audio_vec, text_vec], axis=1)
    n = len(weights)
    for i in range(n):
        w = weights[i].astype(jnp.float32)
        if quantize:
            q, s = _quantize_per_col(w)
        else:
            q, s = w, jnp.ones((w.shape[1],), jnp.float32)
        acc = jnp.dot(x.astype(jnp.bfloat16), q.astype(jnp.bfloat16),
                      preferred_element_type=jnp.float32)
        x = acc * s + biases[i].astype(jnp.float32)
        if i < n - 1:
            x = jnp.maximum(x, 0.0)
    return x


# --------------------------------- main ------------------------------------

if __name__ == "__main__":
    AUDIO_DIM = 768
    TEXT_DIM = 768
    HIDDEN_DIMS = [1024, 512, 256, 128, 64]
    NUM_CLASSES = 6
    BATCH = 2

    key = jax.random.PRNGKey(0)
    key, ka, kt, kp = jax.random.split(key, 4)

    audio_vec = jax.random.normal(ka, (BATCH, AUDIO_DIM), jnp.float32)
    text_vec = jax.random.normal(kt, (BATCH, TEXT_DIM), jnp.float32)
    weights, biases = init_params(kp, AUDIO_DIM, TEXT_DIM, HIDDEN_DIMS, NUM_CLASSES)

    out = jax.block_until_ready(
        deep_mlp_forward(audio_vec, text_vec, weights, biases))
    ref = jax.block_until_ready(
        reference_forward(audio_vec, text_vec, weights, biases))

    assert out.shape == (BATCH, NUM_CLASSES), out.shape
    assert jnp.allclose(out, ref, atol=1e-2, rtol=1e-2), (
        "mismatch vs reference: max abs diff = "
        f"{float(jnp.max(jnp.abs(out - ref)))}")

    print("KERNEL_OK")
</pallas_src>

<mosaic_0001>
module attributes {stable_mosaic.version = 11 : i64} {
  func.func @_deep_mlp_kernel(%arg0: memref<2x768xf32, #tpu.memory_space<vmem>>, %arg1: memref<2x768xf32, #tpu.memory_space<vmem>>, %arg2: memref<2x2176xf32, #tpu.memory_space<vmem>>, %arg3: memref<768x1024xi8, #tpu.memory_space<any>>, %arg4: memref<768x1024xi8, #tpu.memory_space<any>>, %arg5: memref<1024x512xi8, #tpu.memory_space<any>>, %arg6: memref<1024x256xi8, #tpu.memory_space<any>>, %arg7: memref<2x128xf32, #tpu.memory_space<vmem>>, %arg8: memref<768x1024xi8, #tpu.memory_space<vmem>>, %arg9: memref<768x1024xi8, #tpu.memory_space<vmem>>, %arg10: memref<1024x512xi8, #tpu.memory_space<vmem>>, %arg11: memref<1024x256xi8, #tpu.memory_space<vmem>>, %arg12: memref<4x!tpu.dma_semaphore, #tpu.memory_space<semaphore_mem>>) attributes {dimension_semantics = [], scalar_prefetch = 0 : i64, scratch_operands = 5 : i64, tpu.core_type = #tpu.core_type<tc>} {
    %c0_i32 = arith.constant 0 : i32
    %0 = tpu.memref_slice %arg12[%c0_i32] : memref<4x!tpu.dma_semaphore, #tpu.memory_space<semaphore_mem>> -> memref<1x!tpu.dma_semaphore, #tpu.memory_space<semaphore_mem>>
    %1 = tpu.memref_squeeze %0 : memref<1x!tpu.dma_semaphore, #tpu.memory_space<semaphore_mem>> -> memref<!tpu.dma_semaphore, #tpu.memory_space<semaphore_mem>>
    tpu.enqueue_dma source(%arg3 : memref<768x1024xi8, #tpu.memory_space<any>>) target(%arg8 : memref<768x1024xi8, #tpu.memory_space<vmem>>) target_semaphore(%1 : memref<!tpu.dma_semaphore, #tpu.memory_space<semaphore_mem>>)
    %c1_i32 = arith.constant 1 : i32
    %2 = tpu.memref_slice %arg12[%c1_i32] : memref<4x!tpu.dma_semaphore, #tpu.memory_space<semaphore_mem>> -> memref<1x!tpu.dma_semaphore, #tpu.memory_space<semaphore_mem>>
    %3 = tpu.memref_squeeze %2 : memref<1x!tpu.dma_semaphore, #tpu.memory_space<semaphore_mem>> -> memref<!tpu.dma_semaphore, #tpu.memory_space<semaphore_mem>>
    tpu.enqueue_dma source(%arg4 : memref<768x1024xi8, #tpu.memory_space<any>>) target(%arg9 : memref<768x1024xi8, #tpu.memory_space<vmem>>) target_semaphore(%3 : memref<!tpu.dma_semaphore, #tpu.memory_space<semaphore_mem>>)
    %c2_i32 = arith.constant 2 : i32
    %4 = tpu.memref_slice %arg12[%c2_i32] : memref<4x!tpu.dma_semaphore, #tpu.memory_space<semaphore_mem>> -> memref<1x!tpu.dma_semaphore, #tpu.memory_space<semaphore_mem>>
    %5 = tpu.memref_squeeze %4 : memref<1x!tpu.dma_semaphore, #tpu.memory_space<semaphore_mem>> -> memref<!tpu.dma_semaphore, #tpu.memory_space<semaphore_mem>>
    tpu.enqueue_dma source(%arg5 : memref<1024x512xi8, #tpu.memory_space<any>>) target(%arg10 : memref<1024x512xi8, #tpu.memory_space<vmem>>) target_semaphore(%5 : memref<!tpu.dma_semaphore, #tpu.memory_space<semaphore_mem>>)
    %c3_i32 = arith.constant 3 : i32
    %6 = tpu.memref_slice %arg12[%c3_i32] : memref<4x!tpu.dma_semaphore, #tpu.memory_space<semaphore_mem>> -> memref<1x!tpu.dma_semaphore, #tpu.memory_space<semaphore_mem>>
    %7 = tpu.memref_squeeze %6 : memref<1x!tpu.dma_semaphore, #tpu.memory_space<semaphore_mem>> -> memref<!tpu.dma_semaphore, #tpu.memory_space<semaphore_mem>>
    tpu.enqueue_dma source(%arg6 : memref<1024x256xi8, #tpu.memory_space<any>>) target(%arg11 : memref<1024x256xi8, #tpu.memory_space<vmem>>) target_semaphore(%7 : memref<!tpu.dma_semaphore, #tpu.memory_space<semaphore_mem>>)
    %c0_i32_0 = arith.constant 0 : i32
    %8 = tpu.memref_slice %arg12[%c0_i32_0] : memref<4x!tpu.dma_semaphore, #tpu.memory_space<semaphore_mem>> -> memref<1x!tpu.dma_semaphore, #tpu.memory_space<semaphore_mem>>
    %9 = tpu.memref_squeeze %8 : memref<1x!tpu.dma_semaphore, #tpu.memory_space<semaphore_mem>> -> memref<!tpu.dma_semaphore, #tpu.memory_space<semaphore_mem>>
    tpu.wait_dma2 semaphore(%9 : memref<!tpu.dma_semaphore, #tpu.memory_space<semaphore_mem>>) src(%arg3 : memref<768x1024xi8, #tpu.memory_space<any>>) dst(%arg8 : memref<768x1024xi8, #tpu.memory_space<vmem>>)
    %c0 = arith.constant 0 : index
    %c0_1 = arith.constant 0 : index
    %10 = vector.load %arg0[%c0, %c0_1] : memref<2x768xf32, #tpu.memory_space<vmem>>, vector<2x768xf32>
    %11 = arith.truncf %10 : vector<2x768xf32> to vector<2x768xbf16>
    %c0_2 = arith.constant 0 : index
    %c0_3 = arith.constant 0 : index
    %12 = vector.load %arg8[%c0_2, %c0_3] : memref<768x1024xi8, #tpu.memory_space<vmem>>, vector<768x1024xi8>
    %13 = arith.sitofp %12 : vector<768x1024xi8> to vector<768x1024xbf16>
    %cst = arith.constant dense<0.000000e+00> : vector<2x1024xf32>
    %14 = tpu.matmul %11, %13, %cst {dimension_numbers = #tpu.dot_dimension_numbers<[1], [0], [0], [1], [0, 0, 1, 1], [], []>} : vector<2x768xbf16>, vector<768x1024xbf16>, vector<2x1024xf32> -> vector<2x1024xf32>
    %c1_i32_4 = arith.constant 1 : i32
    %15 = tpu.memref_slice %arg12[%c1_i32_4] : memref<4x!tpu.dma_semaphore, #tpu.memory_space<semaphore_mem>> -> memref<1x!tpu.dma_semaphore, #tpu.memory_space<semaphore_mem>>
    %16 = tpu.memref_squeeze %15 : memref<1x!tpu.dma_semaphore, #tpu.memory_space<semaphore_mem>> -> memref<!tpu.dma_semaphore, #tpu.memory_space<semaphore_mem>>
    tpu.wait_dma2 semaphore(%16 : memref<!tpu.dma_semaphore, #tpu.memory_space<semaphore_mem>>) src(%arg4 : memref<768x1024xi8, #tpu.memory_space<any>>) dst(%arg9 : memref<768x1024xi8, #tpu.memory_space<vmem>>)
    %c0_5 = arith.constant 0 : index
    %c0_6 = arith.constant 0 : index
    %17 = vector.load %arg1[%c0_5, %c0_6] : memref<2x768xf32, #tpu.memory_space<vmem>>, vector<2x768xf32>
    %18 = arith.truncf %17 : vector<2x768xf32> to vector<2x768xbf16>
    %c0_7 = arith.constant 0 : index
    %c0_8 = arith.constant 0 : index
    %19 = vector.load %arg9[%c0_7, %c0_8] : memref<768x1024xi8, #tpu.memory_space<vmem>>, vector<768x1024xi8>
    %20 = arith.sitofp %19 : vector<768x1024xi8> to vector<768x1024xbf16>
    %cst_9 = arith.constant dense<0.000000e+00> : vector<2x1024xf32>
    %21 = tpu.matmul %18, %20, %cst_9 {dimension_numbers = #tpu.dot_dimension_numbers<[1], [0], [0], [1], [0, 0, 1, 1], [], []>} : vector<2x768xbf16>, vector<768x1024xbf16>, vector<2x1024xf32> -> vector<2x1024xf32>
    %22 = arith.addf %14, %21 : vector<2x1024xf32>
    %c1 = arith.constant 1 : index
    %c0_10 = arith.constant 0 : index
    %23 = vector.load %arg2[%c1, %c0_10] : memref<2x2176xf32, #tpu.memory_space<vmem>>, vector<1x1024xf32>
    %24 = vector.broadcast %23 : vector<1x1024xf32> to vector<2x1024xf32>
    %25 = arith.mulf %22, %24 : vector<2x1024xf32>
    %c0_11 = arith.constant 0 : index
    %c0_12 = arith.constant 0 : index
    %26 = vector.load %arg2[%c0_11, %c0_12] : memref<2x2176xf32, #tpu.memory_space<vmem>>, vector<1x1024xf32>
    %27 = vector.broadcast %26 : vector<1x1024xf32> to vector<2x1024xf32>
    %28 = arith.addf %25, %27 : vector<2x1024xf32>
    %cst_13 = arith.constant 0.000000e+00 : f32
    %29 = vector.broadcast %cst_13 : f32 to vector<2x1024xf32>
    %30 = arith.maximumf %28, %29 : vector<2x1024xf32>
    %c2_i32_14 = arith.constant 2 : i32
    %31 = tpu.memref_slice %arg12[%c2_i32_14] : memref<4x!tpu.dma_semaphore, #tpu.memory_space<semaphore_mem>> -> memref<1x!tpu.dma_semaphore, #tpu.memory_space<semaphore_mem>>
    %32 = tpu.memref_squeeze %31 : memref<1x!tpu.dma_semaphore, #tpu.memory_space<semaphore_mem>> -> memref<!tpu.dma_semaphore, #tpu.memory_space<semaphore_mem>>
    tpu.wait_dma2 semaphore(%32 : memref<!tpu.dma_semaphore, #tpu.memory_space<semaphore_mem>>) src(%arg5 : memref<1024x512xi8, #tpu.memory_space<any>>) dst(%arg10 : memref<1024x512xi8, #tpu.memory_space<vmem>>)
    %33 = arith.truncf %30 : vector<2x1024xf32> to vector<2x1024xbf16>
    %c0_15 = arith.constant 0 : index
    %c0_16 = arith.constant 0 : index
    %34 = vector.load %arg10[%c0_15, %c0_16] : memref<1024x512xi8, #tpu.memory_space<vmem>>, vector<1024x512xi8>
    %35 = arith.sitofp %34 : vector<1024x512xi8> to vector<1024x512xbf16>
    %cst_17 = arith.constant dense<0.000000e+00> : vector<2x512xf32>
    %36 = tpu.matmul %33, %35, %cst_17 {dimension_numbers = #tpu.dot_dimension_numbers<[1], [0], [0], [1], [0, 0, 1, 1], [], []>} : vector<2x1024xbf16>, vector<1024x512xbf16>, vector<2x512xf32> -> vector<2x512xf32>
    %c1_18 = arith.constant 1 : index
    %c1024 = arith.constant 1024 : index
    %37 = vector.load %arg2[%c1_18, %c1024] : memref<2x2176xf32, #tpu.memory_space<vmem>>, vector<1x512xf32>
    %38 = vector.broadcast %37 : vector<1x512xf32> to vector<2x512xf32>
    %39 = arith.mulf %36, %38 : vector<2x512xf32>
    %c0_19 = arith.constant 0 : index
    %c1024_20 = arith.constant 1024 : index
    %40 = vector.load %arg2[%c0_19, %c1024_20] : memref<2x2176xf32, #tpu.memory_space<vmem>>, vector<1x512xf32>
    %41 = vector.broadcast %40 : vector<1x512xf32> to vector<2x512xf32>
    %42 = arith.addf %39, %41 : vector<2x512xf32>
    %cst_21 = arith.constant 0.000000e+00 : f32
    %43 = vector.broadcast %cst_21 : f32 to vector<2x512xf32>
    %44 = arith.maximumf %42, %43 : vector<2x512xf32>
    %c3_i32_22 = arith.constant 3 : i32
    %45 = tpu.memref_slice %arg12[%c3_i32_22] : memref<4x!tpu.dma_semaphore, #tpu.memory_space<semaphore_mem>> -> memref<1x!tpu.dma_semaphore, #tpu.memory_space<semaphore_mem>>
    %46 = tpu.memref_squeeze %45 : memref<1x!tpu.dma_semaphore, #tpu.memory_space<semaphore_mem>> -> memref<!tpu.dma_semaphore, #tpu.memory_space<semaphore_mem>>
    tpu.wait_dma2 semaphore(%46 : memref<!tpu.dma_semaphore, #tpu.memory_space<semaphore_mem>>) src(%arg6 : memref<1024x256xi8, #tpu.memory_space<any>>) dst(%arg11 : memref<1024x256xi8, #tpu.memory_space<vmem>>)
    %c0_23 = arith.constant 0 : index
    %c0_24 = arith.constant 0 : index
    %47 = vector.load %arg11[%c0_23, %c0_24] : memref<1024x256xi8, #tpu.memory_space<vmem>>, vector<512x256xi8>
    %48 = arith.sitofp %47 : vector<512x256xi8> to vector<512x256xbf16>
    %49 = arith.truncf %44 : vector<2x512xf32> to vector<2x512xbf16>
    %cst_25 = arith.constant dense<0.000000e+00> : vector<2x256xf32>
    %50 = tpu.matmul %49, %48, %cst_25 {dimension_numbers = #tpu.dot_dimension_numbers<[1], [0], [0], [1], [0, 0, 1, 1], [], []>} : vector<2x512xbf16>, vector<512x256xbf16>, vector<2x256xf32> -> vector<2x256xf32>
    %c1_26 = arith.constant 1 : index
    %c1536 = arith.constant 1536 : index
    %51 = vector.load %arg2[%c1_26, %c1536] : memref<2x2176xf32, #tpu.memory_space<vmem>>, vector<1x256xf32>
    %52 = vector.broadcast %51 : vector<1x256xf32> to vector<2x256xf32>
    %53 = arith.mulf %50, %52 : vector<2x256xf32>
    %c0_27 = arith.constant 0 : index
    %c1536_28 = arith.constant 1536 : index
    %54 = vector.load %arg2[%c0_27, %c1536_28] : memref<2x2176xf32, #tpu.memory_space<vmem>>, vector<1x256xf32>
    %55 = vector.broadcast %54 : vector<1x256xf32> to vector<2x256xf32>
    %56 = arith.addf %53, %55 : vector<2x256xf32>
    %cst_29 = arith.constant 0.000000e+00 : f32
    %57 = vector.broadcast %cst_29 : f32 to vector<2x256xf32>
    %58 = arith.maximumf %56, %57 : vector<2x256xf32>
    %c512 = arith.constant 512 : index
    %c0_30 = arith.constant 0 : index
    %59 = vector.load %arg11[%c512, %c0_30] : memref<1024x256xi8, #tpu.memory_space<vmem>>, vector<256x128xi8>
    %60 = arith.sitofp %59 : vector<256x128xi8> to vector<256x128xbf16>
    %61 = arith.truncf %58 : vector<2x256xf32> to vector<2x256xbf16>
    %cst_31 = arith.constant dense<0.000000e+00> : vector<2x128xf32>
    %62 = tpu.matmul %61, %60, %cst_31 {dimension_numbers = #tpu.dot_dimension_numbers<[1], [0], [0], [1], [0, 0, 1, 1], [], []>} : vector<2x256xbf16>, vector<256x128xbf16>, vector<2x128xf32> -> vector<2x128xf32>
    %c1_32 = arith.constant 1 : index
    %c1792 = arith.constant 1792 : index
    %63 = vector.load %arg2[%c1_32, %c1792] : memref<2x2176xf32, #tpu.memory_space<vmem>>, vector<1x128xf32>
    %64 = vector.broadcast %63 : vector<1x128xf32> to vector<2x128xf32>
    %65 = arith.mulf %62, %64 : vector<2x128xf32>
    %c0_33 = arith.constant 0 : index
    %c1792_34 = arith.constant 1792 : index
    %66 = vector.load %arg2[%c0_33, %c1792_34] : memref<2x2176xf32, #tpu.memory_space<vmem>>, vector<1x128xf32>
    %67 = vector.broadcast %66 : vector<1x128xf32> to vector<2x128xf32>
    %68 = arith.addf %65, %67 : vector<2x128xf32>
    %cst_35 = arith.constant 0.000000e+00 : f32
    %69 = vector.broadcast %cst_35 : f32 to vector<2x128xf32>
    %70 = arith.maximumf %68, %69 : vector<2x128xf32>
    %c768 = arith.constant 768 : index
    %c0_36 = arith.constant 0 : index
    %71 = vector.load %arg11[%c768, %c0_36] : memref<1024x256xi8, #tpu.memory_space<vmem>>, vector<128x128xi8>
    %72 = arith.sitofp %71 : vector<128x128xi8> to vector<128x128xbf16>
    %73 = arith.truncf %70 : vector<2x128xf32> to vector<2x128xbf16>
    %cst_37 = arith.constant dense<0.000000e+00> : vector<2x128xf32>
    %74 = tpu.matmul %73, %72, %cst_37 {dimension_numbers = #tpu.dot_dimension_numbers<[1], [0], [0], [1], [0, 0, 1, 1], [], []>} : vector<2x128xbf16>, vector<128x128xbf16>, vector<2x128xf32> -> vector<2x128xf32>
    %c1_38 = arith.constant 1 : index
    %c1920 = arith.constant 1920 : index
    %75 = vector.load %arg2[%c1_38, %c1920] : memref<2x2176xf32, #tpu.memory_space<vmem>>, vector<1x128xf32>
    %76 = vector.broadcast %75 : vector<1x128xf32> to vector<2x128xf32>
    %77 = arith.mulf %74, %76 : vector<2x128xf32>
    %c0_39 = arith.constant 0 : index
    %c1920_40 = arith.constant 1920 : index
    %78 = vector.load %arg2[%c0_39, %c1920_40] : memref<2x2176xf32, #tpu.memory_space<vmem>>, vector<1x128xf32>
    %79 = vector.broadcast %78 : vector<1x128xf32> to vector<2x128xf32>
    %80 = arith.addf %77, %79 : vector<2x128xf32>
    %cst_41 = arith.constant 0.000000e+00 : f32
    %81 = vector.broadcast %cst_41 : f32 to vector<2x128xf32>
    %82 = arith.maximumf %80, %81 : vector<2x128xf32>
    %c896 = arith.constant 896 : index
    %c0_42 = arith.constant 0 : index
    %83 = vector.load %arg11[%c896, %c0_42] : memref<1024x256xi8, #tpu.memory_space<vmem>>, vector<128x128xi8>
    %84 = arith.sitofp %83 : vector<128x128xi8> to vector<128x128xbf16>
    %85 = arith.truncf %82 : vector<2x128xf32> to vector<2x128xbf16>
    %cst_43 = arith.constant dense<0.000000e+00> : vector<2x128xf32>
    %86 = tpu.matmul %85, %84, %cst_43 {dimension_numbers = #tpu.dot_dimension_numbers<[1], [0], [0], [1], [0, 0, 1, 1], [], []>} : vector<2x128xbf16>, vector<128x128xbf16>, vector<2x128xf32> -> vector<2x128xf32>
    %c1_44 = arith.constant 1 : index
    %c2048 = arith.constant 2048 : index
    %87 = vector.load %arg2[%c1_44, %c2048] : memref<2x2176xf32, #tpu.memory_space<vmem>>, vector<1x128xf32>
    %88 = vector.broadcast %87 : vector<1x128xf32> to vector<2x128xf32>
    %89 = arith.mulf %86, %88 : vector<2x128xf32>
    %c0_45 = arith.constant 0 : index
    %c2048_46 = arith.constant 2048 : index
    %90 = vector.load %arg2[%c0_45, %c2048_46] : memref<2x2176xf32, #tpu.memory_space<vmem>>, vector<1x128xf32>
    %91 = vector.broadcast %90 : vector<1x128xf32> to vector<2x128xf32>
    %92 = arith.addf %89, %91 : vector<2x128xf32>
    %c0_47 = arith.constant 0 : index
    %c0_48 = arith.constant 0 : index
    %93 = vector.load %arg7[%c0_47, %c0_48] : memref<2x128xf32, #tpu.memory_space<vmem>>, vector<2x128xf32>
    tpu.vector_store %arg7[%c0_47, %c0_48], %92 {strides = array<i32>} : memref<2x128xf32, #tpu.memory_space<vmem>>, vector<2x128xf32>,
    return
  }
}

</mosaic_0001>

<bundles_post_ra>
// kernel: tpu_custom_call.1
= control target key start
LH: loop header
LB: loop body
LE: loop exit
PB: predicated region body
PF: predicated region fallthrough
CT: control target
= control target key end

     0   :  { %12 = vsyncpa [#allocation8], 0  ;;  %s5998_s0 = inlined_call_operand.hbm [shape: f32[2,768], index: 0, kind: input, shape index: {}]   ;;  %s5999_s1 = inlined_call_operand.hbm [shape: f32[2,768], index: 1, kind: input, shape index: {}]   ;;  %s6000_s2 = inlined_call_operand.hbm [shape: f32[2,2176], index: 2, kind: input, shape index: {}]   ;;  %s6001_s3 = inlined_call_operand.hbm [shape: s8[768,1024], index: 3, kind: input, shape index: {}]   ;;  %s6002_s4 = inlined_call_operand.hbm [shape: s8[768,1024], index: 4, kind: input, shape index: {}]   ;;  %s6003_s5 = inlined_call_operand.hbm [shape: s8[1024,512], index: 5, kind: input, shape index: {}]   ;;  %s6004_s6 = inlined_call_operand.hbm [shape: s8[1024,256], index: 6, kind: input, shape index: {}]   ;;  %s6005_s7 = inlined_call_operand.hbm [shape: f32[2,128], index: 7, kind: output, shape index: {}]  }
   0x1   :  { %13 = vsyncpa [#allocation11], 0 }
   0x2   :  { %14 = vsyncpa [#allocation9], 0  ;;  %s4091_s24 = smov [#allocation10]   ;;  %s4092_s26 = smov [#allocation7]  }
   0x3   :  { %s31_s25 = sshll.u32 %s4091_s24, 4  ;;  %s21_s27 = sshll.u32 %s4092_s26, 4  ;;  %s32_s25 = int_to_ptr.vmem [resolvable:$true] %s31_s25  ;;  %s22_s27 = int_to_ptr.vmem [resolvable:$true] %s21_s27 }
   0x4   :  { %s3901_s30 = scalar_lea.hbm %s5999_s1, 192 }
   0x5   :  { %p3902_p0 = scmp.ne.s32.totalorder %s5999_s1, %s3901_s30  ;;  %p3905_p1 = scmp.lt.u32.totalorder %s3901_s30, %s5999_s1 }
   0x7   :  { %p3907_p2 = pnand %p3905_p1, %p3902_p0 }
   0x9   :  { %3910 = shalt.err (!%p3907_p2)
}
   0xa   :  { %s3911_s12 = scalar_lea.vmem %s32_s25, 192  ;;  %p3916_p4 = scmp.lt.s32.totalorder %s32_s25, %s32_s25 }
   0xb   :  { %p3912_p3 = scmp.ne.s32.totalorder %s32_s25, %s3911_s12  ;;  %p3917_p5 = scmp.lt.s32.totalorder %s3911_s12, %s3911_s12 }
   0xd   :  { %p3918_p6 = por %p3917_p5, %p3916_p4 }
   0xf   :  { %p3919_p7 = pnand %p3918_p6, %p3912_p3 }
  0x11   :  { %3922 = shalt.err (!%p3919_p7)
}
  0x12   :  { %34 = dma.hbm_to_vmem [thread:$0]  %s5999_s1, 192, %s32_s25, [#allocation11]  }
  0x13   :  { %s3923_s17 = scalar_lea.hbm %s5998_s0, 192 }
  0x14   :  { %p3924_p8 = scmp.ne.s32.totalorder %s5998_s0, %s3923_s17  ;;  %p3927_p9 = scmp.lt.u32.totalorder %s3923_s17, %s5998_s0 }
  0x16   :  { %p3929_p10 = pnand %p3927_p9, %p3924_p8 }
  0x18   :  { %3932 = shalt.err (!%p3929_p10)
}
  0x19   :  { %s3933_s22 = scalar_lea.vmem %s22_s27, 192  ;;  %p3938_p12 = scmp.lt.s32.totalorder %s22_s27, %s22_s27 }
  0x1a   :  { %p3934_p11 = scmp.ne.s32.totalorder %s22_s27, %s3933_s22  ;;  %p3939_p13 = scmp.lt.s32.totalorder %s3933_s22, %s3933_s22 }
  0x1c   :  { %p3940_p0 = por %p3939_p13, %p3938_p12 }
  0x1e   :  { %p3941_p1 = pnand %p3940_p0, %p3934_p11 }
  0x20   :  { %3944 = shalt.err (!%p3941_p1)
}
  0x21   :  { %24 = dma.hbm_to_vmem [thread:$0]  %s5998_s0, 192, %s22_s27, [#allocation8]  }
  0x22   :  { %s4093_s24 = smov [#allocation12]   ;;  %s3945_s29 = scalar_lea.hbm %s6000_s2, 544 }
  0x23   :  { %s41_s25 = sshll.u32 %s4093_s24, 4  ;;  %p3946_p2 = scmp.ne.s32.totalorder %s6000_s2, %s3945_s29  ;;  %s42_s25 = int_to_ptr.vmem [resolvable:$true] %s41_s25 }
  0x24   :  { %p3949_p3 = scmp.lt.u32.totalorder %s3945_s29, %s6000_s2 }
  0x26   :  { %p3951_p4 = pnand %p3949_p3, %p3946_p2 }
  0x28   :  { %3954 = shalt.err (!%p3951_p4)
}
  0x29   :  { %s3955_s11 = scalar_lea.vmem %s42_s25, 544  ;;  %p3960_p6 = scmp.lt.s32.totalorder %s42_s25, %s42_s25 }
  0x2a   :  { %p3956_p5 = scmp.ne.s32.totalorder %s42_s25, %s3955_s11  ;;  %p3961_p7 = scmp.lt.s32.totalorder %s3955_s11, %s3955_s11 }
  0x2c   :  { %p3962_p8 = por %p3961_p7, %p3960_p6 }
  0x2e   :  { %p3963_p9 = pnand %p3962_p8, %p3956_p5 }
  0x30   :  { %3966 = shalt.err (!%p3963_p9)
}
  0x31   :  { %44 = dma.hbm_to_vmem [thread:$0]  %s6000_s2, 544, %s42_s25, [#allocation11]  }
  0x32   :  { %4077 = dma.done.wait [#allocation8], 192  }
  0x33   :  { %4078 = vsyncadd [#allocation8], 4294967104 }
  0x34   :  { %4079 = dma.done.wait [#allocation11], 736  }
  0x35   :  { %4080 = vsyncadd [#allocation11], 4294966560  ;;  %s4094_s12 = smov [#allocation2]   ;;  %s4095_s14 = smov [#allocation3]  }
  0x36   :  { %s62_s13 = sshll.u32 %s4094_s12, 4  ;;  %s74_s15 = sshll.u32 %s4095_s14, 4  ;;  %s63_s13 = int_to_ptr.vmem [resolvable:$true] %s62_s13  ;;  %s75_s15 = int_to_ptr.vmem [resolvable:$true] %s74_s15 }
  0x37   :  { %s3967_s18 = scalar_lea.hbm %s6001_s3, 24576 }
  0x38   :  { %p3968_p10 = scmp.ne.s32.totalorder %s6001_s3, %s3967_s18  ;;  %p3971_p11 = scmp.lt.u32.totalorder %s3967_s18, %s6001_s3 }
  0x3a   :  { %p3973_p12 = pnand %p3971_p11, %p3968_p10 }
  0x3c   :  { %3976 = shalt.err (!%p3973_p12)  }
  0x3d   :  { %s3977_s22 = scalar_lea.vmem %s63_s13, 24576  ;;  %p3982_p0 = scmp.lt.s32.totalorder %s63_s13, %s63_s13 }
  0x3e   :  { %p3978_p13 = scmp.ne.s32.totalorder %s63_s13, %s3977_s22  ;;  %p3983_p1 = scmp.lt.s32.totalorder %s3977_s22, %s3977_s22 }
  0x40   :  { %p3984_p2 = por %p3983_p1, %p3982_p0 }
  0x42   :  { %p3985_p3 = pnand %p3984_p2, %p3978_p13 }
  0x44   :  { %3988 = shalt.err (!%p3985_p3)  }
  0x45   :  { %65 = dma.hbm_to_vmem [thread:$0]  %s6001_s3, 24576, %s63_s13, [#allocation6] }
  0x46   :  { %s3989_s26 = scalar_lea.hbm %s6002_s4, 24576 }
  0x47   :  { %p3990_p4 = scmp.ne.s32.totalorder %s6002_s4, %s3989_s26  ;;  %p3993_p5 = scmp.lt.u32.totalorder %s3989_s26, %s6002_s4 }
  0x49   :  { %p3995_p6 = pnand %p3993_p5, %p3990_p4 }
  0x4b   :  { %3998 = shalt.err (!%p3995_p6)  }
  0x4c   :  { %s3999_s9 = scalar_lea.vmem %s75_s15, 24576  ;;  %p4004_p8 = scmp.lt.s32.totalorder %s75_s15, %s75_s15 }
  0x4d   :  { %p4000_p7 = scmp.ne.s32.totalorder %s75_s15, %s3999_s9  ;;  %p4005_p9 = scmp.lt.s32.totalorder %s3999_s9, %s3999_s9 }
  0x4f   :  { %p4006_p10 = por %p4005_p9, %p4004_p8 }
  0x51   :  { %p4007_p11 = pnand %p4006_p10, %p4000_p7 }
  0x53   :  { %4010 = shalt.err (!%p4007_p11)  }
  0x54   :  { %77 = dma.hbm_to_vmem [thread:$0]  %s6002_s4, 24576, %s75_s15, [#allocation6 + $0x1] }
  0x55   :  { %s4096_s11 = smov [#allocation4]   ;;  %s4097_s27 = smov [#allocation5]  }
  0x56   :  { %s86_s0 = sshll.u32 %s4096_s11, 4  ;;  %s98_s12 = sshll.u32 %s4097_s27, 4  ;;  %s87_s0 = int_to_ptr.vmem [resolvable:$true] %s86_s0  ;;  %s99_s12 = int_to_ptr.vmem [resolvable:$true] %s98_s12 }
  0x57   :  { %s4011_s16 = scalar_lea.hbm %s6003_s5, 16384 }
  0x58   :  { %p4012_p12 = scmp.ne.s32.totalorder %s6003_s5, %s4011_s16  ;;  %p4015_p13 = scmp.lt.u32.totalorder %s4011_s16, %s6003_s5 }
  0x5a   :  { %p4017_p0 = pnand %p4015_p13, %p4012_p12 }
  0x5c   :  { %4020 = shalt.err (!%p4017_p0)  }
  0x5d   :  { %s4021_s4 = scalar_lea.vmem %s87_s0, 16384  ;;  %p4026_p2 = scmp.lt.s32.totalorder %s87_s0, %s87_s0 }
  0x5e   :  { %p4022_p1 = scmp.ne.s32.totalorder %s87_s0, %s4021_s4  ;;  %p4027_p3 = scmp.lt.s32.totalorder %s4021_s4, %s4021_s4 }
  0x60   :  { %p4028_p4 = por %p4027_p3, %p4026_p2 }
  0x62   :  { %p4029_p5 = pnand %p4028_p4, %p4022_p1 }
  0x64   :  { %4032 = shalt.err (!%p4029_p5)  }
  0x65   :  { %89 = dma.hbm_to_vmem [thread:$0]  %s6003_s5, 16384, %s87_s0, [#allocation6 + $0x2] }
  0x66   :  { %s4033_s1 = scalar_lea.hbm %s6004_s6, 8192 }
  0x67   :  { %p4034_p6 = scmp.ne.s32.totalorder %s6004_s6, %s4033_s1  ;;  %p4037_p7 = scmp.lt.u32.totalorder %s4033_s1, %s6004_s6 }
  0x69   :  { %p4039_p8 = pnand %p4037_p7, %p4034_p6 }
  0x6b   :  { %4042 = shalt.err (!%p4039_p8)  }
  0x6c   :  { %s4043_s28 = scalar_lea.vmem %s99_s12, 8192  ;;  %p4048_p10 = scmp.lt.s32.totalorder %s99_s12, %s99_s12 }
  0x6d   :  { %p4044_p9 = scmp.ne.s32.totalorder %s99_s12, %s4043_s28  ;;  %p4049_p11 = scmp.lt.s32.totalorder %s4043_s28, %s4043_s28 }
  0x6f   :  { %p4050_p12 = por %p4049_p11, %p4048_p10 }
  0x71   :  { %p4051_p13 = pnand %p4050_p12, %p4044_p9 }
  0x73   :  { %4054 = shalt.err (!%p4051_p13)  }
  0x74   :  { %101 = dma.hbm_to_vmem [thread:$0]  %s6004_s6, 8192, %s99_s12, [#allocation6 + $0x3] }
  0x75   :  { %4081 = dma.done.wait [#allocation6], 24576 }
  0x76   :  { %4082 = vsyncadd [#allocation6], 4294942720  ;;  %v114_v0 = vlaneseq  ;;  %v4098_v1 = vmov 1983009808   ;;  %v106_v6 = vld [vmem:[#allocation7] sm:$0xff]  ;;  %v4236_v13 = vld [vmem:[#allocation2 + $0x8] sm:$0xff] }
  0x77   :  { %v112_v2 = vunpack.c.l.s4 %v4098_v1  ;;  %v3688_v7 = vld.sshfl [vmem:[#allocation7 + $0x8] sm:$0x33 pattern:$0x76325410]  ;;  %v4231_v8 = vld [vmem:[#allocation2] sm:$0xff]  ;;  %v110_v9 = vcombine.high %v106_v6, %v106_v6  ;;  %v4238_v14 = vld [vmem:[#allocation2 + $0x10] sm:$0xff] }
  0x78   :  { %v4226_v3 = vshrl.u32 %v114_v0, 7  ;;  %v134_v11 = vcombine.high %v3688_v7, %v3688_v7  ;;  %v4234_v12 = vpack.c.bf16 %v3688_v7, %v3688_v7  ;;  %v4240_v15 = vld [vmem:[#allocation2 + $0x18] sm:$0xff]  ;;  %v4242_v16 = vld [vmem:[#allocation2 + $0x20] sm:$0xff]  ;;  %v4244_v17 = vld [vmem:[#allocation2 + $0x28] sm:$0xff] }
  0x79   :  { %v113_v4 = vunpack.c.0.s8 %v112_v2  ;;  %6326 = vst [vmem:[#allocation33_spill] sm:$0xff] %v4242_v16  ;;  %6327 = vst [vmem:[#allocation34_spill] sm:$0xff] %v4244_v17  ;;  %v4246_v18 = vld [vmem:[#allocation2 + $0x30] sm:$0xff]  ;;  %v4257_v27 = vld [vmem:[#allocation2 + $0x38] sm:$0xff] }
  0x7a   :  { %6324 = vst [vmem:[#allocation31_spill] sm:$0xff] %v4226_v3  ;;  %6325 = vst [vmem:[#allocation32_spill] sm:$0xff] %v4234_v12  ;;  %v4255_v26 = vpack.c.bf16 %v134_v11, %v134_v11  ;;  %v4259_v28 = vld [vmem:[#allocation2 + $0x40] sm:$0xff]  ;;  %v4261_v29 = vld [vmem:[#allocation2 + $0x48] sm:$0xff] }
  0x7b   :  { %v4229_v5 = vsub.s32 %v113_v4, %v4226_v3  ;;  %6328 = vst [vmem:[#allocation35_spill] sm:$0xff] %v4246_v18  ;;  %6330 = vst [vmem:[#allocation37_spill] sm:$0xff] %v4257_v27  ;;  %v4271_v37 = vld [vmem:[#allocation2 + $0x50] sm:$0xff]  ;;  %v4273_v38 = vld [vmem:[#allocation2 + $0x58] sm:$0xff] }
  0x7c   :  { %6329 = vst [vmem:[#allocation36_spill] sm:$0xff] %v4255_v26  ;;  %v4275_v39 = vld [vmem:[#allocation2 + $0x60] sm:$0xff]  ;;  %v4278_v41 = vld [vmem:[#allocation2 + $0x68] sm:$0xff]  ;;  %v4280_v42 = vld [vmem:[#allocation2 + $0x70] sm:$0xff] }
  0x7d   :  { %v117_v10 = vrot.slane %v106_v6, %v4229_v5  ;;  %v124_v23 = vrot.slane %v110_v9, %v4229_v5  ;;  %6332 = vst [vmem:[#allocation39_spill] sm:$0xff] %v4275_v39  ;;  %6333 = vst [vmem:[#allocation40_spill] sm:$0xff] %v4278_v41  ;;  %v4282_v43 = vld [vmem:[#allocation2 + $0x78] sm:$0xff]  ;;  %v4293_v52 = vld [vmem:[#allocation2 + $0x80] sm:$0xff] }
  0x7e   :  { %6334 = vst [vmem:[#allocation41_spill] sm:$0xff] %v4280_v42  ;;  %6335 = vst [vmem:[#allocation42_spill] sm:$0xff] %v4282_v43  ;;  %v4295_v53 = vld [vmem:[#allocation2 + $0x88] sm:$0xff]  ;;  %v4301_v58 = vld [vmem:[#allocation2 + $0x90] sm:$0xff] }
  0x7f   :  { %v125_v24 = vcombine.high %v117_v10, %v117_v10  ;;  %v4253_v25 = vpack.c.bf16 %v117_v10, %v117_v10  ;;  %v126_v34 = vcombine.high %v124_v23, %v124_v23  ;;  %v4269_v36 = vpack.c.bf16 %v124_v23, %v124_v23  ;;  %v4303_v59 = vld [vmem:[#allocation2 + $0x98] sm:$0xff]  ;;  %v4305_v60 = vld [vmem:[#allocation2 + $0xa0] sm:$0xff]  ;;  %v4311_v1 = vld [vmem:[#allocation2 + $0xa8] sm:$0xff] }
  0x80   :  { %6337 = vst [vmem:[#allocation44_spill] sm:$0xff] %v4305_v60  ;;  %6338 = vst [vmem:[#allocation45_spill] sm:$0xff] %v4311_v1  ;;  %v4313_v2 = vld [vmem:[#allocation2 + $0xb0] sm:$0xff]  ;;  %v4315_v4 = vld [vmem:[#allocation2 + $0xb8] sm:$0xff] }
  0x81   :  { %v4267_v35 = vpack.c.bf16 %v125_v24, %v125_v24  ;;  %6331 = vst [vmem:[#allocation38_spill] sm:$0xff] %v4269_v36  ;;  %v4288_v48 = vpack.c.bf16 %v126_v34, %v126_v34  ;;  %6339 = vst [vmem:[#allocation46_spill] sm:$0xff] %v4313_v2  ;;  %v4325_v63 = vld [vmem:[#allocation2 + $0xc0] sm:$0xff]  ;;  %v4327_v61 = vld [vmem:[#allocation2 + $0xc8] sm:$0xff] }
  0x82   :  { %6340 = vst [vmem:[#allocation47_spill] sm:$0xff] %v4315_v4  ;;  %v4333_v51 = vld [vmem:[#allocation2 + $0xd0] sm:$0xff]  ;;  %v4335_v11 = vld [vmem:[#allocation2 + $0xd8] sm:$0xff]  ;;  %v4337_v23 = vld [vmem:[#allocation2 + $0xe0] sm:$0xff] }
  0x83   :  { %6336 = vst [vmem:[#allocation43_spill] sm:$0xff] %v4288_v48  ;;  %6341 = vst [vmem:[#allocation48_spill] sm:$0xff] %v4337_v23  ;;  %v4343_v30 = vld [vmem:[#allocation2 + $0xe8] sm:$0xff]  ;;  %v4345_v33 = vld [vmem:[#allocation2 + $0xf0] sm:$0xff] }
  0x84   :  { %6342 = vst [vmem:[#allocation49_spill] sm:$0xff] %v4343_v30  ;;  %6343 = vst [vmem:[#allocation50_spill] sm:$0xff] %v4345_v33  ;;  %v4347_v31 = vld [vmem:[#allocation2 + $0xf8] sm:$0xff]  ;;  %v4357_v9 = vld [vmem:[#allocation2 + $0x100] sm:$0xff] }
  0x85   :  { %6344 = vst [vmem:[#allocation51_spill] sm:$0xff] %v4347_v31  ;;  %v4359_v6 = vld [vmem:[#allocation2 + $0x108] sm:$0xff]  ;;  %v4365_v10 = vld [vmem:[#allocation2 + $0x110] sm:$0xff]  ;;  %v4367_v34 = vld [vmem:[#allocation2 + $0x118] sm:$0xff] }
  0x86   :  { %v4369_v49 = vld [vmem:[#allocation2 + $0x120] sm:$0xff]  ;;  %v4375_v56 = vld [vmem:[#allocation2 + $0x128] sm:$0xff]  ;;  %v4377_v0 = vld [vmem:[#allocation2 + $0x130] sm:$0xff] }
  0x87   :  { %6345 = vst [vmem:[#allocation52_spill] sm:$0xff] %v4369_v49  ;;  %6346 = vst [vmem:[#allocation53_spill] sm:$0xff] %v4375_v56  ;;  %v4379_v47 = vld [vmem:[#allocation2 + $0x138] sm:$0xff]  ;;  %v4389_v45 = vld [vmem:[#allocation2 + $0x140] sm:$0xff] }
  0x88   :  { %6347 = vst [vmem:[#allocation54_spill] sm:$0xff] %v4377_v0  ;;  %6348 = vst [vmem:[#allocation55_spill] sm:$0xff] %v4379_v47  ;;  %v4391_v40 = vld [vmem:[#allocation2 + $0x148] sm:$0xff]  ;;  %v4397_v46 = vld [vmem:[#allocation2 + $0x150] sm:$0xff] }
  0x89   :  { %v4399_v62 = vld [vmem:[#allocation2 + $0x158] sm:$0xff]  ;;  %v4401_v7 = vld [vmem:[#allocation2 + $0x160] sm:$0xff]  ;;  %v4407_v21 = vld [vmem:[#allocation2 + $0x168] sm:$0xff] }
  0x8a   :  { %6349 = vst [vmem:[#allocation56_spill] sm:$0xff] %v4401_v7  ;;  %6350 = vst [vmem:[#allocation57_spill] sm:$0xff] %v4407_v21  ;;  %v4409_v54 = vld [vmem:[#allocation2 + $0x170] sm:$0xff]  ;;  %v4411_v57 = vld [vmem:[#allocation2 + $0x178] sm:$0xff] }
  0x8b   :  { %6351 = vst [vmem:[#allocation58_spill] sm:$0xff] %v4409_v54  ;;  %6352 = vst [vmem:[#allocation59_spill] sm:$0xff] %v4411_v57  ;;  %v4421_v3 = vld [vmem:[#allocation2 + $0x180] sm:$0xff]  ;;  %v4423_v33 = vld [vmem:[#allocation2 + $0x188] sm:$0xff] }
  0x8c   :  { %v4429_v23 = vld [vmem:[#allocation2 + $0x190] sm:$0xff]  ;;  %v4431_v55 = vld [vmem:[#allocation2 + $0x198] sm:$0xff]  ;;  %v4433_v44 = vld [vmem:[#allocation2 + $0x1a0] sm:$0xff] }
  0x8d   :  { %6353 = vst [vmem:[#allocation60_spill] sm:$0xff] %v4433_v44  ;;  %v4439_v49 = vld [vmem:[#allocation2 + $0x1a8] sm:$0xff]  ;;  %v4441_v19 = vld [vmem:[#allocation2 + $0x1b0] sm:$0xff]  ;;  %v4443_v22 = vld [vmem:[#allocation2 + $0x1b8] sm:$0xff] }
  0x8e   :  { %6354 = vst [vmem:[#allocation61_spill] sm:$0xff] %v4439_v49  ;;  %6355 = vst [vmem:[#allocation62_spill] sm:$0xff] %v4441_v19  ;;  %v4453_v30 = vld [vmem:[#allocation2 + $0x1c0] sm:$0xff]  ;;  %v4455_v2 = vld [vmem:[#allocation2 + $0x1c8] sm:$0xff] }
  0x8f   :  { %6356 = vst [vmem:[#allocation63_spill] sm:$0xff] %v4443_v22  ;;  %v4461_v60 = vld [vmem:[#allocation2 + $0x1d0] sm:$0xff]  ;;  %v4463_v20 = vld [vmem:[#allocation2 + $0x1d8] sm:$0xff]  ;;  %v4465_v0 = vld [vmem:[#allocation2 + $0x1e0] sm:$0xff] }
  0x90   :  { %6357 = vst [vmem:[#allocation64_spill] sm:$0xff] %v4465_v0  ;;  %v4471_v7 = vld [vmem:[#allocation2 + $0x1e8] sm:$0xff]  ;;  %v4473_v47 = vld [vmem:[#allocation2 + $0x1f0] sm:$0xff]  ;;  %v4475_v56 = vld [vmem:[#allocation2 + $0x1f8] sm:$0xff] }
  0x91   :  { %6358 = vst [vmem:[#allocation65_spill] sm:$0xff] %v4471_v7  ;;  %6359 = vst [vmem:[#allocation66_spill] sm:$0xff] %v4473_v47  ;;  %v4485_v1 = vld [vmem:[#allocation2 + $0x200] sm:$0xff]  ;;  %v4487_v42 = vld [vmem:[#allocation2 + $0x208] sm:$0xff] }
  0x92   :  { %6360 = vst [vmem:[#allocation67_spill] sm:$0xff] %v4475_v56  ;;  %v4493_v39 = vld [vmem:[#allocation2 + $0x210] sm:$0xff]  ;;  %v4495_v31 = vld [vmem:[#allocation2 + $0x218] sm:$0xff]  ;;  %v4497_v54 = vld [vmem:[#allocation2 + $0x220] sm:$0xff] }
  0x93   :  { %6361 = vst [vmem:[#allocation68_spill] sm:$0xff] %v4493_v39  ;;  %6362 = vst [vmem:[#allocation69_spill] sm:$0xff] %v4497_v54  ;;  %v4503_v44 = vld [vmem:[#allocation2 + $0x228] sm:$0xff]  ;;  %v4505_v57 = vld [vmem:[#allocation2 + $0x230] sm:$0xff] }
  0x94   :  { %6363 = vst [vmem:[#allocation70_spill] sm:$0xff] %v4503_v44  ;;  %6364 = vst [vmem:[#allocation71_spill] sm:$0xff] %v4505_v57  ;;  %v4507_v21 = vld [vmem:[#allocation2 + $0x238] sm:$0xff]  ;;  %v4517_v41 = vld [vmem:[#allocation2 + $0x240] sm:$0xff] }
  0x95   :  { %6365 = vst [vmem:[#allocation72_spill] sm:$0xff] %v4507_v21  ;;  %6366 = vst [vmem:[#allocation73_spill] sm:$0xff] %v4517_v41  ;;  %v4519_v18 = vld [vmem:[#allocation2 + $0x248] sm:$0xff]  ;;  %v4525_v16 = vld [vmem:[#allocation2 + $0x250] sm:$0xff] }
  0x96   :  { %6367 = vst [vmem:[#allocation74_spill] sm:$0xff] %v4519_v18  ;;  %6368 = vst [vmem:[#allocation75_spill] sm:$0xff] %v4525_v16  ;;  %v4527_v4 = vld [vmem:[#allocation2 + $0x258] sm:$0xff]  ;;  %v4529_v19 = vld [vmem:[#allocation2 + $0x260] sm:$0xff] }
  0x97   :  { %6369 = vst [vmem:[#allocation76_spill] sm:$0xff] %v4527_v4  ;;  %6370 = vst [vmem:[#allocation77_spill] sm:$0xff] %v4529_v19  ;;  %v4535_v0 = vld [vmem:[#allocation2 + $0x268] sm:$0xff]  ;;  %v4537_v22 = vld [vmem:[#allocation2 + $0x270] sm:$0xff] }
  0x98   :  { %6371 = vst [vmem:[#allocation78_spill] sm:$0xff] %v4535_v0  ;;  %6372 = vst [vmem:[#allocation79_spill] sm:$0xff] %v4537_v22  ;;  %v4539_v49 = vld [vmem:[#allocation2 + $0x278] sm:$0xff]  ;;  %v4549_v27 = vld [vmem:[#allocation2 + $0x280] sm:$0xff] }
  0x99   :  { %6373 = vst [vmem:[#allocation80_spill] sm:$0xff] %v4539_v49  ;;  %6374 = vst [vmem:[#allocation81_spill] sm:$0xff] %v4549_v27  ;;  %v4551_v17 = vld [vmem:[#allocation2 + $0x288] sm:$0xff]  ;;  %v4557_v26 = vld [vmem:[#allocation2 + $0x290] sm:$0xff] }
  0x9a   :  { %6375 = vst [vmem:[#allocation82_spill] sm:$0xff] %v4551_v17  ;;  %6376 = vst [vmem:[#allocation83_spill] sm:$0xff] %v4557_v26  ;;  %v4559_v43 = vld [vmem:[#allocation2 + $0x298] sm:$0xff]  ;;  %v4561_v47 = vld [vmem:[#allocation2 + $0x2a0] sm:$0xff] }
  0x9b   :  { %6377 = vst [vmem:[#allocation84_spill] sm:$0xff] %v4559_v43  ;;  %6378 = vst [vmem:[#allocation85_spill] sm:$0xff] %v4561_v47  ;;  %v4567_v54 = vld [vmem:[#allocation2 + $0x2a8] sm:$0xff]  ;;  %v4569_v56 = vld [vmem:[#allocation2 + $0x2b0] sm:$0xff] }
  0x9c   :  { %6379 = vst [vmem:[#allocation86_spill] sm:$0xff] %v4567_v54  ;;  %6380 = vst [vmem:[#allocation87_spill] sm:$0xff] %v4569_v56  ;;  %v4571_v7 = vld [vmem:[#allocation2 + $0x2b8] sm:$0xff]  ;;  %v4581_v48 = vld [vmem:[#allocation2 + $0x2c0] sm:$0xff] }
  0x9d   :  { %6381 = vst [vmem:[#allocation88_spill] sm:$0xff] %v4571_v7  ;;  %6382 = vst [vmem:[#allocation89_spill] sm:$0xff] %v4581_v48  ;;  %v4583_v39 = vld [vmem:[#allocation2 + $0x2c8] sm:$0xff]  ;;  %v4589_v16 = vld [vmem:[#allocation2 + $0x2d0] sm:$0xff] }
  0x9e   :  { %6383 = vst [vmem:[#allocation90_spill] sm:$0xff] %v4583_v39  ;;  %6384 = vst [vmem:[#allocation91_spill] sm:$0xff] %v4589_v16  ;;  %v4591_v12 = vld [vmem:[#allocation2 + $0x2d8] sm:$0xff]  ;;  %v4593_v57 = vld [vmem:[#allocation2 + $0x2e0] sm:$0xff] }
  0x9f   :  { %6385 = vst [vmem:[#allocation92_spill] sm:$0xff] %v4591_v12  ;;  %6386 = vst [vmem:[#allocation93_spill] sm:$0xff] %v4593_v57  ;;  %v4599_v19 = vld [vmem:[#allocation2 + $0x2e8] sm:$0xff]  ;;  %v4601_v21 = vld [vmem:[#allocation2 + $0x2f0] sm:$0xff] }
  0xa0   :  { %6387 = vst [vmem:[#allocation94_spill] sm:$0xff] %v4599_v19  ;;  %6388 = vst [vmem:[#allocation95_spill] sm:$0xff] %v4601_v21  ;;  %v4603_v44 = vld [vmem:[#allocation2 + $0x2f8] sm:$0xff]  ;;  %v4613_v4 = vld [vmem:[#allocation2 + $0x300] sm:$0xff] }
  0xa1   :  { %6389 = vst [vmem:[#allocation96_spill] sm:$0xff] %v4603_v44  ;;  %6390 = vst [vmem:[#allocation97_spill] sm:$0xff] %v4613_v4  ;;  %v4615_v18 = vld [vmem:[#allocation2 + $0x308] sm:$0xff]  ;;  %v4621_v26 = vld [vmem:[#allocation2 + $0x310] sm:$0xff] }
  0xa2   :  { %6391 = vst [vmem:[#allocation98_spill] sm:$0xff] %v4615_v18  ;;  %6392 = vst [vmem:[#allocation99_spill] sm:$0xff] %v4621_v26  ;;  %v4623_v36 = vld [vmem:[#allocation2 + $0x318] sm:$0xff]  ;;  %v4625_v22 = vld [vmem:[#allocation2 + $0x320] sm:$0xff] }
  0xa3   :  { %6393 = vst [vmem:[#allocation100_spill] sm:$0xff] %v4623_v36  ;;  %6394 = vst [vmem:[#allocation101_spill] sm:$0xff] %v4625_v22  ;;  %v4631_v47 = vld [vmem:[#allocation2 + $0x328] sm:$0xff]  ;;  %v4633_v49 = vld [vmem:[#allocation2 + $0x330] sm:$0xff] }
  0xa4   :  { %6395 = vst [vmem:[#allocation102_spill] sm:$0xff] %v4631_v47  ;;  %6396 = vst [vmem:[#allocation103_spill] sm:$0xff] %v4633_v49  ;;  %v4635_v0 = vld [vmem:[#allocation2 + $0x338] sm:$0xff]  ;;  %v4645_v43 = vld [vmem:[#allocation2 + $0x340] sm:$0xff] }
  0xa5   :  { %6397 = vst [vmem:[#allocation104_spill] sm:$0xff] %v4635_v0  ;;  %6398 = vst [vmem:[#allocation105_spill] sm:$0xff] %v4645_v43  ;;  %v4647_v17 = vld [vmem:[#allocation2 + $0x348] sm:$0xff]  ;;  %v4653_v16 = vld [vmem:[#allocation2 + $0x350] sm:$0xff] }
  0xa6   :  { %6399 = vst [vmem:[#allocation106_spill] sm:$0xff] %v4647_v17  ;;  %6400 = vst [vmem:[#allocation107_spill] sm:$0xff] %v4653_v16  ;;  %v4655_v41 = vld [vmem:[#allocation2 + $0x358] sm:$0xff]  ;;  %v4657_v56 = vld [vmem:[#allocation2 + $0x360] sm:$0xff] }
  0xa7   :  { %6401 = vst [vmem:[#allocation108_spill] sm:$0xff] %v4655_v41  ;;  %6402 = vst [vmem:[#allocation109_spill] sm:$0xff] %v4657_v56  ;;  %v4663_v57 = vld [vmem:[#allocation2 + $0x368] sm:$0xff]  ;;  %v4665_v7 = vld [vmem:[#allocation2 + $0x370] sm:$0xff] }
  0xa8   :  { %6403 = vst [vmem:[#allocation110_spill] sm:$0xff] %v4663_v57  ;;  %6404 = vst [vmem:[#allocation111_spill] sm:$0xff] %v4665_v7  ;;  %v4667_v54 = vld [vmem:[#allocation2 + $0x378] sm:$0xff]  ;;  %v4677_v12 = vld [vmem:[#allocation2 + $0x380] sm:$0xff] }
  0xa9   :  { %6405 = vst [vmem:[#allocation112_spill] sm:$0xff] %v4667_v54  ;;  %6406 = vst [vmem:[#allocation113_spill] sm:$0xff] %v4677_v12  ;;  %v4679_v39 = vld [vmem:[#allocation2 + $0x388] sm:$0xff]  ;;  %v4685_v26 = vld [vmem:[#allocation2 + $0x390] sm:$0xff] }
  0xaa   :  { %6407 = vst [vmem:[#allocation114_spill] sm:$0xff] %v4679_v39  ;;  %6408 = vst [vmem:[#allocation115_spill] sm:$0xff] %v4685_v26  ;;  %v4687_v27 = vld [vmem:[#allocation2 + $0x398] sm:$0xff]  ;;  %v4689_v21 = vld [vmem:[#allocation2 + $0x3a0] sm:$0xff] }
  0xab   :  { %6409 = vst [vmem:[#allocation116_spill] sm:$0xff] %v4687_v27  ;;  %6410 = vst [vmem:[#allocation117_spill] sm:$0xff] %v4689_v21  ;;  %v4695_v22 = vld [vmem:[#allocation2 + $0x3a8] sm:$0xff]  ;;  %v4697_v44 = vld [vmem:[#allocation2 + $0x3b0] sm:$0xff] }
  0xac   :  { %6411 = vst [vmem:[#allocation118_spill] sm:$0xff] %v4695_v22  ;;  %6412 = vst [vmem:[#allocation119_spill] sm:$0xff] %v4697_v44  ;;  %v4699_v19 = vld [vmem:[#allocation2 + $0x3b8] sm:$0xff]  ;;  %v4709_v36 = vld [vmem:[#allocation2 + $0x3c0] sm:$0xff] }
  0xad   :  { %6413 = vst [vmem:[#allocation120_spill] sm:$0xff] %v4699_v19  ;;  %6414 = vst [vmem:[#allocation121_spill] sm:$0xff] %v4709_v36  ;;  %v4711_v18 = vld [vmem:[#allocation2 + $0x3c8] sm:$0xff]  ;;  %v4717_v16 = vld [vmem:[#allocation2 + $0x3d0] sm:$0xff] }
  0xae   :  { %6415 = vst [vmem:[#allocation122_spill] sm:$0xff] %v4711_v18  ;;  %6416 = vst [vmem:[#allocation123_spill] sm:$0xff] %v4717_v16  ;;  %v4719_v48 = vld [vmem:[#allocation2 + $0x3d8] sm:$0xff]  ;;  %v4721_v49 = vld [vmem:[#allocation2 + $0x3e0] sm:$0xff] }
  0xaf   :  { %6417 = vst [vmem:[#allocation124_spill] sm:$0xff] %v4719_v48  ;;  %6418 = vst [vmem:[#allocation125_spill] sm:$0xff] %v4721_v49  ;;  %v4727_v56 = vld [vmem:[#allocation2 + $0x3e8] sm:$0xff]  ;;  %v4729_v0 = vld [vmem:[#allocation2 + $0x3f0] sm:$0xff] }
  0xb0   :  { %6419 = vst [vmem:[#allocation126_spill] sm:$0xff] %v4727_v56  ;;  %6420 = vst [vmem:[#allocation127_spill] sm:$0xff] %v4729_v0  ;;  %v4731_v47 = vld [vmem:[#allocation2 + $0x3f8] sm:$0xff]  ;;  %v4741_v41 = vld [vmem:[#allocation2 + $0x400] sm:$0xff] }
  0xb1   :  { %6421 = vst [vmem:[#allocation128_spill] sm:$0xff] %v4731_v47  ;;  %6422 = vst [vmem:[#allocation129_spill] sm:$0xff] %v4741_v41  ;;  %v4743_v17 = vld [vmem:[#allocation2 + $0x408] sm:$0xff]  ;;  %v4749_v26 = vld [vmem:[#allocation2 + $0x410] sm:$0xff] }
  0xb2   :  { %6423 = vst [vmem:[#allocation130_spill] sm:$0xff] %v4743_v17  ;;  %6424 = vst [vmem:[#allocation131_spill] sm:$0xff] %v4749_v26  ;;  %v4751_v4 = vld [vmem:[#allocation2 + $0x418] sm:$0xff]  ;;  %v4753_v7 = vld [vmem:[#allocation2 + $0x420] sm:$0xff] }
  0xb3   :  { %6425 = vst [vmem:[#allocation132_spill] sm:$0xff] %v4751_v4  ;;  %6426 = vst [vmem:[#allocation133_spill] sm:$0xff] %v4753_v7  ;;  %v4759_v21 = vld [vmem:[#allocation2 + $0x428] sm:$0xff]  ;;  %v4761_v54 = vld [vmem:[#allocation2 + $0x430] sm:$0xff] }
  0xb4   :  { %6427 = vst [vmem:[#allocation134_spill] sm:$0xff] %v4759_v21  ;;  %6428 = vst [vmem:[#allocation135_spill] sm:$0xff] %v4761_v54  ;;  %v4763_v57 = vld [vmem:[#allocation2 + $0x438] sm:$0xff]  ;;  %v4773_v27 = vld [vmem:[#allocation2 + $0x440] sm:$0xff] }
  0xb5   :  { %6429 = vst [vmem:[#allocation136_spill] sm:$0xff] %v4763_v57  ;;  %6430 = vst [vmem:[#allocation137_spill] sm:$0xff] %v4773_v27  ;;  %v4775_v39 = vld [vmem:[#allocation2 + $0x448] sm:$0xff]  ;;  %v4781_v16 = vld [vmem:[#allocation2 + $0x450] sm:$0xff] }
  0xb6   :  { %6431 = vst [vmem:[#allocation138_spill] sm:$0xff] %v4775_v39  ;;  %6432 = vst [vmem:[#allocation139_spill] sm:$0xff] %v4781_v16  ;;  %v4783_v43 = vld [vmem:[#allocation2 + $0x458] sm:$0xff]  ;;  %v4785_v44 = vld [vmem:[#allocation2 + $0x460] sm:$0xff] }
  0xb7   :  { %6433 = vst [vmem:[#allocation140_spill] sm:$0xff] %v4783_v43  ;;  %6434 = vst [vmem:[#allocation141_spill] sm:$0xff] %v4785_v44  ;;  %v4791_v49 = vld [vmem:[#allocation2 + $0x468] sm:$0xff]  ;;  %v4793_v19 = vld [vmem:[#allocation2 + $0x470] sm:$0xff] }
  0xb8   :  { %6435 = vst [vmem:[#allocation142_spill] sm:$0xff] %v4791_v49  ;;  %6436 = vst [vmem:[#allocation143_spill] sm:$0xff] %v4793_v19  ;;  %v4795_v22 = vld [vmem:[#allocation2 + $0x478] sm:$0xff]  ;;  %v4805_v48 = vld [vmem:[#allocation2 + $0x480] sm:$0xff] }
  0xb9   :  { %6437 = vst [vmem:[#allocation144_spill] sm:$0xff] %v4795_v22  ;;  %6438 = vst [vmem:[#allocation145_spill] sm:$0xff] %v4805_v48  ;;  %v4807_v18 = vld [vmem:[#allocation2 + $0x488] sm:$0xff]  ;;  %v4813_v26 = vld [vmem:[#allocation2 + $0x490] sm:$0xff] }
  0xba   :  { %6439 = vst [vmem:[#allocation146_spill] sm:$0xff] %v4807_v18  ;;  %6440 = vst [vmem:[#allocation147_spill] sm:$0xff] %v4813_v26  ;;  %v4815_v12 = vld [vmem:[#allocation2 + $0x498] sm:$0xff]  ;;  %v4817_v0 = vld [vmem:[#allocation2 + $0x4a0] sm:$0xff] }
  0xbb   :  { %6441 = vst [vmem:[#allocation148_spill] sm:$0xff] %v4815_v12  ;;  %6442 = vst [vmem:[#allocation149_spill] sm:$0xff] %v4817_v0  ;;  %v4823_v7 = vld [vmem:[#allocation2 + $0x4a8] sm:$0xff]  ;;  %v4825_v47 = vld [vmem:[#allocation2 + $0x4b0] sm:$0xff] }
  0xbc   :  { %6443 = vst [vmem:[#allocation150_spill] sm:$0xff] %v4823_v7  ;;  %6444 = vst [vmem:[#allocation151_spill] sm:$0xff] %v4825_v47  ;;  %v4827_v56 = vld [vmem:[#allocation2 + $0x4b8] sm:$0xff]  ;;  %v4837_v4 = vld [vmem:[#allocation2 + $0x4c0] sm:$0xff] }
  0xbd   :  { %6445 = vst [vmem:[#allocation152_spill] sm:$0xff] %v4827_v56  ;;  %6446 = vst [vmem:[#allocation153_spill] sm:$0xff] %v4837_v4  ;;  %v4839_v17 = vld [vmem:[#allocation2 + $0x4c8] sm:$0xff]  ;;  %v4845_v16 = vld [vmem:[#allocation2 + $0x4d0] sm:$0xff] }
  0xbe   :  { %6447 = vst [vmem:[#allocation154_spill] sm:$0xff] %v4839_v17  ;;  %6448 = vst [vmem:[#allocation155_spill] sm:$0xff] %v4845_v16  ;;  %v4847_v36 = vld [vmem:[#allocation2 + $0x4d8] sm:$0xff]  ;;  %v4849_v54 = vld [vmem:[#allocation2 + $0x4e0] sm:$0xff] }
  0xbf   :  { %6449 = vst [vmem:[#allocation156_spill] sm:$0xff] %v4847_v36  ;;  %6450 = vst [vmem:[#allocation157_spill] sm:$0xff] %v4849_v54  ;;  %v4855_v44 = vld [vmem:[#allocation2 + $0x4e8] sm:$0xff]  ;;  %v4857_v57 = vld [vmem:[#allocation2 + $0x4f0] sm:$0xff] }
  0xc0   :  { %6451 = vst [vmem:[#allocation158_spill] sm:$0xff] %v4855_v44  ;;  %6452 = vst [vmem:[#allocation159_spill] sm:$0xff] %v4857_v57  ;;  %v4859_v21 = vld [vmem:[#allocation2 + $0x4f8] sm:$0xff]  ;;  %v4869_v43 = vld [vmem:[#allocation2 + $0x500] sm:$0xff] }
  0xc1   :  { %6453 = vst [vmem:[#allocation160_spill] sm:$0xff] %v4859_v21  ;;  %6454 = vst [vmem:[#allocation161_spill] sm:$0xff] %v4869_v43  ;;  %v4871_v39 = vld [vmem:[#allocation2 + $0x508] sm:$0xff]  ;;  %v4877_v26 = vld [vmem:[#allocation2 + $0x510] sm:$0xff] }
  0xc2   :  { %6455 = vst [vmem:[#allocation162_spill] sm:$0xff] %v4871_v39  ;;  %6456 = vst [vmem:[#allocation163_spill] sm:$0xff] %v4877_v26  ;;  %v4879_v41 = vld [vmem:[#allocation2 + $0x518] sm:$0xff]  ;;  %v4881_v19 = vld [vmem:[#allocation2 + $0x520] sm:$0xff] }
  0xc3   :  { %6457 = vst [vmem:[#allocation164_spill] sm:$0xff] %v4879_v41  ;;  %6458 = vst [vmem:[#allocation165_spill] sm:$0xff] %v4881_v19  ;;  %v4887_v0 = vld [vmem:[#allocation2 + $0x528] sm:$0xff]  ;;  %v4889_v22 = vld [vmem:[#allocation2 + $0x530] sm:$0xff] }
  0xc4   :  { %6459 = vst [vmem:[#allocation166_spill] sm:$0xff] %v4887_v0  ;;  %6460 = vst [vmem:[#allocation167_spill] sm:$0xff] %v4889_v22  ;;  %v4891_v49 = vld [vmem:[#allocation2 + $0x538] sm:$0xff]  ;;  %v4901_v12 = vld [vmem:[#allocation2 + $0x540] sm:$0xff] }
  0xc5   :  { %6461 = vst [vmem:[#allocation168_spill] sm:$0xff] %v4891_v49  ;;  %6462 = vst [vmem:[#allocation169_spill] sm:$0xff] %v4901_v12  ;;  %v4903_v18 = vld [vmem:[#allocation2 + $0x548] sm:$0xff]  ;;  %v4909_v16 = vld [vmem:[#allocation2 + $0x550] sm:$0xff] }
  0xc6   :  { %6463 = vst [vmem:[#allocation170_spill] sm:$0xff] %v4903_v18  ;;  %6464 = vst [vmem:[#allocation171_spill] sm:$0xff] %v4909_v16  ;;  %v4911_v27 = vld [vmem:[#allocation2 + $0x558] sm:$0xff]  ;;  %v4913_v47 = vld [vmem:[#allocation2 + $0x560] sm:$0xff] }
  0xc7   :  { %6465 = vst [vmem:[#allocation172_spill] sm:$0xff] %v4911_v27  ;;  %6466 = vst [vmem:[#allocation173_spill] sm:$0xff] %v4913_v47  ;;  %v4919_v54 = vld [vmem:[#allocation2 + $0x568] sm:$0xff]  ;;  %v4921_v56 = vld [vmem:[#allocation2 + $0x570] sm:$0xff] }
  0xc8   :  { %6467 = vst [vmem:[#allocation174_spill] sm:$0xff] %v4919_v54  ;;  %6468 = vst [vmem:[#allocation175_spill] sm:$0xff] %v4921_v56  ;;  %v4923_v7 = vld [vmem:[#allocation2 + $0x578] sm:$0xff]  ;;  %v4933_v36 = vld [vmem:[#allocation2 + $0x580] sm:$0xff] }
  0xc9   :  { %6469 = vst [vmem:[#allocation176_spill] sm:$0xff] %v4923_v7  ;;  %6470 = vst [vmem:[#allocation177_spill] sm:$0xff] %v4933_v36  ;;  %v4935_v17 = vld [vmem:[#allocation2 + $0x588] sm:$0xff]  ;;  %v4941_v26 = vld [vmem:[#allocation2 + $0x590] sm:$0xff] }
  0xca   :  { %6471 = vst [vmem:[#allocation178_spill] sm:$0xff] %v4941_v26  ;;  %v4943_v48 = vld [vmem:[#allocation2 + $0x598] sm:$0xff]  ;;  %v4945_v57 = vld [vmem:[#allocation2 + $0x5a0] sm:$0xff]  ;;  %v4951_v19 = vld [vmem:[#allocation2 + $0x5a8] sm:$0xff] }
  0xcb   :  { %6472 = vst [vmem:[#allocation179_spill] sm:$0xff] %v4943_v48  ;;  %6473 = vst [vmem:[#allocation180_spill] sm:$0xff] %v4945_v57  ;;  %v4953_v21 = vld [vmem:[#allocation2 + $0x5b0] sm:$0xff]  ;;  %v4955_v44 = vld [vmem:[#allocation2 + $0x5b8] sm:$0xff] }
  0xcc   :  { %6474 = vst [vmem:[#allocation181_spill] sm:$0xff] %v4951_v19  ;;  %6475 = vst [vmem:[#allocation182_spill] sm:$0xff] %v4953_v21  ;;  %v4965_v41 = vld [vmem:[#allocation2 + $0x5c0] sm:$0xff]  ;;  %v4967_v39 = vld [vmem:[#allocation2 + $0x5c8] sm:$0xff] }
  0xcd   :  { %6476 = vst [vmem:[#allocation183_spill] sm:$0xff] %v4955_v44  ;;  %6477 = vst [vmem:[#allocation184_spill] sm:$0xff] %v4965_v41  ;;  %v4973_v16 = vld [vmem:[#allocation2 + $0x5d0] sm:$0xff]  ;;  %v4975_v4 = vld [vmem:[#allocation2 + $0x5d8] sm:$0xff] }
  0xce   :  { %6478 = vst [vmem:[#allocation185_spill] sm:$0xff] %v4967_v39  ;;  %6479 = vst [vmem:[#allocation186_spill] sm:$0xff] %v4973_v16  ;;  %v4977_v22 = vld [vmem:[#allocation2 + $0x5e0] sm:$0xff]  ;;  %v4983_v47 = vld [vmem:[#allocation2 + $0x5e8] sm:$0xff] }
  0xcf   :  { %6480 = vst [vmem:[#allocation187_spill] sm:$0xff] %v4975_v4  ;;  %6481 = vst [vmem:[#allocation188_spill] sm:$0xff] %v4977_v22  ;;  %v4985_v49 = vld [vmem:[#allocation2 + $0x5f0] sm:$0xff]  ;;  %v4987_v0 = vld [vmem:[#allocation2 + $0x5f8] sm:$0xff] }
  0xd0   :  { %6482 = vst [vmem:[#allocation189_spill] sm:$0xff] %v4983_v47  ;;  %6483 = vst [vmem:[#allocation190_spill] sm:$0xff] %v4985_v49 }
  0xd1   :  { %6484 = vst [vmem:[#allocation191_spill] sm:$0xff] %v4987_v0 }
  0xd2   :  { %4083 = dma.done.wait [#allocation6 + $0x1], 24576 }
  0xd3   :  { %4084 = vsyncadd [#allocation6 + $0x1], 4294942720  ;;  %v767_v43 = vld [vmem:[#allocation3 + $0x8] sm:$0xff]  ;;  %v769_v56 = vld [vmem:[#allocation3 + $0x18] sm:$0xff] }
  0xd4   :  { %v766_v21 = vld [vmem:[#allocation3] sm:$0xff]  ;;  %v959_v24 = vunpack.c.l.s8.bf16 %v767_v43  ;;  %v967_v57 = vunpack.c.h.s8.bf16 %v767_v43  ;;  %v961_v12 = vunpack.c.l.s8.bf16 %v769_v56  ;;  %v969_v44 = vunpack.c.h.s8.bf16 %v769_v56  ;;  %v768_v27 = vld [vmem:[#allocation3 + $0x10] sm:$0xff]  ;;  %v775_v16 = vld [vmem:[#allocation3 + $0x48] sm:$0xff] }
  0xd5   :  { %v958_v19 = vunpack.c.l.s8.bf16 %v766_v21  ;;  %v960_v18 = vunpack.c.l.s8.bf16 %v768_v27  ;;  %v777_v32 = vld [vmem:[#allocation3 + $0x58] sm:$0xff]  ;;  %v966_v7 = vunpack.c.h.s8.bf16 %v766_v21  ;;  %v968_v54 = vunpack.c.h.s8.bf16 %v768_v27  ;;  %v774_v22 = vld [vmem:[#allocation3 + $0x40] sm:$0xff]  ;;  %v776_v0 = vld [vmem:[#allocation3 + $0x50] sm:$0xff] }
  0xd6   :  { %1342 = vmatprep.subr.bf16.mxu0 %v959_v24  ;;  %1465 = vmatprep.subr.bf16.mxu1 %v961_v12  ;;  %v975_v50 = vunpack.c.l.s8.bf16 %v775_v16  ;;  %v977_v49 = vunpack.c.l.s8.bf16 %v777_v32  ;;  %v974_v43 = vunpack.c.l.s8.bf16 %v774_v22  ;;  %v976_v56 = vunpack.c.l.s8.bf16 %v776_v0  ;;  %v783_v24 = vld [vmem:[#allocation3 + $0x88] sm:$0xff]  ;;  %v785_v12 = vld [vmem:[#allocation3 + $0x98] sm:$0xff]  ;;  %v798_v39 = vld [vmem:[#allocation3 + $0x100] sm:$0xff] }
  0xd7   :  { %1343 = vmatpush1.bf16.msra.mxu0 %v958_v19  ;;  %1466 = vmatpush1.bf16.msra.mxu1 %v960_v18  ;;  %v983_v47 = vunpack.c.h.s8.bf16 %v775_v16  ;;  %v985_v41 = vunpack.c.h.s8.bf16 %v777_v32  ;;  %v982_v19 = vunpack.c.h.s8.bf16 %v774_v22  ;;  %v984_v18 = vunpack.c.h.s8.bf16 %v776_v0  ;;  %v800_v26 = vld [vmem:[#allocation3 + $0x110] sm:$0xff]  ;;  %v910_v36 = vld [vmem:[#allocation3 + $0x480] sm:$0xff] }
  0xd8   :  { %1344 = vmatprep.subr.bf16.mxu0 %v967_v57  ;;  %1467 = vmatprep.subr.bf16.mxu1 %v969_v44  ;;  %v991_v21 = vunpack.c.l.s8.bf16 %v783_v24  ;;  %v993_v27 = vunpack.c.l.s8.bf16 %v785_v12  ;;  %v782_v44 = vld [vmem:[#allocation3 + $0x80] sm:$0xff]  ;;  %v784_v57 = vld [vmem:[#allocation3 + $0x90] sm:$0xff]  ;;  %v999_v16 = vunpack.c.h.s8.bf16 %v783_v24  ;;  %v1001_v32 = vunpack.c.h.s8.bf16 %v785_v12 }
  0xd9   :  { %v998_v0 = vunpack.c.h.s8.bf16 %v782_v44  ;;  %v792_v24 = vld [vmem:[#allocation3 + $0xd0] sm:$0xff] }
  0xda   :  { %v912_v48 = vld [vmem:[#allocation3 + $0x490] sm:$0xff] }
  0xdb   :  { %1345 = vmatpush1.bf16.msra.mxu0 %v966_v7  ;;  %1468 = vmatpush1.bf16.msra.mxu1 %v968_v54  ;;  %v5013_v7 = vld [vmem:[#allocation10] sm:$0xff] }
  0xdc   :  { %1346 = vmatprep.subr.bf16.mxu0 %v975_v50  ;;  %1469 = vmatprep.subr.bf16.mxu1 %v977_v49  ;;  %v990_v50 = vunpack.c.l.s8.bf16 %v782_v44  ;;  %v992_v49 = vunpack.c.l.s8.bf16 %v784_v57  ;;  %v5017_v22 = vrot.slane %v5013_v7, %v4229_v5 }
  0xde   :  { %v744_v54 = vcombine.high %v5017_v22, %v5017_v22 }
  0xdf   :  { %1347 = vmatpush1.bf16.msra.mxu0 %v974_v43  ;;  %1470 = vmatpush1.bf16.msra.mxu1 %v976_v56  ;;  %v1000_v43 = vunpack.c.h.s8.bf16 %v784_v57 }
  0xe0   :  { %1348 = vmatprep.subr.bf16.mxu0 %v983_v47  ;;  %1471 = vmatprep.subr.bf16.mxu1 %v985_v41  ;;  %v791_v47 = vld [vmem:[#allocation3 + $0xc8] sm:$0xff]  ;;  %v793_v41 = vld [vmem:[#allocation3 + $0xd8] sm:$0xff]  ;;  %v5021_v12 = vpack.c.bf16 %v744_v54, %v744_v54 }
  0xe1   :  { %v1007_v56 = vunpack.c.l.s8.bf16 %v791_v47  ;;  %v1015_v44 = vunpack.c.h.s8.bf16 %v791_v47  ;;  %v1017_v57 = vunpack.c.h.s8.bf16 %v793_v41 }
  0xe2   :  { %1374 = vmatprep.mubr.bf16.mxu0 %v5021_v12  ;;  %1497 = vmatprep.mubr.bf16.mxu1 %v5021_v12 }
  0xe3   :  { %1349 = vmatpush1.bf16.msra.mxu0 %v982_v19  ;;  %1472 = vmatpush1.bf16.msra.mxu1 %v984_v18  ;;  %v1009_v19 = vunpack.c.l.s8.bf16 %v793_v41  ;;  %v790_v18 = vld [vmem:[#allocation3 + $0xc0] sm:$0xff] }
  0xe4   :  { %1350 = vmatprep.subr.bf16.mxu0 %v991_v21  ;;  %1473 = vmatprep.subr.bf16.mxu1 %v993_v27  ;;  %v1006_v21 = vunpack.c.l.s8.bf16 %v790_v18  ;;  %v1008_v27 = vunpack.c.l.s8.bf16 %v792_v24 }
  0xe7   :  { %1351 = vmatpush1.bf16.msra.mxu0 %v990_v50  ;;  %1474 = vmatpush1.bf16.msra.mxu1 %v992_v49  ;;  %v799_v50 = vld [vmem:[#allocation3 + $0x108] sm:$0xff]  ;;  %v801_v49 = vld [vmem:[#allocation3 + $0x118] sm:$0xff] }
  0xe8   :  { %1352 = vmatprep.subr.bf16.mxu0 %v999_v16  ;;  %1475 = vmatprep.subr.bf16.mxu1 %v1001_v32  ;;  %v1014_v16 = vunpack.c.h.s8.bf16 %v790_v18  ;;  %v1016_v32 = vunpack.c.h.s8.bf16 %v792_v24  ;;  %v1023_v54 = vunpack.c.l.s8.bf16 %v799_v50  ;;  %v1025_v4 = vunpack.c.l.s8.bf16 %v801_v49 }
  0xe9   :  { %v1031_v47 = vunpack.c.h.s8.bf16 %v799_v50  ;;  %v1033_v41 = vunpack.c.h.s8.bf16 %v801_v49  ;;  %v1030_v18 = vunpack.c.h.s8.bf16 %v798_v39  ;;  %v1032_v24 = vunpack.c.h.s8.bf16 %v800_v26  ;;  %v815_v49 = vld [vmem:[#allocation3 + $0x188] sm:$0xff] }
  0xeb   :  { %1353 = vmatpush1.bf16.msra.mxu0 %v998_v0  ;;  %1476 = vmatpush1.bf16.msra.mxu1 %v1000_v43  ;;  %v1022_v0 = vunpack.c.l.s8.bf16 %v798_v39  ;;  %v1024_v43 = vunpack.c.l.s8.bf16 %v800_v26 }
  0xec   :  { %1354 = vmatprep.subr.bf16.mxu0 %v1007_v56  ;;  %1477 = vmatprep.subr.bf16.mxu1 %v1009_v19  ;;  %v807_v56 = vld [vmem:[#allocation3 + $0x148] sm:$0xff]  ;;  %v809_v19 = vld [vmem:[#allocation3 + $0x158] sm:$0xff] }
  0xed   :  { %v1049_v50 = vunpack.c.h.s8.bf16 %v809_v19 }
  0xef   :  { %1355 = vmatpush1.bf16.msra.mxu0 %v1006_v21  ;;  %1478 = vmatpush1.bf16.msra.mxu1 %v1008_v27  ;;  %v1039_v21 = vunpack.c.l.s8.bf16 %v807_v56  ;;  %v1041_v27 = vunpack.c.l.s8.bf16 %v809_v19 }
  0xf0   :  { %1356 = vmatprep.subr.bf16.mxu0 %v1015_v44  ;;  %1479 = vmatprep.subr.bf16.mxu1 %v1017_v57  ;;  %v806_v44 = vld [vmem:[#allocation3 + $0x140] sm:$0xff]  ;;  %v808_v57 = vld [vmem:[#allocation3 + $0x150] sm:$0xff] }
  0xf1   :  { %v1046_v39 = vunpack.c.h.s8.bf16 %v806_v44  ;;  %v1048_v26 = vunpack.c.h.s8.bf16 %v808_v57 }
  0xf3   :  { %1357 = vmatpush1.bf16.msra.mxu0 %v1014_v16  ;;  %1480 = vmatpush1.bf16.msra.mxu1 %v1016_v32  ;;  %v1038_v16 = vunpack.c.l.s8.bf16 %v806_v44  ;;  %v1040_v32 = vunpack.c.l.s8.bf16 %v808_v57 }
  0xf4   :  { %1358 = vmatprep.subr.bf16.mxu0 %v1023_v54  ;;  %1481 = vmatprep.subr.bf16.mxu1 %v1025_v4  ;;  %v1047_v4 = vunpack.c.h.s8.bf16 %v807_v56  ;;  %v817_v54 = vld [vmem:[#allocation3 + $0x198] sm:$0xff]  ;;  %v1063_v56 = vunpack.c.h.s8.bf16 %v815_v49 }
  0xf5   :  { %v1065_v19 = vunpack.c.h.s8.bf16 %v817_v54 }
  0xf7   :  { %1359 = vmatpush1.bf16.msra.mxu0 %v1022_v0  ;;  %1482 = vmatpush1.bf16.msra.mxu1 %v1024_v43  ;;  %v1055_v0 = vunpack.c.l.s8.bf16 %v815_v49  ;;  %v1057_v43 = vunpack.c.l.s8.bf16 %v817_v54 }
  0xf8   :  { %1360 = vmatprep.subr.bf16.mxu0 %v1031_v47  ;;  %1483 = vmatprep.subr.bf16.mxu1 %v1033_v41  ;;  %v814_v47 = vld [vmem:[#allocation3 + $0x180] sm:$0xff]  ;;  %v816_v41 = vld [vmem:[#allocation3 + $0x190] sm:$0xff] }
  0xf9   :  { %v1062_v44 = vunpack.c.h.s8.bf16 %v814_v47  ;;  %v1064_v57 = vunpack.c.h.s8.bf16 %v816_v41 }
  0xfb   :  { %1361 = vmatpush1.bf16.msra.mxu0 %v1030_v18  ;;  %1484 = vmatpush1.bf16.msra.mxu1 %v1032_v24  ;;  %v1054_v18 = vunpack.c.l.s8.bf16 %v814_v47  ;;  %v1056_v24 = vunpack.c.l.s8.bf16 %v816_v41  ;;  %v833_v47 = vld [vmem:[#allocation3 + $0x218] sm:$0xff] }
  0xfc   :  { %1362 = vmatprep.subr.bf16.mxu0 %v1039_v21  ;;  %1485 = vmatprep.subr.bf16.mxu1 %v1041_v27  ;;  %v823_v21 = vld [vmem:[#allocation3 + $0x1c8] sm:$0xff]  ;;  %v825_v27 = vld [vmem:[#allocation3 + $0x1d8] sm:$0xff] }
  0xfd   :  { %v1079_v54 = vunpack.c.h.s8.bf16 %v823_v21 }
  0xff   :  { %1363 = vmatpush1.bf16.msra.mxu0 %v1038_v16  ;;  %1486 = vmatpush1.bf16.msra.mxu1 %v1040_v32  ;;  %v1071_v16 = vunpack.c.l.s8.bf16 %v823_v21  ;;  %v1073_v32 = vunpack.c.l.s8.bf16 %v825_v27  ;;  %v5034_v21 = vpack.c.bf16 %v5017_v22, %v5017_v22 }
 0x100   :  { %1364 = vmatprep.subr.bf16.mxu0 %v1047_v4  ;;  %1487 = vmatprep.subr.bf16.mxu1 %v1049_v50  ;;  %v822_v4 = vld [vmem:[#allocation3 + $0x1c0] sm:$0xff]  ;;  %v824_v50 = vld [vmem:[#allocation3 + $0x1d0] sm:$0xff] }
 0x101   :  { %v1072_v49 = vunpack.c.l.s8.bf16 %v824_v50 }
 0x103   :  { %1365 = vmatpush1.bf16.msra.mxu0 %v1046_v39  ;;  %1488 = vmatpush1.bf16.msra.mxu1 %v1048_v26  ;;  %v729_v39 = vcombine.high %v5013_v7, %v5013_v7  ;;  %v1070_v26 = vunpack.c.l.s8.bf16 %v822_v4 }
 0x104   :  { %1366 = vmatprep.subr.bf16.mxu0 %v1055_v0  ;;  %1489 = vmatprep.subr.bf16.mxu1 %v1057_v43  ;;  %v1081_v0 = vunpack.c.h.s8.bf16 %v825_v27  ;;  %v831_v43 = vld [vmem:[#allocation3 + $0x208] sm:$0xff] }
 0x105   :  { %v5028_v41 = vrot.slane %v729_v39, %v4229_v5  ;;  %v1087_v7 = vunpack.c.l.s8.bf16 %v831_v43 }
 0x107   :  { %1367 = vmatpush1.bf16.msra.mxu0 %v1054_v18  ;;  %1490 = vmatpush1.bf16.msra.mxu1 %v1056_v24  ;;  %v1078_v18 = vunpack.c.h.s8.bf16 %v822_v4  ;;  %v1080_v24 = vunpack.c.h.s8.bf16 %v824_v50  ;;  %v839_v4 = vld [vmem:[#allocation3 + $0x248] sm:$0xff]  ;;  %v841_v50 = vld [vmem:[#allocation3 + $0x258] sm:$0xff] }
 0x108   :  { %1368 = vmatprep.subr.bf16.mxu0 %v1063_v56  ;;  %1491 = vmatprep.subr.bf16.mxu1 %v1065_v19  ;;  %v1089_v56 = vunpack.c.l.s8.bf16 %v833_v47  ;;  %v830_v19 = vld [vmem:[#allocation3 + $0x200] sm:$0xff] }
 0x109   :  { %v1086_v5 = vunpack.c.l.s8.bf16 %v830_v19  ;;  %v1094_v22 = vunpack.c.h.s8.bf16 %v830_v19  ;;  %v849_v19 = vld [vmem:[#allocation3 + $0x298] sm:$0xff] }
 0x10b   :  { %1369 = vmatpush1.bf16.msra.mxu0 %v1062_v44  ;;  %1492 = vmatpush1.bf16.msra.mxu1 %v1064_v57  ;;  %v832_v44 = vld [vmem:[#allocation3 + $0x210] sm:$0xff]  ;;  %v745_v57 = vcombine.high %v5028_v41, %v5028_v41 }
 0x10c   :  { %1370 = vmatprep.subr.bf16.mxu0 %v1071_v16  ;;  %1493 = vmatprep.subr.bf16.mxu1 %v1073_v32  ;;  %v1088_v27 = vunpack.c.l.s8.bf16 %v832_v44  ;;  %v1095_v16 = vunpack.c.h.s8.bf16 %v831_v43  ;;  %v1097_v32 = vunpack.c.h.s8.bf16 %v833_v47 }
 0x10d   :  { %v5036_v39 = vpack.c.bf16 %v745_v57, %v745_v57 }
 0x10f   :  { %1371 = vmatpush1.bf16.msra.mxu0 %v1070_v26  ;;  %1494 = vmatpush1.bf16.msra.mxu1 %v1072_v49  ;;  %v1096_v26 = vunpack.c.h.s8.bf16 %v832_v44  ;;  %v1103_v49 = vunpack.c.l.s8.bf16 %v839_v4 }
 0x110   :  { %1372 = vmatprep.subr.bf16.mxu0 %v1079_v54  ;;  %1495 = vmatprep.subr.bf16.mxu1 %v1081_v0  ;;  %v1105_v54 = vunpack.c.l.s8.bf16 %v841_v50  ;;  %v838_v0 = vld [vmem:[#allocation3 + $0x240] sm:$0xff] }
 0x111   :  { %v1102_v43 = vunpack.c.l.s8.bf16 %v838_v0  ;;  %v1110_v44 = vunpack.c.h.s8.bf16 %v838_v0 }
 0x113   :  { %1373 = vmatpush1.bf16.msra.mxu0 %v1078_v18  ;;  %1496 = vmatpush1.bf16.msra.mxu1 %v1080_v24  ;;  %v840_v18 = vld [vmem:[#allocation3 + $0x250] sm:$0xff]  ;;  %v1111_v24 = vunpack.c.h.s8.bf16 %v839_v4 }
 0x114   :  { %1383 = vmatprep.subr.bf16.mxu0 %v1087_v7  ;;  %1506 = vmatprep.subr.bf16.mxu1 %v1089_v56  ;;  %v1104_v47 = vunpack.c.l.s8.bf16 %v840_v18  ;;  %v1113_v7 = vunpack.c.h.s8.bf16 %v841_v50  ;;  %v847_v56 = vld [vmem:[#allocation3 + $0x288] sm:$0xff]  ;;  %v1112_v57 = vunpack.c.h.s8.bf16 %v840_v18  ;;  %v1129_v50 = vunpack.c.h.s8.bf16 %v849_v19 }
 0x115   :  { %v1127_v4 = vunpack.c.h.s8.bf16 %v847_v56 }
 0x116   :  { %1375 = vmatmul.mubr.bf16.vlgmr.msra.gmra.mrb[0].mxu0 %v5034_v21  ;;  %1498 = vmatmul.mubr.bf16.vlgmr.msra.gmra.mrb[0].mxu1 %v5034_v21 }
 0x117   :  { %1384 = vmatpush1.bf16.msra.mxu0 %v1086_v5  ;;  %1507 = vmatpush1.bf16.msra.mxu1 %v1088_v27  ;;  %v1119_v5 = vunpack.c.l.s8.bf16 %v847_v56  ;;  %v1121_v27 = vunpack.c.l.s8.bf16 %v849_v19 }
 0x118   :  { %1385 = vmatprep.subr.bf16.mxu0 %v1095_v16  ;;  %1508 = vmatprep.subr.bf16.mxu1 %v1097_v32  ;;  %v846_v16 = vld [vmem:[#allocation3 + $0x280] sm:$0xff]  ;;  %v848_v32 = vld [vmem:[#allocation3 + $0x290] sm:$0xff] }
 0x119   :  { %1415 = vmatprep.mubr.bf16.mxu0 %v5036_v39  ;;  %1538 = vmatprep.mubr.bf16.mxu1 %v5036_v39  ;;  %v1126_v0 = vunpack.c.h.s8.bf16 %v846_v16  ;;  %v1128_v18 = vunpack.c.h.s8.bf16 %v848_v32 }
 0x11b   :  { %1386 = vmatpush1.bf16.msra.mxu0 %v1094_v22  ;;  %1509 = vmatpush1.bf16.msra.mxu1 %v1096_v26  ;;  %v1118_v22 = vunpack.c.l.s8.bf16 %v846_v16  ;;  %v1120_v26 = vunpack.c.l.s8.bf16 %v848_v32 }
 0x11c   :  { %1387 = vmatprep.subr.bf16.mxu0 %v1103_v49  ;;  %1510 = vmatprep.subr.bf16.mxu1 %v1105_v54  ;;  %v855_v49 = vld [vmem:[#allocation3 + $0x2c8] sm:$0xff]  ;;  %v857_v54 = vld [vmem:[#allocation3 + $0x2d8] sm:$0xff] }
 0x11d   :  { %v1143_v56 = vunpack.c.h.s8.bf16 %v855_v49  ;;  %v1145_v19 = vunpack.c.h.s8.bf16 %v857_v54 }
 0x11f   :  { %1388 = vmatpush1.bf16.msra.mxu0 %v1102_v43  ;;  %1511 = vmatpush1.bf16.msra.mxu1 %v1104_v47  ;;  %v1135_v43 = vunpack.c.l.s8.bf16 %v855_v49  ;;  %v1137_v47 = vunpack.c.l.s8.bf16 %v857_v54 }
 0x120   :  { %1389 = vmatprep.subr.bf16.mxu0 %v1111_v24  ;;  %1512 = vmatprep.subr.bf16.mxu1 %v1113_v7  ;;  %v854_v24 = vld [vmem:[#allocation3 + $0x2c0] sm:$0xff]  ;;  %v856_v7 = vld [vmem:[#allocation3 + $0x2d0] sm:$0xff] }
 0x121   :  { %v1142_v16 = vunpack.c.h.s8.bf16 %v854_v24  ;;  %v1144_v32 = vunpack.c.h.s8.bf16 %v856_v7 }
 0x123   :  { %1390 = vmatpush1.bf16.msra.mxu0 %v1110_v44  ;;  %1513 = vmatpush1.bf16.msra.mxu1 %v1112_v57  ;;  %v1134_v44 = vunpack.c.l.s8.bf16 %v854_v24  ;;  %v1136_v57 = vunpack.c.l.s8.bf16 %v856_v7 }
 0x124   :  { %1391 = vmatprep.subr.bf16.mxu0 %v1119_v5  ;;  %1514 = vmatprep.subr.bf16.mxu1 %v1121_v27  ;;  %v863_v5 = vld [vmem:[#allocation3 + $0x308] sm:$0xff]  ;;  %v865_v27 = vld [vmem:[#allocation3 + $0x318] sm:$0xff] }
 0x125   :  { %v1159_v49 = vunpack.c.h.s8.bf16 %v863_v5  ;;  %v1161_v54 = vunpack.c.h.s8.bf16 %v865_v27 }
 0x127   :  { %1392 = vmatpush1.bf16.msra.mxu0 %v1118_v22  ;;  %1515 = vmatpush1.bf16.msra.mxu1 %v1120_v26  ;;  %v1151_v22 = vunpack.c.l.s8.bf16 %v863_v5  ;;  %v1153_v26 = vunpack.c.l.s8.bf16 %v865_v27 }
 0x128   :  { %1393 = vmatprep.subr.bf16.mxu0 %v1127_v4  ;;  %1516 = vmatprep.subr.bf16.mxu1 %v1129_v50  ;;  %v862_v4 = vld [vmem:[#allocation3 + $0x300] sm:$0xff]  ;;  %v864_v50 = vld [vmem:[#allocation3 + $0x310] sm:$0xff] }
 0x129   :  { %v1158_v24 = vunpack.c.h.s8.bf16 %v862_v4  ;;  %v1160_v7 = vunpack.c.h.s8.bf16 %v864_v50 }
 0x12b   :  { %1394 = vmatpush1.bf16.msra.mxu0 %v1126_v0  ;;  %1517 = vmatpush1.bf16.msra.mxu1 %v1128_v18  ;;  %v1150_v0 = vunpack.c.l.s8.bf16 %v862_v4  ;;  %v1152_v18 = vunpack.c.l.s8.bf16 %v864_v50 }
 0x12c   :  { %1395 = vmatprep.subr.bf16.mxu0 %v1135_v43  ;;  %1518 = vmatprep.subr.bf16.mxu1 %v1137_v47  ;;  %v871_v43 = vld [vmem:[#allocation3 + $0x348] sm:$0xff]  ;;  %v873_v47 = vld [vmem:[#allocation3 + $0x358] sm:$0xff] }
 0x12d   :  { %v1175_v5 = vunpack.c.h.s8.bf16 %v871_v43  ;;  %v1177_v27 = vunpack.c.h.s8.bf16 %v873_v47 }
 0x12f   :  { %1396 = vmatpush1.bf16.msra.mxu0 %v1134_v44  ;;  %1519 = vmatpush1.bf16.msra.mxu1 %v1136_v57  ;;  %v1167_v44 = vunpack.c.l.s8.bf16 %v871_v43  ;;  %v1169_v57 = vunpack.c.l.s8.bf16 %v873_v47 }
 0x130   :  { %1397 = vmatprep.subr.bf16.mxu0 %v1143_v56  ;;  %1520 = vmatprep.subr.bf16.mxu1 %v1145_v19  ;;  %v870_v56 = vld [vmem:[#allocation3 + $0x340] sm:$0xff]  ;;  %v872_v19 = vld [vmem:[#allocation3 + $0x350] sm:$0xff] }
 0x131   :  { %v1174_v4 = vunpack.c.h.s8.bf16 %v870_v56  ;;  %v1176_v50 = vunpack.c.h.s8.bf16 %v872_v19 }
 0x133   :  { %1398 = vmatpush1.bf16.msra.mxu0 %v1142_v16  ;;  %1521 = vmatpush1.bf16.msra.mxu1 %v1144_v32  ;;  %v1166_v16 = vunpack.c.l.s8.bf16 %v870_v56  ;;  %v1168_v32 = vunpack.c.l.s8.bf16 %v872_v19 }
 0x134   :  { %1399 = vmatprep.subr.bf16.mxu0 %v1151_v22  ;;  %1522 = vmatprep.subr.bf16.mxu1 %v1153_v26  ;;  %v879_v22 = vld [vmem:[#allocation3 + $0x388] sm:$0xff]  ;;  %v881_v26 = vld [vmem:[#allocation3 + $0x398] sm:$0xff] }
 0x135   :  { %v1191_v43 = vunpack.c.h.s8.bf16 %v879_v22  ;;  %v1193_v47 = vunpack.c.h.s8.bf16 %v881_v26 }
 0x137   :  { %1400 = vmatpush1.bf16.msra.mxu0 %v1150_v0  ;;  %1523 = vmatpush1.bf16.msra.mxu1 %v1152_v18  ;;  %v1183_v0 = vunpack.c.l.s8.bf16 %v879_v22  ;;  %v1185_v18 = vunpack.c.l.s8.bf16 %v881_v26 }
 0x138   :  { %1401 = vmatprep.subr.bf16.mxu0 %v1159_v49  ;;  %1524 = vmatprep.subr.bf16.mxu1 %v1161_v54  ;;  %v878_v49 = vld [vmem:[#allocation3 + $0x380] sm:$0xff]  ;;  %v880_v54 = vld [vmem:[#allocation3 + $0x390] sm:$0xff] }
 0x139   :  { %v1190_v56 = vunpack.c.h.s8.bf16 %v878_v49  ;;  %v1192_v19 = vunpack.c.h.s8.bf16 %v880_v54 }
 0x13b   :  { %1402 = vmatpush1.bf16.msra.mxu0 %v1158_v24  ;;  %1525 = vmatpush1.bf16.msra.mxu1 %v1160_v7  ;;  %v1182_v24 = vunpack.c.l.s8.bf16 %v878_v49  ;;  %v1184_v7 = vunpack.c.l.s8.bf16 %v880_v54 }
 0x13c   :  { %1403 = vmatprep.subr.bf16.mxu0 %v1167_v44  ;;  %1526 = vmatprep.subr.bf16.mxu1 %v1169_v57  ;;  %v887_v44 = vld [vmem:[#allocation3 + $0x3c8] sm:$0xff]  ;;  %v889_v57 = vld [vmem:[#allocation3 + $0x3d8] sm:$0xff] }
 0x13d   :  { %v1207_v22 = vunpack.c.h.s8.bf16 %v887_v44  ;;  %v1209_v26 = vunpack.c.h.s8.bf16 %v889_v57 }
 0x13f   :  { %1404 = vmatpush1.bf16.msra.mxu0 %v1166_v16  ;;  %1527 = vmatpush1.bf16.msra.mxu1 %v1168_v32  ;;  %v1199_v16 = vunpack.c.l.s8.bf16 %v887_v44  ;;  %v1201_v32 = vunpack.c.l.s8.bf16 %v889_v57  ;;  %v5048_v44 = vpack.c.bf16 %v5028_v41, %v5028_v41 }
 0x140   :  { %1405 = vmatprep.subr.bf16.mxu0 %v1175_v5  ;;  %1528 = vmatprep.subr.bf16.mxu1 %v1177_v27  ;;  %v886_v5 = vld [vmem:[#allocation3 + $0x3c0] sm:$0xff]  ;;  %v888_v27 = vld [vmem:[#allocation3 + $0x3d0] sm:$0xff] }
 0x141   :  { %v1206_v49 = vunpack.c.h.s8.bf16 %v886_v5  ;;  %v1208_v54 = vunpack.c.h.s8.bf16 %v888_v27 }
 0x143   :  { %1406 = vmatpush1.bf16.msra.mxu0 %v1174_v4  ;;  %1529 = vmatpush1.bf16.msra.mxu1 %v1176_v50  ;;  %v1198_v4 = vunpack.c.l.s8.bf16 %v886_v5  ;;  %v1200_v50 = vunpack.c.l.s8.bf16 %v888_v27  ;;  %v903_v27 = vld [vmem:[#allocation3 + $0x448] sm:$0xff] }
 0x144   :  { %1407 = vmatprep.subr.bf16.mxu0 %v1183_v0  ;;  %1530 = vmatprep.subr.bf16.mxu1 %v1185_v18  ;;  %v895_v0 = vld [vmem:[#allocation3 + $0x408] sm:$0xff]  ;;  %v897_v18 = vld [vmem:[#allocation3 + $0x418] sm:$0xff] }
 0x145   :  { %v1225_v5 = vunpack.c.h.s8.bf16 %v897_v18 }
 0x147   :  { %1408 = vmatpush1.bf16.msra.mxu0 %v1182_v24  ;;  %1531 = vmatpush1.bf16.msra.mxu1 %v1184_v7  ;;  %v5042_v24 = vld.sshfl [vmem:[#allocation10 + $0x8] sm:$0x33 pattern:$0x76325410]  ;;  %v1215_v7 = vunpack.c.l.s8.bf16 %v895_v0 }
 0x148   :  { %1409 = vmatprep.subr.bf16.mxu0 %v1191_v43  ;;  %1532 = vmatprep.subr.bf16.mxu1 %v1193_v47  ;;  %v1217_v43 = vunpack.c.l.s8.bf16 %v897_v18  ;;  %v894_v47 = vld [vmem:[#allocation3 + $0x400] sm:$0xff] }
 0x149   :  { %v1214_v57 = vunpack.c.l.s8.bf16 %v894_v47  ;;  %v1222_v41 = vunpack.c.h.s8.bf16 %v894_v47  ;;  %v911_v47 = vld [vmem:[#allocation3 + $0x488] sm:$0xff] }
 0x14b   :  { %1410 = vmatpush1.bf16.msra.mxu0 %v1190_v56  ;;  %1533 = vmatpush1.bf16.msra.mxu1 %v1192_v19  ;;  %v896_v56 = vld [vmem:[#allocation3 + $0x410] sm:$0xff]  ;;  %v753_v19 = vcombine.high %v5042_v24, %v5042_v24 }
 0x14c   :  { %1411 = vmatprep.subr.bf16.mxu0 %v1199_v16  ;;  %1534 = vmatprep.subr.bf16.mxu1 %v1201_v32  ;;  %v1216_v16 = vunpack.c.l.s8.bf16 %v896_v56  ;;  %v1223_v32 = vunpack.c.h.s8.bf16 %v895_v0 }
 0x14f   :  { %1412 = vmatpush1.bf16.msra.mxu0 %v1198_v4  ;;  %1535 = vmatpush1.bf16.msra.mxu1 %v1200_v50  ;;  %v905_v4 = vld [vmem:[#allocation3 + $0x458] sm:$0xff]  ;;  %v5050_v50 = vpack.c.bf16 %v753_v19, %v753_v19 }
 0x150   :  { %1413 = vmatprep.subr.bf16.mxu0 %v1207_v22  ;;  %1536 = vmatprep.subr.bf16.mxu1 %v1209_v26  ;;  %v1224_v22 = vunpack.c.h.s8.bf16 %v896_v56  ;;  %v1231_v26 = vunpack.c.l.s8.bf16 %v903_v27  ;;  %v1241_v19 = vunpack.c.h.s8.bf16 %v905_v4  ;;  %v913_v56 = vld [vmem:[#allocation3 + $0x498] sm:$0xff] }
 0x153   :  { %1414 = vmatpush1.bf16.msra.mxu0 %v1206_v49  ;;  %1537 = vmatpush1.bf16.msra.mxu1 %v1208_v54  ;;  %v1233_v49 = vunpack.c.l.s8.bf16 %v905_v4  ;;  %v902_v54 = vld [vmem:[#allocation3 + $0x440] sm:$0xff]  ;;  %v1257_v4 = vunpack.c.h.s8.bf16 %v913_v56 }
 0x154   :  { %1424 = vmatprep.subr.bf16.mxu0 %v1215_v7  ;;  %1547 = vmatprep.subr.bf16.mxu1 %v1217_v43  ;;  %v904_v7 = vld [vmem:[#allocation3 + $0x450] sm:$0xff]  ;;  %v1230_v0 = vunpack.c.l.s8.bf16 %v902_v54  ;;  %v1239_v43 = vunpack.c.h.s8.bf16 %v903_v27  ;;  %v1255_v27 = vunpack.c.h.s8.bf16 %v911_v47 }
 0x155   :  { %v1232_v18 = vunpack.c.l.s8.bf16 %v904_v7 }
 0x156   :  { %1416 = vmatmul.mubr.bf16.vlgmr.msra.gmra.mrb[0].mxu0 %v5048_v44  ;;  %1539 = vmatmul.mubr.bf16.vlgmr.msra.gmra.mrb[0].mxu1 %v5048_v44 }
 0x157   :  { %1425 = vmatpush1.bf16.msra.mxu0 %v1214_v57  ;;  %1548 = vmatpush1.bf16.msra.mxu1 %v1216_v16  ;;  %v1238_v57 = vunpack.c.h.s8.bf16 %v902_v54  ;;  %v1240_v16 = vunpack.c.h.s8.bf16 %v904_v7  ;;  %v1254_v54 = vunpack.c.h.s8.bf16 %v910_v36  ;;  %v1256_v7 = vunpack.c.h.s8.bf16 %v912_v48 }
 0x158   :  { %1426 = vmatprep.subr.bf16.mxu0 %v1223_v32  ;;  %1549 = vmatprep.subr.bf16.mxu1 %v1225_v5  ;;  %v1247_v32 = vunpack.c.l.s8.bf16 %v911_v47  ;;  %v1249_v5 = vunpack.c.l.s8.bf16 %v913_v56 }
 0x159   :  { %1456 = vmatprep.mubr.bf16.mxu0 %v5050_v50  ;;  %1579 = vmatprep.mubr.bf16.mxu1 %v5050_v50 }
 0x15b   :  { %1427 = vmatpush1.bf16.msra.mxu0 %v1222_v41  ;;  %1550 = vmatpush1.bf16.msra.mxu1 %v1224_v22  ;;  %v1246_v41 = vunpack.c.l.s8.bf16 %v910_v36  ;;  %v1248_v22 = vunpack.c.l.s8.bf16 %v912_v48 }
 0x15c   :  { %1428 = vmatprep.subr.bf16.mxu0 %v1231_v26  ;;  %1551 = vmatprep.subr.bf16.mxu1 %v1233_v49  ;;  %v919_v26 = vld [vmem:[#allocation3 + $0x4c8] sm:$0xff]  ;;  %v921_v49 = vld [vmem:[#allocation3 + $0x4d8] sm:$0xff] }
 0x15d   :  { %v1271_v47 = vunpack.c.h.s8.bf16 %v919_v26  ;;  %v1273_v56 = vunpack.c.h.s8.bf16 %v921_v49 }
 0x15f   :  { %1429 = vmatpush1.bf16.msra.mxu0 %v1230_v0  ;;  %1552 = vmatpush1.bf16.msra.mxu1 %v1232_v18  ;;  %v1263_v0 = vunpack.c.l.s8.bf16 %v919_v26  ;;  %v1265_v18 = vunpack.c.l.s8.bf16 %v921_v49 }
 0x160   :  { %1430 = vmatprep.subr.bf16.mxu0 %v1239_v43  ;;  %1553 = vmatprep.subr.bf16.mxu1 %v1241_v19  ;;  %v918_v43 = vld [vmem:[#allocation3 + $0x4c0] sm:$0xff]  ;;  %v920_v19 = vld [vmem:[#allocation3 + $0x4d0] sm:$0xff] }
 0x161   :  { %v1270_v36 = vunpack.c.h.s8.bf16 %v918_v43  ;;  %v1272_v48 = vunpack.c.h.s8.bf16 %v920_v19 }
 0x163   :  { %1431 = vmatpush1.bf16.msra.mxu0 %v1238_v57  ;;  %1554 = vmatpush1.bf16.msra.mxu1 %v1240_v16  ;;  %v1262_v57 = vunpack.c.l.s8.bf16 %v918_v43  ;;  %v1264_v16 = vunpack.c.l.s8.bf16 %v920_v19 }
 0x164   :  { %1432 = vmatprep.subr.bf16.mxu0 %v1247_v32  ;;  %1555 = vmatprep.subr.bf16.mxu1 %v1249_v5  ;;  %v927_v32 = vld [vmem:[#allocation3 + $0x508] sm:$0xff]  ;;  %v929_v5 = vld [vmem:[#allocation3 + $0x518] sm:$0xff] }
 0x165   :  { %v1287_v26 = vunpack.c.h.s8.bf16 %v927_v32  ;;  %v1289_v49 = vunpack.c.h.s8.bf16 %v929_v5 }
 0x167   :  { %1433 = vmatpush1.bf16.msra.mxu0 %v1246_v41  ;;  %1556 = vmatpush1.bf16.msra.mxu1 %v1248_v22  ;;  %v1279_v41 = vunpack.c.l.s8.bf16 %v927_v32  ;;  %v1281_v22 = vunpack.c.l.s8.bf16 %v929_v5 }
 0x168   :  { %1434 = vmatprep.subr.bf16.mxu0 %v1255_v27  ;;  %1557 = vmatprep.subr.bf16.mxu1 %v1257_v4  ;;  %v926_v27 = vld [vmem:[#allocation3 + $0x500] sm:$0xff]  ;;  %v928_v4 = vld [vmem:[#allocation3 + $0x510] sm:$0xff] }
 0x169   :  { %v1286_v43 = vunpack.c.h.s8.bf16 %v926_v27  ;;  %v1288_v19 = vunpack.c.h.s8.bf16 %v928_v4 }
 0x16b   :  { %1435 = vmatpush1.bf16.msra.mxu0 %v1254_v54  ;;  %1558 = vmatpush1.bf16.msra.mxu1 %v1256_v7  ;;  %v1278_v54 = vunpack.c.l.s8.bf16 %v926_v27  ;;  %v1280_v7 = vunpack.c.l.s8.bf16 %v928_v4 }
 0x16c   :  { %1436 = vmatprep.subr.bf16.mxu0 %v1263_v0  ;;  %1559 = vmatprep.subr.bf16.mxu1 %v1265_v18  ;;  %v935_v0 = vld [vmem:[#allocation3 + $0x548] sm:$0xff]  ;;  %v937_v18 = vld [vmem:[#allocation3 + $0x558] sm:$0xff] }
 0x16d   :  { %v1303_v32 = vunpack.c.h.s8.bf16 %v935_v0  ;;  %v1305_v5 = vunpack.c.h.s8.bf16 %v937_v18 }
 0x16f   :  { %1437 = vmatpush1.bf16.msra.mxu0 %v1262_v57  ;;  %1560 = vmatpush1.bf16.msra.mxu1 %v1264_v16  ;;  %v1295_v57 = vunpack.c.l.s8.bf16 %v935_v0  ;;  %v1297_v16 = vunpack.c.l.s8.bf16 %v937_v18 }
 0x170   :  { %1438 = vmatprep.subr.bf16.mxu0 %v1271_v47  ;;  %1561 = vmatprep.subr.bf16.mxu1 %v1273_v56  ;;  %v934_v47 = vld [vmem:[#allocation3 + $0x540] sm:$0xff]  ;;  %v936_v56 = vld [vmem:[#allocation3 + $0x550] sm:$0xff] }
 0x171   :  { %v1302_v27 = vunpack.c.h.s8.bf16 %v934_v47  ;;  %v1304_v4 = vunpack.c.h.s8.bf16 %v936_v56 }
 0x173   :  { %1439 = vmatpush1.bf16.msra.mxu0 %v1270_v36  ;;  %1562 = vmatpush1.bf16.msra.mxu1 %v1272_v48  ;;  %v1294_v36 = vunpack.c.l.s8.bf16 %v934_v47  ;;  %v1296_v48 = vunpack.c.l.s8.bf16 %v936_v56 }
 0x174   :  { %1440 = vmatprep.subr.bf16.mxu0 %v1279_v41  ;;  %1563 = vmatprep.subr.bf16.mxu1 %v1281_v22  ;;  %v943_v41 = vld [vmem:[#allocation3 + $0x588] sm:$0xff]  ;;  %v945_v22 = vld [vmem:[#allocation3 + $0x598] sm:$0xff] }
 0x175   :  { %v1319_v0 = vunpack.c.h.s8.bf16 %v943_v41  ;;  %v1321_v18 = vunpack.c.h.s8.bf16 %v945_v22 }
 0x177   :  { %1441 = vmatpush1.bf16.msra.mxu0 %v1278_v54  ;;  %1564 = vmatpush1.bf16.msra.mxu1 %v1280_v7  ;;  %v1311_v54 = vunpack.c.l.s8.bf16 %v943_v41  ;;  %v1313_v7 = vunpack.c.l.s8.bf16 %v945_v22 }
 0x178   :  { %1442 = vmatprep.subr.bf16.mxu0 %v1287_v26  ;;  %1565 = vmatprep.subr.bf16.mxu1 %v1289_v49  ;;  %v942_v26 = vld [vmem:[#allocation3 + $0x580] sm:$0xff]  ;;  %v944_v49 = vld [vmem:[#allocation3 + $0x590] sm:$0xff] }
 0x179   :  { %v1318_v47 = vunpack.c.h.s8.bf16 %v942_v26  ;;  %v1320_v56 = vunpack.c.h.s8.bf16 %v944_v49 }
 0x17b   :  { %1443 = vmatpush1.bf16.msra.mxu0 %v1286_v43  ;;  %1566 = vmatpush1.bf16.msra.mxu1 %v1288_v19  ;;  %v1310_v43 = vunpack.c.l.s8.bf16 %v942_v26  ;;  %v1312_v19 = vunpack.c.l.s8.bf16 %v944_v49 }
 0x17c   :  { %1444 = vmatprep.subr.bf16.mxu0 %v1295_v57  ;;  %1567 = vmatprep.subr.bf16.mxu1 %v1297_v16  ;;  %v951_v57 = vld [vmem:[#allocation3 + $0x5c8] sm:$0xff]  ;;  %v953_v16 = vld [vmem:[#allocation3 + $0x5d8] sm:$0xff] }
 0x17d   :  { %v1335_v41 = vunpack.c.h.s8.bf16 %v951_v57  ;;  %v1337_v22 = vunpack.c.h.s8.bf16 %v953_v16 }
 0x17f   :  { %1445 = vmatpush1.bf16.msra.mxu0 %v1294_v36  ;;  %1568 = vmatpush1.bf16.msra.mxu1 %v1296_v48  ;;  %v1327_v36 = vunpack.c.l.s8.bf16 %v951_v57  ;;  %v1329_v48 = vunpack.c.l.s8.bf16 %v953_v16 }
 0x180   :  { %1446 = vmatprep.subr.bf16.mxu0 %v1303_v32  ;;  %1569 = vmatprep.subr.bf16.mxu1 %v1305_v5  ;;  %v950_v32 = vld [vmem:[#allocation3 + $0x5c0] sm:$0xff]  ;;  %v952_v5 = vld [vmem:[#allocation3 + $0x5d0] sm:$0xff] }
 0x181   :  { %v1334_v26 = vunpack.c.h.s8.bf16 %v950_v32  ;;  %v1336_v49 = vunpack.c.h.s8.bf16 %v952_v5 }
 0x183   :  { %1447 = vmatpush1.bf16.msra.mxu0 %v1302_v27  ;;  %1570 = vmatpush1.bf16.msra.mxu1 %v1304_v4  ;;  %v1326_v27 = vunpack.c.l.s8.bf16 %v950_v32  ;;  %v1328_v4 = vunpack.c.l.s8.bf16 %v952_v5  ;;  %v781_v32 = vld [vmem:[#allocation3 + $0x78] sm:$0xff] }
 0x184   :  { %1448 = vmatprep.subr.bf16.mxu0 %v1311_v54  ;;  %1571 = vmatprep.subr.bf16.mxu1 %v1313_v7  ;;  %v771_v54 = vld [vmem:[#allocation3 + $0x28] sm:$0xff]  ;;  %v773_v7 = vld [vmem:[#allocation3 + $0x38] sm:$0xff] }
 0x187   :  { %1449 = vmatpush1.bf16.msra.mxu0 %v1310_v43  ;;  %1572 = vmatpush1.bf16.msra.mxu1 %v1312_v19  ;;  %v963_v43 = vunpack.c.l.s8.bf16 %v771_v54  ;;  %v965_v19 = vunpack.c.l.s8.bf16 %v773_v7 }
 0x188   :  { %1450 = vmatprep.subr.bf16.mxu0 %v1319_v0  ;;  %1573 = vmatprep.subr.bf16.mxu1 %v1321_v18  ;;  %v770_v0 = vld [vmem:[#allocation3 + $0x20] sm:$0xff]  ;;  %v772_v18 = vld [vmem:[#allocation3 + $0x30] sm:$0xff] }
 0x189   :  { %v962_v57 = vunpack.c.l.s8.bf16 %v770_v0  ;;  %v964_v16 = vunpack.c.l.s8.bf16 %v772_v18  ;;  %v970_v5 = vunpack.c.h.s8.bf16 %v770_v0 }
 0x18b   :  { %1451 = vmatpush1.bf16.msra.mxu0 %v1318_v47  ;;  %1574 = vmatpush1.bf16.msra.mxu1 %v1320_v56  ;;  %v5058_v47 = vpack.c.bf16 %v5042_v24, %v5042_v24  ;;  %v971_v56 = vunpack.c.h.s8.bf16 %v771_v54 }
 0x18c   :  { %1452 = vmatprep.subr.bf16.mxu0 %v1327_v36  ;;  %1575 = vmatprep.subr.bf16.mxu1 %v1329_v48  ;;  %v973_v36 = vunpack.c.h.s8.bf16 %v773_v7  ;;  %v779_v48 = vld [vmem:[#allocation3 + $0x68] sm:$0xff] }
 0x18d   :  { %v979_v24 = vunpack.c.l.s8.bf16 %v779_v48 }
 0x18f   :  { %1453 = vmatpush1.bf16.msra.mxu0 %v1326_v27  ;;  %1576 = vmatpush1.bf16.msra.mxu1 %v1328_v4  ;;  %v972_v27 = vunpack.c.h.s8.bf16 %v772_v18  ;;  %v981_v4 = vunpack.c.l.s8.bf16 %v781_v32 }
 0x190   :  { %1454 = vmatprep.subr.bf16.mxu0 %v1335_v41  ;;  %1577 = vmatprep.subr.bf16.mxu1 %v1337_v22  ;;  %v778_v41 = vld [vmem:[#allocation3 + $0x60] sm:$0xff]  ;;  %v780_v22 = vld [vmem:[#allocation3 + $0x70] sm:$0xff] }
 0x191   :  { %v978_v54 = vunpack.c.l.s8.bf16 %v778_v41  ;;  %v980_v7 = vunpack.c.l.s8.bf16 %v780_v22  ;;  %v986_v0 = vunpack.c.h.s8.bf16 %v778_v41  ;;  %v988_v18 = vunpack.c.h.s8.bf16 %v780_v22 }
 0x193   :  { %1455 = vmatpush1.bf16.msra.mxu0 %v1334_v26  ;;  %1578 = vmatpush1.bf16.msra.mxu1 %v1336_v49  ;;  %v987_v26 = vunpack.c.h.s8.bf16 %v779_v48  ;;  %v989_v49 = vunpack.c.h.s8.bf16 %v781_v32 }
 0x194   :  { %1588 = vmatprep.subr.bf16.mxu0 %v963_v43  ;;  %1711 = vmatprep.subr.bf16.mxu1 %v965_v19  ;;  %v787_v43 = vld [vmem:[#allocation3 + $0xa8] sm:$0xff]  ;;  %v789_v19 = vld [vmem:[#allocation3 + $0xb8] sm:$0xff] }
 0x195   :  { %v1003_v48 = vunpack.c.h.s8.bf16 %v787_v43  ;;  %v1005_v32 = vunpack.c.h.s8.bf16 %v789_v19 }
 0x196   :  { %1457 = vmatmul.mubr.bf16.vlgmr.msra.gmra.mrb[0].mxu0 %v5058_v47  ;;  %1580 = vmatmul.mubr.bf16.vlgmr.msra.gmra.mrb[0].mxu1 %v5058_v47 }
 0x197   :  { %1589 = vmatpush1.bf16.msra.mxu0 %v962_v57  ;;  %1712 = vmatpush1.bf16.msra.mxu1 %v964_v16  ;;  %v995_v57 = vunpack.c.l.s8.bf16 %v787_v43  ;;  %v997_v16 = vunpack.c.l.s8.bf16 %v789_v19 }
 0x198   :  { %1590 = vmatprep.subr.bf16.mxu0 %v971_v56  ;;  %1713 = vmatprep.subr.bf16.mxu1 %v973_v36  ;;  %v786_v56 = vld [vmem:[#allocation3 + $0xa0] sm:$0xff] }
 0x199   :  { %1620 = vmatprep.mubr.bf16.mxu0 %v5021_v12  ;;  %1743 = vmatprep.mubr.bf16.mxu1 %v5021_v12  ;;  %v788_v12 = vld [vmem:[#allocation3 + $0xb0] sm:$0xff]  ;;  %v994_v36 = vunpack.c.l.s8.bf16 %v786_v56 }
 0x19a   :  { %v1004_v41 = vunpack.c.h.s8.bf16 %v788_v12 }
 0x19b   :  { %1591 = vmatpush1.bf16.msra.mxu0 %v970_v5  ;;  %1714 = vmatpush1.bf16.msra.mxu1 %v972_v27  ;;  %v996_v5 = vunpack.c.l.s8.bf16 %v788_v12  ;;  %v795_v27 = vld [vmem:[#allocation3 + $0xe8] sm:$0xff] }
 0x19c   :  { %1592 = vmatprep.subr.bf16.mxu0 %v979_v24  ;;  %1715 = vmatprep.subr.bf16.mxu1 %v981_v4  ;;  %v797_v24 = vld [vmem:[#allocation3 + $0xf8] sm:$0xff]  ;;  %v1002_v4 = vunpack.c.h.s8.bf16 %v786_v56  ;;  %v1011_v22 = vunpack.c.l.s8.bf16 %v795_v27  ;;  %v1019_v43 = vunpack.c.h.s8.bf16 %v795_v27 }
 0x19d   :  { %v1021_v19 = vunpack.c.h.s8.bf16 %v797_v24 }
 0x19f   :  { %1593 = vmatpush1.bf16.msra.mxu0 %v978_v54  ;;  %1716 = vmatpush1.bf16.msra.mxu1 %v980_v7  ;;  %v1013_v54 = vunpack.c.l.s8.bf16 %v797_v24  ;;  %v794_v7 = vld [vmem:[#allocation3 + $0xe0] sm:$0xff] }
 0x1a0   :  { %1594 = vmatprep.subr.bf16.mxu0 %v987_v26  ;;  %1717 = vmatprep.subr.bf16.mxu1 %v989_v49  ;;  %v796_v26 = vld [vmem:[#allocation3 + $0xf0] sm:$0xff]  ;;  %v1010_v49 = vunpack.c.l.s8.bf16 %v794_v7 }
 0x1a1   :  { %v1020_v56 = vunpack.c.h.s8.bf16 %v796_v26 }
 0x1a3   :  { %1595 = vmatpush1.bf16.msra.mxu0 %v986_v0  ;;  %1718 = vmatpush1.bf16.msra.mxu1 %v988_v18  ;;  %v1012_v0 = vunpack.c.l.s8.bf16 %v796_v26  ;;  %v803_v18 = vld [vmem:[#allocation3 + $0x128] sm:$0xff] }
 0x1a4   :  { %1596 = vmatprep.subr.bf16.mxu0 %v995_v57  ;;  %1719 = vmatprep.subr.bf16.mxu1 %v997_v16  ;;  %v805_v57 = vld [vmem:[#allocation3 + $0x138] sm:$0xff]  ;;  %v1018_v16 = vunpack.c.h.s8.bf16 %v794_v7  ;;  %v1027_v12 = vunpack.c.l.s8.bf16 %v803_v18  ;;  %v1035_v27 = vunpack.c.h.s8.bf16 %v803_v18 }
 0x1a5   :  { %v1037_v24 = vunpack.c.h.s8.bf16 %v805_v57 }
 0x1a7   :  { %1597 = vmatpush1.bf16.msra.mxu0 %v994_v36  ;;  %1720 = vmatpush1.bf16.msra.mxu1 %v996_v5  ;;  %v1029_v36 = vunpack.c.l.s8.bf16 %v805_v57  ;;  %v802_v5 = vld [vmem:[#allocation3 + $0x120] sm:$0xff] }
 0x1a8   :  { %1598 = vmatprep.subr.bf16.mxu0 %v1003_v48  ;;  %1721 = vmatprep.subr.bf16.mxu1 %v1005_v32  ;;  %v804_v48 = vld [vmem:[#allocation3 + $0x130] sm:$0xff]  ;;  %v1026_v32 = vunpack.c.l.s8.bf16 %v802_v5 }
 0x1a9   :  { %v1036_v7 = vunpack.c.h.s8.bf16 %v804_v48 }
 0x1ab   :  { %1599 = vmatpush1.bf16.msra.mxu0 %v1002_v4  ;;  %1722 = vmatpush1.bf16.msra.mxu1 %v1004_v41  ;;  %v1028_v4 = vunpack.c.l.s8.bf16 %v804_v48  ;;  %v811_v41 = vld [vmem:[#allocation3 + $0x168] sm:$0xff] }
 0x1ac   :  { %1600 = vmatprep.subr.bf16.mxu0 %v1011_v22  ;;  %1723 = vmatprep.subr.bf16.mxu1 %v1013_v54  ;;  %v813_v22 = vld [vmem:[#allocation3 + $0x178] sm:$0xff]  ;;  %v1034_v54 = vunpack.c.h.s8.bf16 %v802_v5  ;;  %v1043_v26 = vunpack.c.l.s8.bf16 %v811_v41  ;;  %v1051_v18 = vunpack.c.h.s8.bf16 %v811_v41 }
 0x1ad   :  { %v1053_v57 = vunpack.c.h.s8.bf16 %v813_v22 }
 0x1af   :  { %1601 = vmatpush1.bf16.msra.mxu0 %v1010_v49  ;;  %1724 = vmatpush1.bf16.msra.mxu1 %v1012_v0  ;;  %v1045_v49 = vunpack.c.l.s8.bf16 %v813_v22  ;;  %v810_v0 = vld [vmem:[#allocation3 + $0x160] sm:$0xff] }
 0x1b0   :  { %1602 = vmatprep.subr.bf16.mxu0 %v1019_v43  ;;  %1725 = vmatprep.subr.bf16.mxu1 %v1021_v19  ;;  %v812_v43 = vld [vmem:[#allocation3 + $0x170] sm:$0xff]  ;;  %v1042_v19 = vunpack.c.l.s8.bf16 %v810_v0 }
 0x1b1   :  { %v1052_v5 = vunpack.c.h.s8.bf16 %v812_v43 }
 0x1b3   :  { %1603 = vmatpush1.bf16.msra.mxu0 %v1018_v16  ;;  %1726 = vmatpush1.bf16.msra.mxu1 %v1020_v56  ;;  %v1044_v16 = vunpack.c.l.s8.bf16 %v812_v43  ;;  %v819_v56 = vld [vmem:[#allocation3 + $0x1a8] sm:$0xff] }
 0x1b4   :  { %1604 = vmatprep.subr.bf16.mxu0 %v1027_v12  ;;  %1727 = vmatprep.subr.bf16.mxu1 %v1029_v36  ;;  %v821_v12 = vld [vmem:[#allocation3 + $0x1b8] sm:$0xff]  ;;  %v1050_v36 = vunpack.c.h.s8.bf16 %v810_v0  ;;  %v1059_v48 = vunpack.c.l.s8.bf16 %v819_v56  ;;  %v1067_v41 = vunpack.c.h.s8.bf16 %v819_v56 }
 0x1b5   :  { %v1069_v22 = vunpack.c.h.s8.bf16 %v821_v12 }
 0x1b7   :  { %1605 = vmatpush1.bf16.msra.mxu0 %v1026_v32  ;;  %1728 = vmatpush1.bf16.msra.mxu1 %v1028_v4  ;;  %v1061_v32 = vunpack.c.l.s8.bf16 %v821_v12  ;;  %v818_v4 = vld [vmem:[#allocation3 + $0x1a0] sm:$0xff] }
 0x1b8   :  { %1606 = vmatprep.subr.bf16.mxu0 %v1035_v27  ;;  %1729 = vmatprep.subr.bf16.mxu1 %v1037_v24  ;;  %v820_v27 = vld [vmem:[#allocation3 + $0x1b0] sm:$0xff]  ;;  %v1058_v24 = vunpack.c.l.s8.bf16 %v818_v4 }
 0x1b9   :  { %v1068_v0 = vunpack.c.h.s8.bf16 %v820_v27 }
 0x1bb   :  { %1607 = vmatpush1.bf16.msra.mxu0 %v1034_v54  ;;  %1730 = vmatpush1.bf16.msra.mxu1 %v1036_v7  ;;  %v1060_v54 = vunpack.c.l.s8.bf16 %v820_v27  ;;  %v827_v7 = vld [vmem:[#allocation3 + $0x1e8] sm:$0xff] }
 0x1bc   :  { %1608 = vmatprep.subr.bf16.mxu0 %v1043_v26  ;;  %1731 = vmatprep.subr.bf16.mxu1 %v1045_v49  ;;  %v829_v26 = vld [vmem:[#allocation3 + $0x1f8] sm:$0xff]  ;;  %v1066_v49 = vunpack.c.h.s8.bf16 %v818_v4  ;;  %v1075_v43 = vunpack.c.l.s8.bf16 %v827_v7  ;;  %v1083_v56 = vunpack.c.h.s8.bf16 %v827_v7 }
 0x1bd   :  { %v1085_v12 = vunpack.c.h.s8.bf16 %v829_v26 }
 0x1bf   :  { %1609 = vmatpush1.bf16.msra.mxu0 %v1042_v19  ;;  %1732 = vmatpush1.bf16.msra.mxu1 %v1044_v16  ;;  %v1077_v19 = vunpack.c.l.s8.bf16 %v829_v26  ;;  %v826_v16 = vld [vmem:[#allocation3 + $0x1e0] sm:$0xff] }
 0x1c0   :  { %1610 = vmatprep.subr.bf16.mxu0 %v1051_v18  ;;  %1733 = vmatprep.subr.bf16.mxu1 %v1053_v57  ;;  %v828_v18 = vld [vmem:[#allocation3 + $0x1f0] sm:$0xff]  ;;  %v1074_v57 = vunpack.c.l.s8.bf16 %v826_v16 }
 0x1c1   :  { %v1084_v4 = vunpack.c.h.s8.bf16 %v828_v18 }
 0x1c3   :  { %1611 = vmatpush1.bf16.msra.mxu0 %v1050_v36  ;;  %1734 = vmatpush1.bf16.msra.mxu1 %v1052_v5  ;;  %v1076_v36 = vunpack.c.l.s8.bf16 %v828_v18  ;;  %v835_v5 = vld [vmem:[#allocation3 + $0x228] sm:$0xff] }
 0x1c4   :  { %1612 = vmatprep.subr.bf16.mxu0 %v1059_v48  ;;  %1735 = vmatprep.subr.bf16.mxu1 %v1061_v32  ;;  %v837_v48 = vld [vmem:[#allocation3 + $0x238] sm:$0xff]  ;;  %v1082_v32 = vunpack.c.h.s8.bf16 %v826_v16  ;;  %v1091_v27 = vunpack.c.l.s8.bf16 %v835_v5  ;;  %v1099_v7 = vunpack.c.h.s8.bf16 %v835_v5 }
 0x1c5   :  { %v1101_v26 = vunpack.c.h.s8.bf16 %v837_v48 }
 0x1c7   :  { %1613 = vmatpush1.bf16.msra.mxu0 %v1058_v24  ;;  %1736 = vmatpush1.bf16.msra.mxu1 %v1060_v54  ;;  %v1093_v24 = vunpack.c.l.s8.bf16 %v837_v48  ;;  %v834_v54 = vld [vmem:[#allocation3 + $0x220] sm:$0xff] }
 0x1c8   :  { %1614 = vmatprep.subr.bf16.mxu0 %v1067_v41  ;;  %1737 = vmatprep.subr.bf16.mxu1 %v1069_v22  ;;  %v836_v41 = vld [vmem:[#allocation3 + $0x230] sm:$0xff]  ;;  %v1090_v22 = vunpack.c.l.s8.bf16 %v834_v54 }
 0x1c9   :  { %v1100_v16 = vunpack.c.h.s8.bf16 %v836_v41 }
 0x1cb   :  { %1615 = vmatpush1.bf16.msra.mxu0 %v1066_v49  ;;  %1738 = vmatpush1.bf16.msra.mxu1 %v1068_v0  ;;  %v1092_v49 = vunpack.c.l.s8.bf16 %v836_v41  ;;  %v843_v0 = vld [vmem:[#allocation3 + $0x268] sm:$0xff] }
 0x1cc   :  { %1616 = vmatprep.subr.bf16.mxu0 %v1075_v43  ;;  %1739 = vmatprep.subr.bf16.mxu1 %v1077_v19  ;;  %v845_v43 = vld [vmem:[#allocation3 + $0x278] sm:$0xff]  ;;  %v1098_v19 = vunpack.c.h.s8.bf16 %v834_v54  ;;  %v1107_v18 = vunpack.c.l.s8.bf16 %v843_v0 }
 0x1cd   :  { %v1117_v48 = vunpack.c.h.s8.bf16 %v845_v43 }
 0x1cf   :  { %1617 = vmatpush1.bf16.msra.mxu0 %v1074_v57  ;;  %1740 = vmatpush1.bf16.msra.mxu1 %v1076_v36  ;;  %v1109_v57 = vunpack.c.l.s8.bf16 %v845_v43  ;;  %v842_v36 = vld [vmem:[#allocation3 + $0x260] sm:$0xff]  ;;  %v859_v43 = vld [vmem:[#allocation3 + $0x2e8] sm:$0xff] }
 0x1d0   :  { %1618 = vmatprep.subr.bf16.mxu0 %v1083_v56  ;;  %1741 = vmatprep.subr.bf16.mxu1 %v1085_v12  ;;  %v844_v56 = vld [vmem:[#allocation3 + $0x270] sm:$0xff]  ;;  %v1106_v12 = vunpack.c.l.s8.bf16 %v842_v36 }
 0x1d1   :  { %v1108_v5 = vunpack.c.l.s8.bf16 %v844_v56 }
 0x1d3   :  { %1619 = vmatpush1.bf16.msra.mxu0 %v1082_v32  ;;  %1742 = vmatpush1.bf16.msra.mxu1 %v1084_v4  ;;  %v851_v32 = vld [vmem:[#allocation3 + $0x2a8] sm:$0xff]  ;;  %v853_v4 = vld [vmem:[#allocation3 + $0x2b8] sm:$0xff] }
 0x1d4   :  { %1629 = vmatprep.subr.bf16.mxu0 %v1091_v27  ;;  %1752 = vmatprep.subr.bf16.mxu1 %v1093_v24  ;;  %v1114_v27 = vunpack.c.h.s8.bf16 %v842_v36  ;;  %v1116_v24 = vunpack.c.h.s8.bf16 %v844_v56  ;;  %v1123_v54 = vunpack.c.l.s8.bf16 %v851_v32  ;;  %v1125_v41 = vunpack.c.l.s8.bf16 %v853_v4  ;;  %v858_v56 = vld [vmem:[#allocation3 + $0x2e0] sm:$0xff] }
 0x1d6   :  { %1621 = vmatmul.mubr.bf16.vlgmr.msra.gmra.mrb[4].mxu0 %v5034_v21  ;;  %1744 = vmatmul.mubr.bf16.vlgmr.msra.gmra.mrb[4].mxu1 %v5034_v21  ;;  %v1115_v21 = vunpack.c.h.s8.bf16 %v843_v0  ;;  %v1133_v0 = vunpack.c.h.s8.bf16 %v853_v4  ;;  %v867_v4 = vld [vmem:[#allocation3 + $0x328] sm:$0xff] }
 0x1d7   :  { %1630 = vmatpush1.bf16.msra.mxu0 %v1090_v22  ;;  %1753 = vmatpush1.bf16.msra.mxu1 %v1092_v49  ;;  %v850_v22 = vld [vmem:[#allocation3 + $0x2a0] sm:$0xff] }
 0x1d8   :  { %1631 = vmatprep.subr.bf16.mxu0 %v1099_v7  ;;  %1754 = vmatprep.subr.bf16.mxu1 %v1101_v26  ;;  %v1122_v49 = vunpack.c.l.s8.bf16 %v850_v22  ;;  %v1131_v26 = vunpack.c.h.s8.bf16 %v851_v32 }
 0x1d9   :  { %1661 = vmatprep.mubr.bf16.mxu0 %v5036_v39  ;;  %1784 = vmatprep.mubr.bf16.mxu1 %v5036_v39  ;;  %v852_v39 = vld [vmem:[#allocation3 + $0x2b0] sm:$0xff] }
 0x1da   :  { %v1124_v7 = vunpack.c.l.s8.bf16 %v852_v39 }
 0x1db   :  { %1632 = vmatpush1.bf16.msra.mxu0 %v1098_v19  ;;  %1755 = vmatpush1.bf16.msra.mxu1 %v1100_v16  ;;  %v861_v19 = vld [vmem:[#allocation3 + $0x2f8] sm:$0xff]  ;;  %v1130_v16 = vunpack.c.h.s8.bf16 %v850_v22 }
 0x1dc   :  { %1633 = vmatprep.subr.bf16.mxu0 %v1107_v18  ;;  %1756 = vmatprep.subr.bf16.mxu1 %v1109_v57  ;;  %v1132_v18 = vunpack.c.h.s8.bf16 %v852_v39  ;;  %v1139_v57 = vunpack.c.l.s8.bf16 %v859_v43  ;;  %v1141_v36 = vunpack.c.l.s8.bf16 %v861_v19  ;;  %v1149_v32 = vunpack.c.h.s8.bf16 %v861_v19  ;;  %v866_v39 = vld [vmem:[#allocation3 + $0x320] sm:$0xff]  ;;  %v875_v19 = vld [vmem:[#allocation3 + $0x368] sm:$0xff] }
 0x1df   :  { %1634 = vmatpush1.bf16.msra.mxu0 %v1106_v12  ;;  %1757 = vmatpush1.bf16.msra.mxu1 %v1108_v5  ;;  %v860_v12 = vld [vmem:[#allocation3 + $0x2f0] sm:$0xff]  ;;  %v1138_v5 = vunpack.c.l.s8.bf16 %v858_v56 }
 0x1e0   :  { %1635 = vmatprep.subr.bf16.mxu0 %v1115_v21  ;;  %1758 = vmatprep.subr.bf16.mxu1 %v1117_v48  ;;  %v1140_v21 = vunpack.c.l.s8.bf16 %v860_v12  ;;  %v1147_v48 = vunpack.c.h.s8.bf16 %v859_v43 }
 0x1e3   :  { %1636 = vmatpush1.bf16.msra.mxu0 %v1114_v27  ;;  %1759 = vmatpush1.bf16.msra.mxu1 %v1116_v24  ;;  %v869_v27 = vld [vmem:[#allocation3 + $0x338] sm:$0xff]  ;;  %v1146_v24 = vunpack.c.h.s8.bf16 %v858_v56 }
 0x1e4   :  { %1637 = vmatprep.subr.bf16.mxu0 %v1123_v54  ;;  %1760 = vmatprep.subr.bf16.mxu1 %v1125_v41  ;;  %v1148_v54 = vunpack.c.h.s8.bf16 %v860_v12  ;;  %v1155_v41 = vunpack.c.l.s8.bf16 %v867_v4  ;;  %v1157_v22 = vunpack.c.l.s8.bf16 %v869_v27  ;;  %v1165_v43 = vunpack.c.h.s8.bf16 %v869_v27  ;;  %v874_v12 = vld [vmem:[#allocation3 + $0x360] sm:$0xff]  ;;  %v883_v27 = vld [vmem:[#allocation3 + $0x3a8] sm:$0xff] }
 0x1e7   :  { %1638 = vmatpush1.bf16.msra.mxu0 %v1122_v49  ;;  %1761 = vmatpush1.bf16.msra.mxu1 %v1124_v7  ;;  %v868_v49 = vld [vmem:[#allocation3 + $0x330] sm:$0xff]  ;;  %v1154_v7 = vunpack.c.l.s8.bf16 %v866_v39 }
 0x1e8   :  { %1639 = vmatprep.subr.bf16.mxu0 %v1131_v26  ;;  %1762 = vmatprep.subr.bf16.mxu1 %v1133_v0  ;;  %v1156_v26 = vunpack.c.l.s8.bf16 %v868_v49  ;;  %v1163_v0 = vunpack.c.h.s8.bf16 %v867_v4 }
 0x1eb   :  { %1640 = vmatpush1.bf16.msra.mxu0 %v1130_v16  ;;  %1763 = vmatpush1.bf16.msra.mxu1 %v1132_v18  ;;  %v877_v16 = vld [vmem:[#allocation3 + $0x378] sm:$0xff]  ;;  %v1162_v18 = vunpack.c.h.s8.bf16 %v866_v39 }
 0x1ec   :  { %1641 = vmatprep.subr.bf16.mxu0 %v1139_v57  ;;  %1764 = vmatprep.subr.bf16.mxu1 %v1141_v36  ;;  %v1164_v57 = vunpack.c.h.s8.bf16 %v868_v49  ;;  %v1171_v36 = vunpack.c.l.s8.bf16 %v875_v19  ;;  %v1173_v56 = vunpack.c.l.s8.bf16 %v877_v16  ;;  %v1181_v4 = vunpack.c.h.s8.bf16 %v877_v16  ;;  %v882_v49 = vld [vmem:[#allocation3 + $0x3a0] sm:$0xff]  ;;  %v891_v16 = vld [vmem:[#allocation3 + $0x3e8] sm:$0xff] }
 0x1ef   :  { %1642 = vmatpush1.bf16.msra.mxu0 %v1138_v5  ;;  %1765 = vmatpush1.bf16.msra.mxu1 %v1140_v21  ;;  %v876_v5 = vld [vmem:[#allocation3 + $0x370] sm:$0xff]  ;;  %v1170_v21 = vunpack.c.l.s8.bf16 %v874_v12 }
 0x1f0   :  { %1643 = vmatprep.subr.bf16.mxu0 %v1147_v48  ;;  %1766 = vmatprep.subr.bf16.mxu1 %v1149_v32  ;;  %v1172_v48 = vunpack.c.l.s8.bf16 %v876_v5  ;;  %v1179_v32 = vunpack.c.h.s8.bf16 %v875_v19 }
 0x1f3   :  { %1644 = vmatpush1.bf16.msra.mxu0 %v1146_v24  ;;  %1767 = vmatpush1.bf16.msra.mxu1 %v1148_v54  ;;  %v885_v24 = vld [vmem:[#allocation3 + $0x3b8] sm:$0xff]  ;;  %v1178_v54 = vunpack.c.h.s8.bf16 %v874_v12 }
 0x1f4   :  { %1645 = vmatprep.subr.bf16.mxu0 %v1155_v41  ;;  %1768 = vmatprep.subr.bf16.mxu1 %v1157_v22  ;;  %v1180_v41 = vunpack.c.h.s8.bf16 %v876_v5  ;;  %v1187_v22 = vunpack.c.l.s8.bf16 %v883_v27  ;;  %v1189_v39 = vunpack.c.l.s8.bf16 %v885_v24  ;;  %v1197_v19 = vunpack.c.h.s8.bf16 %v885_v24  ;;  %v890_v5 = vld [vmem:[#allocation3 + $0x3e0] sm:$0xff]  ;;  %v899_v24 = vld [vmem:[#allocation3 + $0x428] sm:$0xff] }
 0x1f7   :  { %1646 = vmatpush1.bf16.msra.mxu0 %v1154_v7  ;;  %1769 = vmatpush1.bf16.msra.mxu1 %v1156_v26  ;;  %v884_v7 = vld [vmem:[#allocation3 + $0x3b0] sm:$0xff]  ;;  %v1186_v26 = vunpack.c.l.s8.bf16 %v882_v49 }
 0x1f8   :  { %1647 = vmatprep.subr.bf16.mxu0 %v1163_v0  ;;  %1770 = vmatprep.subr.bf16.mxu1 %v1165_v43  ;;  %v1188_v0 = vunpack.c.l.s8.bf16 %v884_v7  ;;  %v1195_v43 = vunpack.c.h.s8.bf16 %v883_v27 }
 0x1fb   :  { %1648 = vmatpush1.bf16.msra.mxu0 %v1162_v18  ;;  %1771 = vmatpush1.bf16.msra.mxu1 %v1164_v57  ;;  %v893_v18 = vld [vmem:[#allocation3 + $0x3f8] sm:$0xff]  ;;  %v1194_v57 = vunpack.c.h.s8.bf16 %v882_v49 }
 0x1fc   :  { %1649 = vmatprep.subr.bf16.mxu0 %v1171_v36  ;;  %1772 = vmatprep.subr.bf16.mxu1 %v1173_v56  ;;  %v1196_v36 = vunpack.c.h.s8.bf16 %v884_v7  ;;  %v1203_v56 = vunpack.c.l.s8.bf16 %v891_v16  ;;  %v1205_v12 = vunpack.c.l.s8.bf16 %v893_v18  ;;  %v1213_v27 = vunpack.c.h.s8.bf16 %v893_v18  ;;  %v898_v7 = vld [vmem:[#allocation3 + $0x420] sm:$0xff]  ;;  %v907_v18 = vld [vmem:[#allocation3 + $0x468] sm:$0xff] }
 0x1ff   :  { %1650 = vmatpush1.bf16.msra.mxu0 %v1170_v21  ;;  %1773 = vmatpush1.bf16.msra.mxu1 %v1172_v48  ;;  %v892_v21 = vld [vmem:[#allocation3 + $0x3f0] sm:$0xff]  ;;  %v1202_v48 = vunpack.c.l.s8.bf16 %v890_v5 }
 0x200   :  { %1651 = vmatprep.subr.bf16.mxu0 %v1179_v32  ;;  %1774 = vmatprep.subr.bf16.mxu1 %v1181_v4  ;;  %v1204_v32 = vunpack.c.l.s8.bf16 %v892_v21  ;;  %v1211_v4 = vunpack.c.h.s8.bf16 %v891_v16 }
 0x203   :  { %1652 = vmatpush1.bf16.msra.mxu0 %v1178_v54  ;;  %1775 = vmatpush1.bf16.msra.mxu1 %v1180_v41  ;;  %v901_v54 = vld [vmem:[#allocation3 + $0x438] sm:$0xff]  ;;  %v1210_v41 = vunpack.c.h.s8.bf16 %v890_v5 }
 0x204   :  { %1653 = vmatprep.subr.bf16.mxu0 %v1187_v22  ;;  %1776 = vmatprep.subr.bf16.mxu1 %v1189_v39  ;;  %v1212_v22 = vunpack.c.h.s8.bf16 %v892_v21  ;;  %v1219_v39 = vunpack.c.l.s8.bf16 %v899_v24  ;;  %v1221_v49 = vunpack.c.l.s8.bf16 %v901_v54  ;;  %v1229_v16 = vunpack.c.h.s8.bf16 %v901_v54  ;;  %v906_v21 = vld [vmem:[#allocation3 + $0x460] sm:$0xff]  ;;  %v917_v54 = vld [vmem:[#allocation3 + $0x4b8] sm:$0xff] }
 0x207   :  { %1654 = vmatpush1.bf16.msra.mxu0 %v1186_v26  ;;  %1777 = vmatpush1.bf16.msra.mxu1 %v1188_v0  ;;  %v900_v26 = vld [vmem:[#allocation3 + $0x430] sm:$0xff]  ;;  %v1218_v0 = vunpack.c.l.s8.bf16 %v898_v7 }
 0x208   :  { %1655 = vmatprep.subr.bf16.mxu0 %v1195_v43  ;;  %1778 = vmatprep.subr.bf16.mxu1 %v1197_v19  ;;  %v1220_v43 = vunpack.c.l.s8.bf16 %v900_v26  ;;  %v1227_v19 = vunpack.c.h.s8.bf16 %v899_v24  ;;  %v915_v24 = vld [vmem:[#allocation3 + $0x4a8] sm:$0xff] }
 0x20b   :  { %1656 = vmatpush1.bf16.msra.mxu0 %v1194_v57  ;;  %1779 = vmatpush1.bf16.msra.mxu1 %v1196_v36  ;;  %v909_v57 = vld [vmem:[#allocation3 + $0x478] sm:$0xff]  ;;  %v1226_v36 = vunpack.c.h.s8.bf16 %v898_v7  ;;  %v914_v7 = vld [vmem:[#allocation3 + $0x4a0] sm:$0xff] }
 0x20c   :  { %1657 = vmatprep.subr.bf16.mxu0 %v1203_v56  ;;  %1780 = vmatprep.subr.bf16.mxu1 %v1205_v12  ;;  %v1228_v56 = vunpack.c.h.s8.bf16 %v900_v26  ;;  %v1235_v12 = vunpack.c.l.s8.bf16 %v907_v18  ;;  %v1237_v5 = vunpack.c.l.s8.bf16 %v909_v57  ;;  %v1250_v26 = vunpack.c.l.s8.bf16 %v914_v7 }
 0x20f   :  { %1658 = vmatpush1.bf16.msra.mxu0 %v1202_v48  ;;  %1781 = vmatpush1.bf16.msra.mxu1 %v1204_v32  ;;  %v908_v48 = vld [vmem:[#allocation3 + $0x470] sm:$0xff]  ;;  %v1234_v32 = vunpack.c.l.s8.bf16 %v906_v21 }
 0x210   :  { %1659 = vmatprep.subr.bf16.mxu0 %v1211_v4  ;;  %1782 = vmatprep.subr.bf16.mxu1 %v1213_v27  ;;  %v1236_v4 = vunpack.c.l.s8.bf16 %v908_v48  ;;  %v1245_v27 = vunpack.c.h.s8.bf16 %v909_v57  ;;  %v1258_v57 = vunpack.c.h.s8.bf16 %v914_v7  ;;  %v932_v7 = vld [vmem:[#allocation3 + $0x530] sm:$0xff] }
 0x213   :  { %1660 = vmatpush1.bf16.msra.mxu0 %v1210_v41  ;;  %1783 = vmatpush1.bf16.msra.mxu1 %v1212_v22  ;;  %v1242_v41 = vunpack.c.h.s8.bf16 %v906_v21  ;;  %v1244_v22 = vunpack.c.h.s8.bf16 %v908_v48  ;;  %v924_v21 = vld [vmem:[#allocation3 + $0x4f0] sm:$0xff] }
 0x214   :  { %1670 = vmatprep.subr.bf16.mxu0 %v1219_v39  ;;  %1793 = vmatprep.subr.bf16.mxu1 %v1221_v49  ;;  %v1251_v39 = vunpack.c.l.s8.bf16 %v915_v24  ;;  %v1253_v49 = vunpack.c.l.s8.bf16 %v917_v54 }
 0x216   :  { %1662 = vmatmul.mubr.bf16.vlgmr.msra.gmra.mrb[4].mxu0 %v5048_v44  ;;  %1785 = vmatmul.mubr.bf16.vlgmr.msra.gmra.mrb[4].mxu1 %v5048_v44  ;;  %v1243_v44 = vunpack.c.h.s8.bf16 %v907_v18  ;;  %v925_v18 = vld [vmem:[#allocation3 + $0x4f8] sm:$0xff] }
 0x217   :  { %1671 = vmatpush1.bf16.msra.mxu0 %v1218_v0  ;;  %1794 = vmatpush1.bf16.msra.mxu1 %v1220_v43  ;;  %v1259_v43 = vunpack.c.h.s8.bf16 %v915_v24  ;;  %v933_v24 = vld [vmem:[#allocation3 + $0x538] sm:$0xff] }
 0x218   :  { %1672 = vmatprep.subr.bf16.mxu0 %v1227_v19  ;;  %1795 = vmatprep.subr.bf16.mxu1 %v1229_v16  ;;  %v1261_v19 = vunpack.c.h.s8.bf16 %v917_v54  ;;  %v923_v16 = vld [vmem:[#allocation3 + $0x4e8] sm:$0xff] }
 0x219   :  { %1702 = vmatprep.mubr.bf16.mxu0 %v5050_v50  ;;  %1825 = vmatprep.mubr.bf16.mxu1 %v5050_v50  ;;  %v916_v50 = vld [vmem:[#allocation3 + $0x4b0] sm:$0xff] }
 0x21a   :  { %v1252_v0 = vunpack.c.l.s8.bf16 %v916_v50 }
 0x21b   :  { %1673 = vmatpush1.bf16.msra.mxu0 %v1226_v36  ;;  %1796 = vmatpush1.bf16.msra.mxu1 %v1228_v56  ;;  %v1260_v36 = vunpack.c.h.s8.bf16 %v916_v50  ;;  %v1267_v56 = vunpack.c.l.s8.bf16 %v923_v16 }
 0x21c   :  { %1674 = vmatprep.subr.bf16.mxu0 %v1235_v12  ;;  %1797 = vmatprep.subr.bf16.mxu1 %v1237_v5  ;;  %v1269_v12 = vunpack.c.l.s8.bf16 %v925_v18  ;;  %v922_v5 = vld [vmem:[#allocation3 + $0x4e0] sm:$0xff] }
 0x21d   :  { %v1266_v48 = vunpack.c.l.s8.bf16 %v922_v5  ;;  %v1274_v54 = vunpack.c.h.s8.bf16 %v922_v5  ;;  %v940_v5 = vld [vmem:[#allocation3 + $0x570] sm:$0xff] }
 0x21f   :  { %1675 = vmatpush1.bf16.msra.mxu0 %v1234_v32  ;;  %1798 = vmatpush1.bf16.msra.mxu1 %v1236_v4  ;;  %v1268_v32 = vunpack.c.l.s8.bf16 %v924_v21  ;;  %v1275_v4 = vunpack.c.h.s8.bf16 %v923_v16  ;;  %v941_v16 = vld [vmem:[#allocation3 + $0x578] sm:$0xff] }
 0x220   :  { %1676 = vmatprep.subr.bf16.mxu0 %v1243_v44  ;;  %1799 = vmatprep.subr.bf16.mxu1 %v1245_v27  ;;  %v1277_v44 = vunpack.c.h.s8.bf16 %v925_v18  ;;  %v931_v27 = vld [vmem:[#allocation3 + $0x528] sm:$0xff] }
 0x223   :  { %1677 = vmatpush1.bf16.msra.mxu0 %v1242_v41  ;;  %1800 = vmatpush1.bf16.msra.mxu1 %v1244_v22  ;;  %v1276_v41 = vunpack.c.h.s8.bf16 %v924_v21  ;;  %v1283_v22 = vunpack.c.l.s8.bf16 %v931_v27 }
 0x224   :  { %1678 = vmatprep.subr.bf16.mxu0 %v1251_v39  ;;  %1801 = vmatprep.subr.bf16.mxu1 %v1253_v49  ;;  %v1285_v39 = vunpack.c.l.s8.bf16 %v933_v24  ;;  %v930_v49 = vld [vmem:[#allocation3 + $0x520] sm:$0xff] }
 0x225   :  { %v1282_v50 = vunpack.c.l.s8.bf16 %v930_v49  ;;  %v1290_v18 = vunpack.c.h.s8.bf16 %v930_v49  ;;  %v948_v49 = vld [vmem:[#allocation3 + $0x5b0] sm:$0xff] }
 0x227   :  { %1679 = vmatpush1.bf16.msra.mxu0 %v1250_v26  ;;  %1802 = vmatpush1.bf16.msra.mxu1 %v1252_v0  ;;  %v1284_v26 = vunpack.c.l.s8.bf16 %v932_v7  ;;  %v1291_v0 = vunpack.c.h.s8.bf16 %v931_v27  ;;  %v949_v27 = vld [vmem:[#allocation3 + $0x5b8] sm:$0xff] }
 0x228   :  { %1680 = vmatprep.subr.bf16.mxu0 %v1259_v43  ;;  %1803 = vmatprep.subr.bf16.mxu1 %v1261_v19  ;;  %v1293_v43 = vunpack.c.h.s8.bf16 %v933_v24  ;;  %v939_v19 = vld [vmem:[#allocation3 + $0x568] sm:$0xff] }
 0x22b   :  { %1681 = vmatpush1.bf16.msra.mxu0 %v1258_v57  ;;  %1804 = vmatpush1.bf16.msra.mxu1 %v1260_v36  ;;  %v1292_v57 = vunpack.c.h.s8.bf16 %v932_v7  ;;  %v1299_v36 = vunpack.c.l.s8.bf16 %v939_v19 }
 0x22c   :  { %1682 = vmatprep.subr.bf16.mxu0 %v1267_v56  ;;  %1805 = vmatprep.subr.bf16.mxu1 %v1269_v12  ;;  %v1301_v56 = vunpack.c.l.s8.bf16 %v941_v16  ;;  %v938_v12 = vld [vmem:[#allocation3 + $0x560] sm:$0xff] }
 0x22d   :  { %v1298_v21 = vunpack.c.l.s8.bf16 %v938_v12  ;;  %v1306_v24 = vunpack.c.h.s8.bf16 %v938_v12  ;;  %v956_v12 = vld [vmem:[#allocation3 + $0x5f0] sm:$0xff] }
 0x22f   :  { %1683 = vmatpush1.bf16.msra.mxu0 %v1266_v48  ;;  %1806 = vmatpush1.bf16.msra.mxu1 %v1268_v32  ;;  %v1300_v48 = vunpack.c.l.s8.bf16 %v940_v5  ;;  %v1307_v32 = vunpack.c.h.s8.bf16 %v939_v19  ;;  %v957_v19 = vld [vmem:[#allocation3 + $0x5f8] sm:$0xff] }
 0x230   :  { %1684 = vmatprep.subr.bf16.mxu0 %v1275_v4  ;;  %1807 = vmatprep.subr.bf16.mxu1 %v1277_v44  ;;  %v1309_v4 = vunpack.c.h.s8.bf16 %v941_v16  ;;  %v947_v44 = vld [vmem:[#allocation3 + $0x5a8] sm:$0xff] }
 0x233   :  { %1685 = vmatpush1.bf16.msra.mxu0 %v1274_v54  ;;  %1808 = vmatpush1.bf16.msra.mxu1 %v1276_v41  ;;  %v1308_v54 = vunpack.c.h.s8.bf16 %v940_v5  ;;  %v1315_v41 = vunpack.c.l.s8.bf16 %v947_v44 }
 0x234   :  { %1686 = vmatprep.subr.bf16.mxu0 %v1283_v22  ;;  %1809 = vmatprep.subr.bf16.mxu1 %v1285_v39  ;;  %v1317_v22 = vunpack.c.l.s8.bf16 %v949_v27  ;;  %v946_v39 = vld [vmem:[#allocation3 + $0x5a0] sm:$0xff] }
 0x235   :  { %v1314_v7 = vunpack.c.l.s8.bf16 %v946_v39  ;;  %v1322_v16 = vunpack.c.h.s8.bf16 %v946_v39  ;;  %v6490_v39 = vunpack.c.h.s8.bf16 %v4240_v15 }
 0x237   :  { %1687 = vmatpush1.bf16.msra.mxu0 %v1282_v50  ;;  %1810 = vmatpush1.bf16.msra.mxu1 %v1284_v26  ;;  %v1316_v50 = vunpack.c.l.s8.bf16 %v948_v49  ;;  %v1323_v26 = vunpack.c.h.s8.bf16 %v947_v44  ;;  %v1340_v44 = vunpack.c.h.s8.bf16 %v956_v12 }
 0x238   :  { %1688 = vmatprep.subr.bf16.mxu0 %v1291_v0  ;;  %1811 = vmatprep.subr.bf16.mxu1 %v1293_v43  ;;  %v1325_v0 = vunpack.c.h.s8.bf16 %v949_v27  ;;  %v955_v43 = vld [vmem:[#allocation3 + $0x5e8] sm:$0xff]  ;;  %v6485_v27 = vunpack.c.l.s8.bf16 %v4236_v13 }
 0x23b   :  { %1689 = vmatpush1.bf16.msra.mxu0 %v1290_v18  ;;  %1812 = vmatpush1.bf16.msra.mxu1 %v1292_v57  ;;  %v1324_v18 = vunpack.c.h.s8.bf16 %v948_v49  ;;  %v1331_v57 = vunpack.c.l.s8.bf16 %v955_v43  ;;  %v6491_v49 = vunpack.c.h.s8.bf16 %v4231_v8 }
 0x23c   :  { %1690 = vmatprep.subr.bf16.mxu0 %v1299_v36  ;;  %1813 = vmatprep.subr.bf16.mxu1 %v1301_v56  ;;  %v1333_v36 = vunpack.c.l.s8.bf16 %v957_v19  ;;  %v954_v56 = vld [vmem:[#allocation3 + $0x5e0] sm:$0xff] }
 0x23d   :  { %v1330_v5 = vunpack.c.l.s8.bf16 %v954_v56 }
 0x23f   :  { %1691 = vmatpush1.bf16.msra.mxu0 %v1298_v21  ;;  %1814 = vmatpush1.bf16.msra.mxu1 %v1300_v48  ;;  %v1332_v21 = vunpack.c.l.s8.bf16 %v956_v12  ;;  %v1339_v48 = vunpack.c.h.s8.bf16 %v955_v43  ;;  %v6501_v43 = vunpack.c.l.s8.bf16 %v4295_v53  ;;  %v6516_v12 = vunpack.c.h.s8.bf16 %v4333_v51 }
 0x240   :  { %1692 = vmatprep.subr.bf16.mxu0 %v1307_v32  ;;  %1815 = vmatprep.subr.bf16.mxu1 %v1309_v4  ;;  %v1341_v32 = vunpack.c.h.s8.bf16 %v957_v19  ;;  %v1338_v4 = vunpack.c.h.s8.bf16 %v954_v56  ;;  %v6502_v19 = vunpack.c.l.s8.bf16 %v4303_v59  ;;  %v6511_v56 = vunpack.c.l.s8.bf16 %v4325_v63 }
 0x243   :  { %1693 = vmatpush1.bf16.msra.mxu0 %v1306_v24  ;;  %1816 = vmatpush1.bf16.msra.mxu1 %v1308_v54  ;;  %v6486_v24 = vunpack.c.l.s8.bf16 %v4240_v15  ;;  %v6487_v54 = vunpack.c.l.s8.bf16 %v4231_v8  ;;  %v6496_v15 = vunpack.c.l.s8.bf16 %v4271_v37  ;;  %v6498_v8 = vunpack.c.h.s8.bf16 %v4273_v38 }
 0x244   :  { %1694 = vmatprep.subr.bf16.mxu0 %v1315_v41  ;;  %1817 = vmatprep.subr.bf16.mxu1 %v1317_v22  ;;  %v6488_v41 = vunpack.c.l.s8.bf16 %v4238_v14  ;;  %v6489_v22 = vunpack.c.h.s8.bf16 %v4236_v13  ;;  %v6495_v13 = vunpack.c.l.s8.bf16 %v4259_v28 }
 0x247   :  { %1695 = vmatpush1.bf16.msra.mxu0 %v1314_v7  ;;  %1818 = vmatpush1.bf16.msra.mxu1 %v1316_v50  ;;  %v6493_v7 = vunpack.c.l.s8.bf16 %v4261_v29  ;;  %v6494_v50 = vunpack.c.l.s8.bf16 %v4273_v38  ;;  %v6505_v38 = vunpack.c.h.s8.bf16 %v4295_v53  ;;  %v6512_v53 = vunpack.c.l.s8.bf16 %v4333_v51 }
 0x248   :  { %1696 = vmatprep.subr.bf16.mxu0 %v1323_v26  ;;  %1819 = vmatprep.subr.bf16.mxu1 %v1325_v0  ;;  %v6497_v26 = vunpack.c.h.s8.bf16 %v4261_v29  ;;  %v6500_v0 = vunpack.c.h.s8.bf16 %v4271_v37  ;;  %v6504_v29 = vunpack.c.l.s8.bf16 %v4301_v58  ;;  %v6507_v37 = vunpack.c.h.s8.bf16 %v4293_v52 }
 0x249   :  { %v6523_v51 = vunpack.c.h.s8.bf16 %v4357_v9 }
 0x24b   :  { %1697 = vmatpush1.bf16.msra.mxu0 %v1322_v16  ;;  %1820 = vmatpush1.bf16.msra.mxu1 %v1324_v18  ;;  %v6503_v16 = vunpack.c.l.s8.bf16 %v4293_v52  ;;  %v6508_v18 = vunpack.c.h.s8.bf16 %v4301_v58  ;;  %v6514_v52 = vunpack.c.h.s8.bf16 %v4335_v11  ;;  %v6515_v58 = vunpack.c.h.s8.bf16 %v4325_v63 }
 0x24c   :  { %1698 = vmatprep.subr.bf16.mxu0 %v1331_v57  ;;  %1821 = vmatprep.subr.bf16.mxu1 %v1333_v36  ;;  %v6509_v57 = vunpack.c.l.s8.bf16 %v4327_v61  ;;  %v6510_v36 = vunpack.c.l.s8.bf16 %v4335_v11  ;;  %v6521_v11 = vunpack.c.h.s8.bf16 %v4359_v6  ;;  %v6522_v63 = vunpack.c.h.s8.bf16 %v4367_v34 }
 0x24f   :  { %1699 = vmatpush1.bf16.msra.mxu0 %v1330_v5  ;;  %1822 = vmatpush1.bf16.msra.mxu1 %v1332_v21  ;;  %v6517_v5 = vunpack.c.l.s8.bf16 %v4359_v6  ;;  %v6518_v21 = vunpack.c.l.s8.bf16 %v4367_v34  ;;  %v6528_v6 = vunpack.c.l.s8.bf16 %v4397_v46  ;;  %v6529_v34 = vunpack.c.h.s8.bf16 %v4391_v40 }
 0x250   :  { %1700 = vmatprep.subr.bf16.mxu0 %v1339_v48  ;;  %1823 = vmatprep.subr.bf16.mxu1 %v1341_v32  ;;  %v6519_v48 = vunpack.c.l.s8.bf16 %v4357_v9  ;;  %v6524_v32 = vunpack.c.h.s8.bf16 %v4365_v10  ;;  %v6530_v9 = vunpack.c.h.s8.bf16 %v4399_v62 }
 0x253   :  { %1701 = vmatpush1.bf16.msra.mxu0 %v1338_v4  ;;  %1824 = vmatpush1.bf16.msra.mxu1 %v1340_v44  ;;  %v6525_v4 = vunpack.c.l.s8.bf16 %v4391_v40  ;;  %v6526_v44 = vunpack.c.l.s8.bf16 %v4399_v62  ;;  %v6536_v40 = vunpack.c.l.s8.bf16 %v4429_v23  ;;  %v6537_v62 = vunpack.c.h.s8.bf16 %v4423_v33 }
 0x254   :  { %1834 = vmatprep.subr.bf16.mxu0 %v6485_v27  ;;  %1957 = vmatprep.subr.bf16.mxu1 %v6486_v24  ;;  %v6527_v27 = vunpack.c.l.s8.bf16 %v4389_v45  ;;  %v6532_v24 = vunpack.c.h.s8.bf16 %v4397_v46  ;;  %v6539_v46 = vunpack.c.h.s8.bf16 %v4421_v3 }
 0x256   :  { %1703 = vmatmul.mubr.bf16.vlgmr.msra.gmra.mrb[4].mxu0 %v5058_v47  ;;  %1826 = vmatmul.mubr.bf16.vlgmr.msra.gmra.mrb[4].mxu1 %v5058_v47  ;;  %v6492_v47 = vunpack.c.h.s8.bf16 %v4238_v14  ;;  %v6499_v14 = vunpack.c.h.s8.bf16 %v4259_v28  ;;  %v6506_v28 = vunpack.c.h.s8.bf16 %v4303_v59  ;;  %v6513_v59 = vunpack.c.h.s8.bf16 %v4327_v61 }
 0x257   :  { %1835 = vmatpush1.bf16.msra.mxu0 %v6487_v54  ;;  %1958 = vmatpush1.bf16.msra.mxu1 %v6488_v41  ;;  %v6520_v61 = vunpack.c.l.s8.bf16 %v4365_v10  ;;  %v6531_v10 = vunpack.c.h.s8.bf16 %v4389_v45  ;;  %v6533_v54 = vunpack.c.l.s8.bf16 %v4423_v33  ;;  %v6534_v41 = vunpack.c.l.s8.bf16 %v4431_v55 }
 0x258   :  { %1836 = vmatprep.subr.bf16.mxu0 %v6489_v22  ;;  %1959 = vmatprep.subr.bf16.mxu1 %v6490_v39  ;;  %v6535_v22 = vunpack.c.l.s8.bf16 %v4421_v3  ;;  %v6538_v45 = vunpack.c.h.s8.bf16 %v4431_v55  ;;  %v6540_v39 = vunpack.c.h.s8.bf16 %v4429_v23  ;;  %v6544_v33 = vunpack.c.l.s8.bf16 %v4461_v60 }
 0x259   :  { %1866 = vmatprep.mubr.bf16.mxu0 %v4267_v35  ;;  %1989 = vmatprep.mubr.bf16.mxu1 %v4267_v35  ;;  %v6545_v55 = vunpack.c.h.s8.bf16 %v4455_v2  ;;  %v6546_v3 = vunpack.c.h.s8.bf16 %v4463_v20  ;;  %v6547_v23 = vunpack.c.h.s8.bf16 %v4453_v30 }
 0x25b   :  { %1837 = vmatpush1.bf16.msra.mxu0 %v6491_v49  ;;  %1960 = vmatpush1.bf16.msra.mxu1 %v6492_v47  ;;  %v6541_v49 = vunpack.c.l.s8.bf16 %v4455_v2  ;;  %v6542_v47 = vunpack.c.l.s8.bf16 %v4463_v20  ;;  %v6551_v2 = vunpack.c.l.s8.bf16 %v4485_v1  ;;  %v6552_v20 = vld [vmem:[#allocation68_spill] sm:$0xff] }
 0x25c   :  { %1838 = vmatprep.subr.bf16.mxu0 %v6493_v7  ;;  %1961 = vmatprep.subr.bf16.mxu1 %v6494_v50  ;;  %v6543_v7 = vunpack.c.l.s8.bf16 %v4453_v30  ;;  %v6548_v50 = vunpack.c.h.s8.bf16 %v4461_v60  ;;  %v6554_v30 = vunpack.c.h.s8.bf16 %v4487_v42  ;;  %v6555_v60 = vunpack.c.h.s8.bf16 %v4495_v31 }
 0x25f   :  { %1839 = vmatpush1.bf16.msra.mxu0 %v6495_v13  ;;  %1962 = vmatpush1.bf16.msra.mxu1 %v6496_v15  ;;  %v6549_v13 = vunpack.c.l.s8.bf16 %v4487_v42  ;;  %v6550_v15 = vunpack.c.l.s8.bf16 %v4495_v31  ;;  %v6563_v42 = vld [vmem:[#allocation73_spill] sm:$0xff]  ;;  %v6565_v31 = vld [vmem:[#allocation75_spill] sm:$0xff] }
 0x260   :  { %1840 = vmatprep.subr.bf16.mxu0 %v6497_v26  ;;  %1963 = vmatprep.subr.bf16.mxu1 %v6498_v8  ;;  %v6553_v26 = vunpack.c.l.s8.bf16 %v6552_v20  ;;  %v6556_v8 = vld [vmem:[#allocation43_spill] sm:$0xff] }
 0x263   :  { %1841 = vmatpush1.bf16.msra.mxu0 %v6499_v14  ;;  %1964 = vmatpush1.bf16.msra.mxu1 %v6500_v0  ;;  %v6557_v14 = vunpack.c.h.s8.bf16 %v4485_v1  ;;  %v6558_v0 = vunpack.c.h.s8.bf16 %v6552_v20  ;;  %v6613_v20 = vld [vmem:[#allocation107_spill] sm:$0xff] }
 0x264   :  { %1842 = vmatprep.subr.bf16.mxu0 %v6501_v43  ;;  %1965 = vmatprep.subr.bf16.mxu1 %v6502_v19  ;;  %v6559_v43 = vld [vmem:[#allocation74_spill] sm:$0xff] }
 0x265   :  { %v6560_v19 = vunpack.c.l.s8.bf16 %v6559_v43 }
 0x267   :  { %1843 = vmatpush1.bf16.msra.mxu0 %v6503_v16  ;;  %1966 = vmatpush1.bf16.msra.mxu1 %v6504_v29  ;;  %v6561_v16 = vld [vmem:[#allocation76_spill] sm:$0xff] }
 0x268   :  { %1844 = vmatprep.subr.bf16.mxu0 %v6505_v38  ;;  %1967 = vmatprep.subr.bf16.mxu1 %v6506_v28  ;;  %v6562_v29 = vunpack.c.l.s8.bf16 %v6561_v16  ;;  %v6564_v38 = vunpack.c.l.s8.bf16 %v6563_v42  ;;  %v6566_v28 = vunpack.c.l.s8.bf16 %v6565_v31  ;;  %v6568_v1 = vunpack.c.h.s8.bf16 %v6561_v16  ;;  %v6621_v16 = vld [vmem:[#allocation116_spill] sm:$0xff] }
 0x26b   :  { %1845 = vmatpush1.bf16.msra.mxu0 %v6507_v37  ;;  %1968 = vmatpush1.bf16.msra.mxu1 %v6508_v18  ;;  %v6567_v37 = vunpack.c.h.s8.bf16 %v6559_v43  ;;  %v6569_v18 = vunpack.c.h.s8.bf16 %v6563_v42  ;;  %v6619_v43 = vld [vmem:[#allocation114_spill] sm:$0xff]  ;;  %v6623_v42 = vld [vmem:[#allocation113_spill] sm:$0xff] }
 0x26c   :  { %1846 = vmatprep.subr.bf16.mxu0 %v6509_v57  ;;  %1969 = vmatprep.subr.bf16.mxu1 %v6510_v36  ;;  %v6570_v57 = vunpack.c.h.s8.bf16 %v6565_v31  ;;  %v6571_v36 = vld [vmem:[#allocation82_spill] sm:$0xff]  ;;  %v6625_v31 = vld [vmem:[#allocation115_spill] sm:$0xff] }
 0x26f   :  { %1847 = vmatpush1.bf16.msra.mxu0 %v6511_v56  ;;  %1970 = vmatpush1.bf16.msra.mxu1 %v6512_v53  ;;  %v6572_v56 = vunpack.c.l.s8.bf16 %v6571_v36  ;;  %v6573_v53 = vld [vmem:[#allocation84_spill] sm:$0xff] }
 0x270   :  { %1848 = vmatprep.subr.bf16.mxu0 %v6513_v59  ;;  %1971 = vmatprep.subr.bf16.mxu1 %v6514_v52  ;;  %v6574_v59 = vunpack.c.l.s8.bf16 %v6573_v53  ;;  %v6575_v52 = vld [vmem:[#allocation81_spill] sm:$0xff] }
 0x273   :  { %1849 = vmatpush1.bf16.msra.mxu0 %v6515_v58  ;;  %1972 = vmatpush1.bf16.msra.mxu1 %v6516_v12  ;;  %v6576_v58 = vunpack.c.l.s8.bf16 %v6575_v52  ;;  %v6577_v12 = vld [vmem:[#allocation83_spill] sm:$0xff] }
 0x274   :  { %1850 = vmatprep.subr.bf16.mxu0 %v6517_v5  ;;  %1973 = vmatprep.subr.bf16.mxu1 %v6518_v21  ;;  %v6578_v5 = vunpack.c.l.s8.bf16 %v6577_v12  ;;  %v6579_v21 = vunpack.c.h.s8.bf16 %v6571_v36  ;;  %v6631_v36 = vld [vmem:[#allocation122_spill] sm:$0xff] }
 0x277   :  { %1851 = vmatpush1.bf16.msra.mxu0 %v6519_v48  ;;  %1974 = vmatpush1.bf16.msra.mxu1 %v6520_v61  ;;  %v6580_v48 = vunpack.c.h.s8.bf16 %v6573_v53  ;;  %v6581_v61 = vunpack.c.h.s8.bf16 %v6575_v52  ;;  %v6633_v53 = vld [vmem:[#allocation124_spill] sm:$0xff]  ;;  %v6635_v52 = vld [vmem:[#allocation121_spill] sm:$0xff] }
 0x278   :  { %1852 = vmatprep.subr.bf16.mxu0 %v6521_v11  ;;  %1975 = vmatprep.subr.bf16.mxu1 %v6522_v63  ;;  %v6582_v11 = vunpack.c.h.s8.bf16 %v6577_v12  ;;  %v6583_v63 = vld [vmem:[#allocation90_spill] sm:$0xff]  ;;  %v6637_v12 = vld [vmem:[#allocation123_spill] sm:$0xff] }
 0x27b   :  { %1853 = vmatpush1.bf16.msra.mxu0 %v6523_v51  ;;  %1976 = vmatpush1.bf16.msra.mxu1 %v6524_v32  ;;  %v6584_v51 = vunpack.c.l.s8.bf16 %v6583_v63  ;;  %v6585_v32 = vld [vmem:[#allocation92_spill] sm:$0xff] }
 0x27c   :  { %1854 = vmatprep.subr.bf16.mxu0 %v6525_v4  ;;  %1977 = vmatprep.subr.bf16.mxu1 %v6526_v44  ;;  %v6586_v4 = vunpack.c.l.s8.bf16 %v6585_v32  ;;  %v6587_v44 = vld [vmem:[#allocation89_spill] sm:$0xff] }
 0x27f   :  { %1855 = vmatpush1.bf16.msra.mxu0 %v6527_v27  ;;  %1978 = vmatpush1.bf16.msra.mxu1 %v6528_v6  ;;  %v6588_v27 = vunpack.c.l.s8.bf16 %v6587_v44  ;;  %v6589_v6 = vld [vmem:[#allocation91_spill] sm:$0xff] }
 0x280   :  { %1856 = vmatprep.subr.bf16.mxu0 %v6529_v34  ;;  %1979 = vmatprep.subr.bf16.mxu1 %v6530_v9  ;;  %v6590_v34 = vunpack.c.l.s8.bf16 %v6589_v6  ;;  %v6591_v9 = vunpack.c.h.s8.bf16 %v6583_v63  ;;  %v6643_v63 = vld [vmem:[#allocation130_spill] sm:$0xff] }
 0x283   :  { %1857 = vmatpush1.bf16.msra.mxu0 %v6531_v10  ;;  %1980 = vmatpush1.bf16.msra.mxu1 %v6532_v24  ;;  %v6592_v10 = vunpack.c.h.s8.bf16 %v6585_v32  ;;  %v6593_v24 = vunpack.c.h.s8.bf16 %v6587_v44  ;;  %v6645_v32 = vld [vmem:[#allocation132_spill] sm:$0xff]  ;;  %v6647_v44 = vld [vmem:[#allocation38_spill] sm:$0xff] }
 0x284   :  { %1858 = vmatprep.subr.bf16.mxu0 %v6533_v54  ;;  %1981 = vmatprep.subr.bf16.mxu1 %v6534_v41  ;;  %v6594_v54 = vunpack.c.h.s8.bf16 %v6589_v6  ;;  %v6595_v41 = vld [vmem:[#allocation98_spill] sm:$0xff] }
 0x287   :  { %1859 = vmatpush1.bf16.msra.mxu0 %v6535_v22  ;;  %1982 = vmatpush1.bf16.msra.mxu1 %v6536_v40  ;;  %v6596_v22 = vunpack.c.l.s8.bf16 %v6595_v41  ;;  %v6597_v40 = vld [vmem:[#allocation100_spill] sm:$0xff] }
 0x288   :  { %1860 = vmatprep.subr.bf16.mxu0 %v6537_v62  ;;  %1983 = vmatprep.subr.bf16.mxu1 %v6538_v45  ;;  %v6598_v62 = vunpack.c.l.s8.bf16 %v6597_v40  ;;  %v6599_v45 = vld [vmem:[#allocation97_spill] sm:$0xff] }
 0x28b   :  { %1861 = vmatpush1.bf16.msra.mxu0 %v6539_v46  ;;  %1984 = vmatpush1.bf16.msra.mxu1 %v6540_v39  ;;  %v6600_v46 = vunpack.c.l.s8.bf16 %v6599_v45  ;;  %v6601_v39 = vld [vmem:[#allocation99_spill] sm:$0xff] }
 0x28c   :  { %1862 = vmatprep.subr.bf16.mxu0 %v6541_v49  ;;  %1985 = vmatprep.subr.bf16.mxu1 %v6542_v47  ;;  %v6602_v49 = vunpack.c.l.s8.bf16 %v6601_v39  ;;  %v6603_v47 = vunpack.c.h.s8.bf16 %v6595_v41 }
 0x28f   :  { %1863 = vmatpush1.bf16.msra.mxu0 %v6543_v7  ;;  %1986 = vmatpush1.bf16.msra.mxu1 %v6544_v33  ;;  %v6604_v7 = vunpack.c.h.s8.bf16 %v6597_v40  ;;  %v6605_v33 = vunpack.c.h.s8.bf16 %v6599_v45  ;;  %v6657_v40 = vld [vmem:[#allocation138_spill] sm:$0xff]  ;;  %v6659_v45 = vld [vmem:[#allocation140_spill] sm:$0xff] }
 0x290   :  { %1864 = vmatprep.subr.bf16.mxu0 %v6545_v55  ;;  %1987 = vmatprep.subr.bf16.mxu1 %v6546_v3  ;;  %v6606_v55 = vunpack.c.h.s8.bf16 %v6601_v39  ;;  %v6607_v3 = vld [vmem:[#allocation106_spill] sm:$0xff]  ;;  %v6661_v39 = vld [vmem:[#allocation137_spill] sm:$0xff] }
 0x293   :  { %1865 = vmatpush1.bf16.msra.mxu0 %v6547_v23  ;;  %1988 = vmatpush1.bf16.msra.mxu1 %v6548_v50  ;;  %v6608_v23 = vunpack.c.l.s8.bf16 %v6607_v3  ;;  %v6609_v50 = vld [vmem:[#allocation108_spill] sm:$0xff] }
 0x294   :  { %1875 = vmatprep.subr.bf16.mxu0 %v6549_v13  ;;  %1998 = vmatprep.subr.bf16.mxu1 %v6550_v15  ;;  %v6610_v13 = vunpack.c.l.s8.bf16 %v6609_v50  ;;  %v6611_v15 = vld [vmem:[#allocation105_spill] sm:$0xff] }
 0x296   :  { %1867 = vmatmul.mubr.bf16.vlgmr.msra.gmra.mrb[0].mxu0 %v4253_v25  ;;  %1990 = vmatmul.mubr.bf16.vlgmr.msra.gmra.mrb[0].mxu1 %v4253_v25 }
 0x297   :  { %1876 = vmatpush1.bf16.msra.mxu0 %v6551_v2  ;;  %1999 = vmatpush1.bf16.msra.mxu1 %v6553_v26  ;;  %v6612_v2 = vunpack.c.l.s8.bf16 %v6611_v15  ;;  %v6614_v26 = vunpack.c.l.s8.bf16 %v6613_v20 }
 0x298   :  { %1877 = vmatprep.subr.bf16.mxu0 %v6554_v30  ;;  %2000 = vmatprep.subr.bf16.mxu1 %v6555_v60  ;;  %v6615_v30 = vunpack.c.h.s8.bf16 %v6607_v3  ;;  %v6616_v60 = vunpack.c.h.s8.bf16 %v6609_v50  ;;  %v6667_v3 = vunpack.c.h.s8.bf16 %v6661_v39  ;;  %v6669_v50 = vld [vmem:[#allocation146_spill] sm:$0xff] }
 0x299   :  { %1907 = vmatprep.mubr.bf16.mxu0 %v6556_v8  ;;  %2030 = vmatprep.mubr.bf16.mxu1 %v6556_v8 }
 0x29b   :  { %1878 = vmatpush1.bf16.msra.mxu0 %v6557_v14  ;;  %2001 = vmatpush1.bf16.msra.mxu1 %v6558_v0  ;;  %v6617_v14 = vunpack.c.h.s8.bf16 %v6611_v15  ;;  %v6618_v0 = vunpack.c.h.s8.bf16 %v6613_v20  ;;  %v6671_v15 = vld [vmem:[#allocation148_spill] sm:$0xff]  ;;  %v6673_v20 = vld [vmem:[#allocation145_spill] sm:$0xff] }
 0x29c   :  { %1879 = vmatprep.subr.bf16.mxu0 %v6560_v19  ;;  %2002 = vmatprep.subr.bf16.mxu1 %v6562_v29  ;;  %v6620_v19 = vunpack.c.l.s8.bf16 %v6619_v43  ;;  %v6622_v29 = vunpack.c.l.s8.bf16 %v6621_v16 }
 0x29f   :  { %1880 = vmatpush1.bf16.msra.mxu0 %v6564_v38  ;;  %2003 = vmatpush1.bf16.msra.mxu1 %v6566_v28  ;;  %v6624_v38 = vunpack.c.l.s8.bf16 %v6623_v42  ;;  %v6626_v28 = vunpack.c.l.s8.bf16 %v6625_v31 }
 0x2a0   :  { %1881 = vmatprep.subr.bf16.mxu0 %v6567_v37  ;;  %2004 = vmatprep.subr.bf16.mxu1 %v6568_v1  ;;  %v6627_v37 = vunpack.c.h.s8.bf16 %v6619_v43  ;;  %v6628_v1 = vunpack.c.h.s8.bf16 %v6621_v16  ;;  %v6679_v43 = vunpack.c.h.s8.bf16 %v6673_v20  ;;  %v6681_v16 = vld [vmem:[#allocation154_spill] sm:$0xff] }
 0x2a3   :  { %1882 = vmatpush1.bf16.msra.mxu0 %v6569_v18  ;;  %2005 = vmatpush1.bf16.msra.mxu1 %v6570_v57  ;;  %v6629_v18 = vunpack.c.h.s8.bf16 %v6623_v42  ;;  %v6630_v57 = vunpack.c.h.s8.bf16 %v6625_v31  ;;  %v6683_v42 = vld [vmem:[#allocation156_spill] sm:$0xff]  ;;  %v6685_v31 = vld [vmem:[#allocation153_spill] sm:$0xff] }
 0x2a4   :  { %1883 = vmatprep.subr.bf16.mxu0 %v6572_v56  ;;  %2006 = vmatprep.subr.bf16.mxu1 %v6574_v59  ;;  %v6632_v56 = vunpack.c.l.s8.bf16 %v6631_v36  ;;  %v6634_v59 = vunpack.c.l.s8.bf16 %v6633_v53 }
 0x2a7   :  { %1884 = vmatpush1.bf16.msra.mxu0 %v6576_v58  ;;  %2007 = vmatpush1.bf16.msra.mxu1 %v6578_v5  ;;  %v6636_v58 = vunpack.c.l.s8.bf16 %v6635_v52  ;;  %v6638_v5 = vunpack.c.l.s8.bf16 %v6637_v12 }
 0x2a8   :  { %1885 = vmatprep.subr.bf16.mxu0 %v6579_v21  ;;  %2008 = vmatprep.subr.bf16.mxu1 %v6580_v48  ;;  %v6639_v21 = vunpack.c.h.s8.bf16 %v6631_v36  ;;  %v6640_v48 = vunpack.c.h.s8.bf16 %v6633_v53  ;;  %v6691_v36 = vunpack.c.h.s8.bf16 %v6685_v31  ;;  %v6693_v53 = vld [vmem:[#allocation162_spill] sm:$0xff] }
 0x2ab   :  { %1886 = vmatpush1.bf16.msra.mxu0 %v6581_v61  ;;  %2009 = vmatpush1.bf16.msra.mxu1 %v6582_v11  ;;  %v6641_v61 = vunpack.c.h.s8.bf16 %v6635_v52  ;;  %v6642_v11 = vunpack.c.h.s8.bf16 %v6637_v12  ;;  %v6695_v52 = vld [vmem:[#allocation164_spill] sm:$0xff]  ;;  %v6697_v12 = vld [vmem:[#allocation161_spill] sm:$0xff] }
 0x2ac   :  { %1887 = vmatprep.subr.bf16.mxu0 %v6584_v51  ;;  %2010 = vmatprep.subr.bf16.mxu1 %v6586_v4  ;;  %v6644_v51 = vunpack.c.l.s8.bf16 %v6643_v63  ;;  %v6646_v4 = vunpack.c.l.s8.bf16 %v6645_v32 }
 0x2af   :  { %1888 = vmatpush1.bf16.msra.mxu0 %v6588_v27  ;;  %2011 = vmatpush1.bf16.msra.mxu1 %v6590_v34  ;;  %v6648_v27 = vld [vmem:[#allocation129_spill] sm:$0xff]  ;;  %v6650_v34 = vld [vmem:[#allocation131_spill] sm:$0xff] }
 0x2b0   :  { %1889 = vmatprep.subr.bf16.mxu0 %v6591_v9  ;;  %2012 = vmatprep.subr.bf16.mxu1 %v6592_v10  ;;  %v6649_v6 = vunpack.c.l.s8.bf16 %v6648_v27  ;;  %v6651_v9 = vunpack.c.l.s8.bf16 %v6650_v34  ;;  %v6652_v10 = vunpack.c.h.s8.bf16 %v6643_v63  ;;  %v6655_v41 = vunpack.c.h.s8.bf16 %v6648_v27  ;;  %v6707_v27 = vld [vmem:[#allocation172_spill] sm:$0xff] }
 0x2b1   :  { %v6703_v63 = vunpack.c.h.s8.bf16 %v6697_v12 }
 0x2b3   :  { %1890 = vmatpush1.bf16.msra.mxu0 %v6593_v24  ;;  %2013 = vmatpush1.bf16.msra.mxu1 %v6594_v54  ;;  %v6653_v24 = vunpack.c.h.s8.bf16 %v6645_v32  ;;  %v6654_v54 = vld [vmem:[#allocation36_spill] sm:$0xff]  ;;  %v6705_v32 = vld [vmem:[#allocation170_spill] sm:$0xff] }
 0x2b4   :  { %1891 = vmatprep.subr.bf16.mxu0 %v6596_v22  ;;  %2014 = vmatprep.subr.bf16.mxu1 %v6598_v62  ;;  %v6656_v22 = vunpack.c.h.s8.bf16 %v6650_v34  ;;  %v6658_v62 = vunpack.c.l.s8.bf16 %v6657_v40  ;;  %v6709_v34 = vld [vmem:[#allocation169_spill] sm:$0xff] }
 0x2b7   :  { %1892 = vmatpush1.bf16.msra.mxu0 %v6600_v46  ;;  %2015 = vmatpush1.bf16.msra.mxu1 %v6602_v49  ;;  %v6660_v46 = vunpack.c.l.s8.bf16 %v6659_v45  ;;  %v6662_v49 = vunpack.c.l.s8.bf16 %v6661_v39 }
 0x2b8   :  { %1893 = vmatprep.subr.bf16.mxu0 %v6603_v47  ;;  %2016 = vmatprep.subr.bf16.mxu1 %v6604_v7  ;;  %v6663_v47 = vld [vmem:[#allocation139_spill] sm:$0xff] }
 0x2b9   :  { %v6664_v7 = vunpack.c.l.s8.bf16 %v6663_v47 }
 0x2bb   :  { %1894 = vmatpush1.bf16.msra.mxu0 %v6605_v33  ;;  %2017 = vmatpush1.bf16.msra.mxu1 %v6606_v55  ;;  %v6665_v33 = vunpack.c.h.s8.bf16 %v6657_v40  ;;  %v6666_v55 = vunpack.c.h.s8.bf16 %v6659_v45  ;;  %v6715_v40 = vunpack.c.h.s8.bf16 %v6709_v34  ;;  %v6717_v45 = vunpack.c.l.s8.bf16 %v4935_v17 }
 0x2bc   :  { %1895 = vmatprep.subr.bf16.mxu0 %v6608_v23  ;;  %2018 = vmatprep.subr.bf16.mxu1 %v6610_v13  ;;  %v6668_v23 = vunpack.c.h.s8.bf16 %v6663_v47  ;;  %v6670_v13 = vunpack.c.l.s8.bf16 %v6669_v50 }
 0x2bf   :  { %1896 = vmatpush1.bf16.msra.mxu0 %v6612_v2  ;;  %2019 = vmatpush1.bf16.msra.mxu1 %v6614_v26  ;;  %v6672_v2 = vunpack.c.l.s8.bf16 %v6671_v15  ;;  %v6674_v26 = vunpack.c.l.s8.bf16 %v6673_v20 }
 0x2c0   :  { %1897 = vmatprep.subr.bf16.mxu0 %v6615_v30  ;;  %2020 = vmatprep.subr.bf16.mxu1 %v6616_v60  ;;  %v6675_v30 = vld [vmem:[#allocation147_spill] sm:$0xff] }
 0x2c1   :  { %v6676_v60 = vunpack.c.l.s8.bf16 %v6675_v30 }
 0x2c3   :  { %1898 = vmatpush1.bf16.msra.mxu0 %v6617_v14  ;;  %2021 = vmatpush1.bf16.msra.mxu1 %v6618_v0  ;;  %v6677_v14 = vunpack.c.h.s8.bf16 %v6669_v50  ;;  %v6678_v0 = vunpack.c.h.s8.bf16 %v6671_v15 }
 0x2c4   :  { %1899 = vmatprep.subr.bf16.mxu0 %v6620_v19  ;;  %2022 = vmatprep.subr.bf16.mxu1 %v6622_v29  ;;  %v6680_v19 = vunpack.c.h.s8.bf16 %v6675_v30  ;;  %v6682_v29 = vunpack.c.l.s8.bf16 %v6681_v16 }
 0x2c7   :  { %1900 = vmatpush1.bf16.msra.mxu0 %v6624_v38  ;;  %2023 = vmatpush1.bf16.msra.mxu1 %v6626_v28  ;;  %v6684_v38 = vunpack.c.l.s8.bf16 %v6683_v42  ;;  %v6686_v28 = vunpack.c.l.s8.bf16 %v6685_v31  ;;  %v6744_v31 = vld [vmem:[#allocation32_spill] sm:$0xff] }
 0x2c8   :  { %1901 = vmatprep.subr.bf16.mxu0 %v6627_v37  ;;  %2024 = vmatprep.subr.bf16.mxu1 %v6628_v1  ;;  %v6687_v37 = vld [vmem:[#allocation155_spill] sm:$0xff] }
 0x2c9   :  { %v6688_v1 = vunpack.c.l.s8.bf16 %v6687_v37 }
 0x2cb   :  { %1902 = vmatpush1.bf16.msra.mxu0 %v6629_v18  ;;  %2025 = vmatpush1.bf16.msra.mxu1 %v6630_v57  ;;  %v6689_v18 = vunpack.c.h.s8.bf16 %v6681_v16  ;;  %v6690_v57 = vunpack.c.h.s8.bf16 %v6683_v42  ;;  %v6740_v16 = vld [vmem:[#allocation34_spill] sm:$0xff]  ;;  %v6742_v42 = vld [vmem:[#allocation37_spill] sm:$0xff] }
 0x2cc   :  { %1903 = vmatprep.subr.bf16.mxu0 %v6632_v56  ;;  %2026 = vmatprep.subr.bf16.mxu1 %v6634_v59  ;;  %v6692_v56 = vunpack.c.h.s8.bf16 %v6687_v37  ;;  %v6694_v59 = vunpack.c.l.s8.bf16 %v6693_v53 }
 0x2cf   :  { %1904 = vmatpush1.bf16.msra.mxu0 %v6636_v58  ;;  %2027 = vmatpush1.bf16.msra.mxu1 %v6638_v5  ;;  %v6696_v58 = vunpack.c.l.s8.bf16 %v6695_v52  ;;  %v6698_v5 = vunpack.c.l.s8.bf16 %v6697_v12 }
 0x2d0   :  { %1905 = vmatprep.subr.bf16.mxu0 %v6639_v21  ;;  %2028 = vmatprep.subr.bf16.mxu1 %v6640_v48  ;;  %v6699_v21 = vld [vmem:[#allocation163_spill] sm:$0xff] }
 0x2d1   :  { %v6700_v48 = vunpack.c.l.s8.bf16 %v6699_v21 }
 0x2d3   :  { %1906 = vmatpush1.bf16.msra.mxu0 %v6641_v61  ;;  %2029 = vmatpush1.bf16.msra.mxu1 %v6642_v11  ;;  %v6701_v61 = vunpack.c.h.s8.bf16 %v6693_v53  ;;  %v6702_v11 = vunpack.c.h.s8.bf16 %v6695_v52 }
 0x2d4   :  { %1916 = vmatprep.subr.bf16.mxu0 %v6644_v51  ;;  %2039 = vmatprep.subr.bf16.mxu1 %v6646_v4  ;;  %v6704_v51 = vunpack.c.h.s8.bf16 %v6699_v21  ;;  %v6706_v4 = vunpack.c.l.s8.bf16 %v6705_v32 }
 0x2d6   :  { %1908 = vmatmul.mubr.bf16.vlgmr.msra.gmra.mrb[0].mxu0 %v6647_v44  ;;  %2031 = vmatmul.mubr.bf16.vlgmr.msra.gmra.mrb[0].mxu1 %v6647_v44 }
 0x2d7   :  { %1917 = vmatpush1.bf16.msra.mxu0 %v6649_v6  ;;  %2040 = vmatpush1.bf16.msra.mxu1 %v6651_v9  ;;  %v6708_v6 = vunpack.c.l.s8.bf16 %v6707_v27  ;;  %v6710_v9 = vunpack.c.l.s8.bf16 %v6709_v34  ;;  %v6769_v34 = vld [vmem:[#allocation44_spill] sm:$0xff] }
 0x2d8   :  { %1918 = vmatprep.subr.bf16.mxu0 %v6652_v10  ;;  %2041 = vmatprep.subr.bf16.mxu1 %v6653_v24  ;;  %v6711_v10 = vld [vmem:[#allocation171_spill] sm:$0xff] }
 0x2d9   :  { %1948 = vmatprep.mubr.bf16.mxu0 %v6654_v54  ;;  %2071 = vmatprep.mubr.bf16.mxu1 %v6654_v54  ;;  %v6712_v24 = vunpack.c.l.s8.bf16 %v6711_v10 }
 0x2db   :  { %1919 = vmatpush1.bf16.msra.mxu0 %v6655_v41  ;;  %2042 = vmatpush1.bf16.msra.mxu1 %v6656_v22  ;;  %v6713_v41 = vunpack.c.h.s8.bf16 %v6705_v32  ;;  %v6714_v22 = vunpack.c.h.s8.bf16 %v6707_v27  ;;  %v6765_v32 = vld [vmem:[#allocation45_spill] sm:$0xff]  ;;  %v6767_v27 = vld [vmem:[#allocation47_spill] sm:$0xff] }
 0x2dc   :  { %1920 = vmatprep.subr.bf16.mxu0 %v6658_v62  ;;  %2043 = vmatprep.subr.bf16.mxu1 %v6660_v46  ;;  %v6716_v62 = vunpack.c.h.s8.bf16 %v6711_v10  ;;  %v6718_v46 = vld [vmem:[#allocation179_spill] sm:$0xff]  ;;  %v6771_v10 = vld [vmem:[#allocation46_spill] sm:$0xff] }
 0x2dd   :  { %v6719_v39 = vunpack.c.l.s8.bf16 %v6718_v46 }
 0x2df   :  { %1921 = vmatpush1.bf16.msra.mxu0 %v6662_v49  ;;  %2044 = vmatpush1.bf16.msra.mxu1 %v6664_v7  ;;  %v6720_v49 = vld [vmem:[#allocation177_spill] sm:$0xff]  ;;  %v6722_v7 = vld [vmem:[#allocation178_spill] sm:$0xff] }
 0x2e0   :  { %1922 = vmatprep.subr.bf16.mxu0 %v6665_v33  ;;  %2045 = vmatprep.subr.bf16.mxu1 %v6666_v55  ;;  %v6721_v47 = vunpack.c.l.s8.bf16 %v6720_v49  ;;  %v6723_v33 = vunpack.c.l.s8.bf16 %v6722_v7  ;;  %v6724_v55 = vunpack.c.h.s8.bf16 %v4935_v17  ;;  %v6727_v50 = vunpack.c.h.s8.bf16 %v6722_v7  ;;  %v6734_v17 = vld [vmem:[#allocation186_spill] sm:$0xff] }
 0x2e3   :  { %1923 = vmatpush1.bf16.msra.mxu0 %v6667_v3  ;;  %2046 = vmatpush1.bf16.msra.mxu1 %v6668_v23  ;;  %v6725_v3 = vunpack.c.h.s8.bf16 %v6718_v46  ;;  %v6726_v23 = vunpack.c.h.s8.bf16 %v6720_v49 }
 0x2e4   :  { %1924 = vmatprep.subr.bf16.mxu0 %v6670_v13  ;;  %2047 = vmatprep.subr.bf16.mxu1 %v6672_v2  ;;  %v6728_v13 = vld [vmem:[#allocation185_spill] sm:$0xff]  ;;  %v6730_v2 = vld [vmem:[#allocation187_spill] sm:$0xff] }
 0x2e5   :  { %v6729_v15 = vunpack.c.l.s8.bf16 %v6728_v13  ;;  %v6731_v20 = vunpack.c.l.s8.bf16 %v6730_v2 }
 0x2e7   :  { %1925 = vmatpush1.bf16.msra.mxu0 %v6674_v26  ;;  %2048 = vmatpush1.bf16.msra.mxu1 %v6676_v60  ;;  %v6732_v26 = vld [vmem:[#allocation184_spill] sm:$0xff]  ;;  %v6735_v60 = vunpack.c.l.s8.bf16 %v6734_v17 }
 0x2e8   :  { %1926 = vmatprep.subr.bf16.mxu0 %v6677_v14  ;;  %2049 = vmatprep.subr.bf16.mxu1 %v6678_v0  ;;  %v6733_v30 = vunpack.c.l.s8.bf16 %v6732_v26  ;;  %v6736_v14 = vunpack.c.h.s8.bf16 %v6728_v13  ;;  %v6737_v0 = vunpack.c.h.s8.bf16 %v6730_v2 }
 0x2eb   :  { %1927 = vmatpush1.bf16.msra.mxu0 %v6679_v43  ;;  %2050 = vmatpush1.bf16.msra.mxu1 %v6680_v19  ;;  %v6738_v43 = vunpack.c.h.s8.bf16 %v6732_v26  ;;  %v6739_v19 = vunpack.c.h.s8.bf16 %v6734_v17 }
 0x2ec   :  { %1928 = vmatprep.subr.bf16.mxu0 %v6682_v29  ;;  %2051 = vmatprep.subr.bf16.mxu1 %v6684_v38  ;;  %v6741_v29 = vunpack.c.l.s8.bf16 %v6740_v16  ;;  %v6743_v38 = vunpack.c.l.s8.bf16 %v6742_v42 }
 0x2ef   :  { %1929 = vmatpush1.bf16.msra.mxu0 %v6686_v28  ;;  %2052 = vmatpush1.bf16.msra.mxu1 %v6688_v1  ;;  %v6745_v28 = vld [vmem:[#allocation33_spill] sm:$0xff]  ;;  %v6747_v1 = vld [vmem:[#allocation35_spill] sm:$0xff] }
 0x2f0   :  { %1930 = vmatprep.subr.bf16.mxu0 %v6689_v18  ;;  %2053 = vmatprep.subr.bf16.mxu1 %v6690_v57  ;;  %v6746_v37 = vunpack.c.l.s8.bf16 %v6745_v28  ;;  %v6748_v18 = vunpack.c.l.s8.bf16 %v6747_v1  ;;  %v6749_v57 = vunpack.c.h.s8.bf16 %v6740_v16  ;;  %v6752_v53 = vunpack.c.h.s8.bf16 %v6747_v1 }
 0x2f3   :  { %1931 = vmatpush1.bf16.msra.mxu0 %v6691_v36  ;;  %2054 = vmatpush1.bf16.msra.mxu1 %v6692_v56  ;;  %v6750_v36 = vunpack.c.h.s8.bf16 %v6742_v42  ;;  %v6751_v56 = vunpack.c.h.s8.bf16 %v6745_v28 }
 0x2f4   :  { %1932 = vmatprep.subr.bf16.mxu0 %v6694_v59  ;;  %2055 = vmatprep.subr.bf16.mxu1 %v6696_v58  ;;  %v6753_v59 = vld [vmem:[#allocation40_spill] sm:$0xff]  ;;  %v6755_v58 = vld [vmem:[#allocation42_spill] sm:$0xff] }
 0x2f5   :  { %v6754_v52 = vunpack.c.l.s8.bf16 %v6753_v59  ;;  %v6756_v12 = vunpack.c.l.s8.bf16 %v6755_v58 }
 0x2f7   :  { %1933 = vmatpush1.bf16.msra.mxu0 %v6698_v5  ;;  %2056 = vmatpush1.bf16.msra.mxu1 %v6700_v48  ;;  %v6757_v5 = vld [vmem:[#allocation39_spill] sm:$0xff]  ;;  %v6759_v48 = vld [vmem:[#allocation41_spill] sm:$0xff] }
 0x2f8   :  { %1934 = vmatprep.subr.bf16.mxu0 %v6701_v61  ;;  %2057 = vmatprep.subr.bf16.mxu1 %v6702_v11  ;;  %v6758_v21 = vunpack.c.l.s8.bf16 %v6757_v5  ;;  %v6760_v61 = vunpack.c.l.s8.bf16 %v6759_v48  ;;  %v6762_v11 = vunpack.c.h.s8.bf16 %v6755_v58 }
 0x2fb   :  { %1935 = vmatpush1.bf16.msra.mxu0 %v6703_v63  ;;  %2058 = vmatpush1.bf16.msra.mxu1 %v6704_v51  ;;  %v6763_v63 = vunpack.c.h.s8.bf16 %v6757_v5  ;;  %v6764_v51 = vunpack.c.h.s8.bf16 %v6759_v48 }
 0x2fc   :  { %1936 = vmatprep.subr.bf16.mxu0 %v6706_v4  ;;  %2059 = vmatprep.subr.bf16.mxu1 %v6708_v6  ;;  %v6766_v4 = vunpack.c.l.s8.bf16 %v6765_v32  ;;  %v6768_v6 = vunpack.c.l.s8.bf16 %v6767_v27 }
 0x2ff   :  { %1937 = vmatpush1.bf16.msra.mxu0 %v6710_v9  ;;  %2060 = vmatpush1.bf16.msra.mxu1 %v6712_v24  ;;  %v6770_v9 = vunpack.c.l.s8.bf16 %v6769_v34  ;;  %v6772_v24 = vunpack.c.l.s8.bf16 %v6771_v10 }
 0x300   :  { %1938 = vmatprep.subr.bf16.mxu0 %v6713_v41  ;;  %2061 = vmatprep.subr.bf16.mxu1 %v6714_v22  ;;  %v6773_v41 = vunpack.c.h.s8.bf16 %v6765_v32  ;;  %v6774_v22 = vunpack.c.h.s8.bf16 %v6767_v27 }
 0x303   :  { %1939 = vmatpush1.bf16.msra.mxu0 %v6715_v40  ;;  %2062 = vmatpush1.bf16.msra.mxu1 %v6716_v62  ;;  %v6775_v40 = vunpack.c.h.s8.bf16 %v6769_v34  ;;  %v6776_v62 = vunpack.c.h.s8.bf16 %v6771_v10 }
 0x304   :  { %1940 = vmatprep.subr.bf16.mxu0 %v6717_v45  ;;  %2063 = vmatprep.subr.bf16.mxu1 %v6719_v39  ;;  %v6777_v45 = vld [vmem:[#allocation49_spill] sm:$0xff]  ;;  %v6779_v39 = vld [vmem:[#allocation51_spill] sm:$0xff] }
 0x305   :  { %v6778_v46 = vunpack.c.l.s8.bf16 %v6777_v45  ;;  %v6780_v49 = vunpack.c.l.s8.bf16 %v6779_v39 }
 0x307   :  { %1941 = vmatpush1.bf16.msra.mxu0 %v6721_v47  ;;  %2064 = vmatpush1.bf16.msra.mxu1 %v6723_v33  ;;  %v6781_v47 = vld [vmem:[#allocation48_spill] sm:$0xff]  ;;  %v6783_v33 = vld [vmem:[#allocation50_spill] sm:$0xff] }
 0x308   :  { %1942 = vmatprep.subr.bf16.mxu0 %v6724_v55  ;;  %2065 = vmatprep.subr.bf16.mxu1 %v6725_v3  ;;  %v6782_v7 = vunpack.c.l.s8.bf16 %v6781_v47  ;;  %v6784_v55 = vunpack.c.l.s8.bf16 %v6783_v33  ;;  %v6785_v3 = vunpack.c.h.s8.bf16 %v6777_v45  ;;  %v6788_v13 = vunpack.c.h.s8.bf16 %v6783_v33 }
 0x30b   :  { %1943 = vmatpush1.bf16.msra.mxu0 %v6726_v23  ;;  %2066 = vmatpush1.bf16.msra.mxu1 %v6727_v50  ;;  %v6786_v23 = vunpack.c.h.s8.bf16 %v6779_v39  ;;  %v6787_v50 = vunpack.c.h.s8.bf16 %v6781_v47 }
 0x30c   :  { %1944 = vmatprep.subr.bf16.mxu0 %v6729_v15  ;;  %2067 = vmatprep.subr.bf16.mxu1 %v6731_v20  ;;  %v6789_v15 = vld [vmem:[#allocation53_spill] sm:$0xff]  ;;  %v6791_v20 = vld [vmem:[#allocation55_spill] sm:$0xff] }
 0x30d   :  { %v6790_v2 = vunpack.c.l.s8.bf16 %v6789_v15  ;;  %v6792_v26 = vunpack.c.l.s8.bf16 %v6791_v20 }
 0x30f   :  { %1945 = vmatpush1.bf16.msra.mxu0 %v6733_v30  ;;  %2068 = vmatpush1.bf16.msra.mxu1 %v6735_v60  ;;  %v6793_v30 = vld [vmem:[#allocation52_spill] sm:$0xff]  ;;  %v6795_v60 = vld [vmem:[#allocation54_spill] sm:$0xff] }
 0x310   :  { %1946 = vmatprep.subr.bf16.mxu0 %v6736_v14  ;;  %2069 = vmatprep.subr.bf16.mxu1 %v6737_v0  ;;  %v6794_v17 = vunpack.c.l.s8.bf16 %v6793_v30  ;;  %v6796_v14 = vunpack.c.l.s8.bf16 %v6795_v60  ;;  %v6797_v0 = vunpack.c.h.s8.bf16 %v6789_v15  ;;  %v6800_v16 = vunpack.c.h.s8.bf16 %v6795_v60  ;;  %v6849_v15 = vld [vmem:[#allocation78_spill] sm:$0xff]  ;;  %v6855_v60 = vld [vmem:[#allocation79_spill] sm:$0xff] }
 0x313   :  { %1947 = vmatpush1.bf16.msra.mxu0 %v6738_v43  ;;  %2070 = vmatpush1.bf16.msra.mxu1 %v6739_v19  ;;  %v6798_v43 = vunpack.c.h.s8.bf16 %v6791_v20  ;;  %v6799_v19 = vunpack.c.h.s8.bf16 %v6793_v30  ;;  %v6851_v20 = vld [vmem:[#allocation80_spill] sm:$0xff]  ;;  %v6853_v30 = vld [vmem:[#allocation77_spill] sm:$0xff] }
 0x314   :  { %2080 = vmatprep.subr.bf16.mxu0 %v6741_v29  ;;  %2203 = vmatprep.subr.bf16.mxu1 %v6743_v38  ;;  %v6801_v29 = vld [vmem:[#allocation57_spill] sm:$0xff]  ;;  %v6803_v38 = vld [vmem:[#allocation59_spill] sm:$0xff] }
 0x315   :  { %v6802_v42 = vunpack.c.l.s8.bf16 %v6801_v29  ;;  %v6804_v28 = vunpack.c.l.s8.bf16 %v6803_v38 }
 0x316   :  { %1949 = vmatmul.mubr.bf16.vlgmr.msra.gmra.mrb[0].mxu0 %v6744_v31  ;;  %2072 = vmatmul.mubr.bf16.vlgmr.msra.gmra.mrb[0].mxu1 %v6744_v31 }
 0x317   :  { %2081 = vmatpush1.bf16.msra.mxu0 %v6746_v37  ;;  %2204 = vmatpush1.bf16.msra.mxu1 %v6748_v18  ;;  %v6805_v37 = vld [vmem:[#allocation56_spill] sm:$0xff]  ;;  %v6807_v18 = vld [vmem:[#allocation58_spill] sm:$0xff] }
 0x318   :  { %2082 = vmatprep.subr.bf16.mxu0 %v6749_v57  ;;  %2205 = vmatprep.subr.bf16.mxu1 %v6750_v36  ;;  %v6806_v1 = vunpack.c.l.s8.bf16 %v6805_v37  ;;  %v6808_v57 = vunpack.c.l.s8.bf16 %v6807_v18  ;;  %v6809_v36 = vunpack.c.h.s8.bf16 %v6801_v29 }
 0x319   :  { %2112 = vmatprep.mubr.bf16.mxu0 %v4267_v35  ;;  %2235 = vmatprep.mubr.bf16.mxu1 %v4267_v35  ;;  %v6761_v35 = vunpack.c.h.s8.bf16 %v6753_v59  ;;  %v6812_v59 = vunpack.c.h.s8.bf16 %v6807_v18 }
 0x31b   :  { %2083 = vmatpush1.bf16.msra.mxu0 %v6751_v56  ;;  %2206 = vmatpush1.bf16.msra.mxu1 %v6752_v53  ;;  %v6810_v56 = vunpack.c.h.s8.bf16 %v6803_v38  ;;  %v6811_v53 = vunpack.c.h.s8.bf16 %v6805_v37 }
 0x31c   :  { %2084 = vmatprep.subr.bf16.mxu0 %v6754_v52  ;;  %2207 = vmatprep.subr.bf16.mxu1 %v6756_v12  ;;  %v6813_v52 = vld [vmem:[#allocation61_spill] sm:$0xff]  ;;  %v6815_v12 = vld [vmem:[#allocation63_spill] sm:$0xff] }
 0x31d   :  { %v6814_v58 = vunpack.c.l.s8.bf16 %v6813_v52  ;;  %v6816_v5 = vunpack.c.l.s8.bf16 %v6815_v12 }
 0x31f   :  { %2085 = vmatpush1.bf16.msra.mxu0 %v6758_v21  ;;  %2208 = vmatpush1.bf16.msra.mxu1 %v6760_v61  ;;  %v6817_v21 = vld [vmem:[#allocation60_spill] sm:$0xff]  ;;  %v6819_v61 = vld [vmem:[#allocation62_spill] sm:$0xff] }
 0x320   :  { %2086 = vmatprep.subr.bf16.mxu0 %v6761_v35  ;;  %2209 = vmatprep.subr.bf16.mxu1 %v6762_v11  ;;  %v6818_v48 = vunpack.c.l.s8.bf16 %v6817_v21  ;;  %v6820_v35 = vunpack.c.l.s8.bf16 %v6819_v61  ;;  %v6821_v11 = vunpack.c.h.s8.bf16 %v6813_v52  ;;  %v6824_v32 = vunpack.c.h.s8.bf16 %v6819_v61 }
 0x323   :  { %2087 = vmatpush1.bf16.msra.mxu0 %v6763_v63  ;;  %2210 = vmatpush1.bf16.msra.mxu1 %v6764_v51  ;;  %v6822_v63 = vunpack.c.h.s8.bf16 %v6815_v12  ;;  %v6823_v51 = vunpack.c.h.s8.bf16 %v6817_v21 }
 0x324   :  { %2088 = vmatprep.subr.bf16.mxu0 %v6766_v4  ;;  %2211 = vmatprep.subr.bf16.mxu1 %v6768_v6  ;;  %v6825_v4 = vld [vmem:[#allocation65_spill] sm:$0xff]  ;;  %v6827_v6 = vld [vmem:[#allocation67_spill] sm:$0xff] }
 0x325   :  { %v6826_v27 = vunpack.c.l.s8.bf16 %v6825_v4  ;;  %v6828_v34 = vunpack.c.l.s8.bf16 %v6827_v6 }
 0x327   :  { %2089 = vmatpush1.bf16.msra.mxu0 %v6770_v9  ;;  %2212 = vmatpush1.bf16.msra.mxu1 %v6772_v24  ;;  %v6829_v9 = vld [vmem:[#allocation64_spill] sm:$0xff]  ;;  %v6831_v24 = vld [vmem:[#allocation66_spill] sm:$0xff] }
 0x328   :  { %2090 = vmatprep.subr.bf16.mxu0 %v6773_v41  ;;  %2213 = vmatprep.subr.bf16.mxu1 %v6774_v22  ;;  %v6830_v10 = vunpack.c.l.s8.bf16 %v6829_v9  ;;  %v6832_v41 = vunpack.c.l.s8.bf16 %v6831_v24  ;;  %v6833_v22 = vunpack.c.h.s8.bf16 %v6825_v4  ;;  %v6836_v45 = vunpack.c.h.s8.bf16 %v6831_v24 }
 0x32b   :  { %2091 = vmatpush1.bf16.msra.mxu0 %v6775_v40  ;;  %2214 = vmatpush1.bf16.msra.mxu1 %v6776_v62  ;;  %v6834_v40 = vunpack.c.h.s8.bf16 %v6827_v6  ;;  %v6835_v62 = vunpack.c.h.s8.bf16 %v6829_v9 }
 0x32c   :  { %2092 = vmatprep.subr.bf16.mxu0 %v6778_v46  ;;  %2215 = vmatprep.subr.bf16.mxu1 %v6780_v49  ;;  %v6837_v46 = vld [vmem:[#allocation70_spill] sm:$0xff]  ;;  %v6839_v49 = vld [vmem:[#allocation72_spill] sm:$0xff] }
 0x32d   :  { %v6838_v39 = vunpack.c.l.s8.bf16 %v6837_v46  ;;  %v6840_v47 = vunpack.c.l.s8.bf16 %v6839_v49 }
 0x32f   :  { %2093 = vmatpush1.bf16.msra.mxu0 %v6782_v7  ;;  %2216 = vmatpush1.bf16.msra.mxu1 %v6784_v55  ;;  %v6841_v7 = vld [vmem:[#allocation69_spill] sm:$0xff]  ;;  %v6843_v55 = vld [vmem:[#allocation71_spill] sm:$0xff] }
 0x330   :  { %2094 = vmatprep.subr.bf16.mxu0 %v6785_v3  ;;  %2217 = vmatprep.subr.bf16.mxu1 %v6786_v23  ;;  %v6842_v33 = vunpack.c.l.s8.bf16 %v6841_v7  ;;  %v6844_v3 = vunpack.c.l.s8.bf16 %v6843_v55  ;;  %v6845_v23 = vunpack.c.h.s8.bf16 %v6837_v46 }
 0x333   :  { %2095 = vmatpush1.bf16.msra.mxu0 %v6787_v50  ;;  %2218 = vmatpush1.bf16.msra.mxu1 %v6788_v13  ;;  %v6846_v50 = vunpack.c.h.s8.bf16 %v6839_v49  ;;  %v6847_v13 = vunpack.c.h.s8.bf16 %v6841_v7 }
 0x334   :  { %2096 = vmatprep.subr.bf16.mxu0 %v6790_v2  ;;  %2219 = vmatprep.subr.bf16.mxu1 %v6792_v26  ;;  %v6850_v2 = vunpack.c.l.s8.bf16 %v6849_v15  ;;  %v6852_v26 = vunpack.c.l.s8.bf16 %v6851_v20 }
 0x337   :  { %2097 = vmatpush1.bf16.msra.mxu0 %v6794_v17  ;;  %2220 = vmatpush1.bf16.msra.mxu1 %v6796_v14  ;;  %v6854_v17 = vunpack.c.l.s8.bf16 %v6853_v30  ;;  %v6856_v14 = vunpack.c.l.s8.bf16 %v6855_v60 }
 0x338   :  { %2098 = vmatprep.subr.bf16.mxu0 %v6797_v0  ;;  %2221 = vmatprep.subr.bf16.mxu1 %v6798_v43  ;;  %v6858_v0 = vunpack.c.h.s8.bf16 %v6851_v20  ;;  %v6859_v43 = vunpack.c.h.s8.bf16 %v6853_v30 }
 0x33b   :  { %2099 = vmatpush1.bf16.msra.mxu0 %v6799_v19  ;;  %2222 = vmatpush1.bf16.msra.mxu1 %v6800_v16  ;;  %v6860_v19 = vunpack.c.h.s8.bf16 %v6855_v60  ;;  %v6861_v16 = vld [vmem:[#allocation86_spill] sm:$0xff] }
 0x33c   :  { %2100 = vmatprep.subr.bf16.mxu0 %v6802_v42  ;;  %2223 = vmatprep.subr.bf16.mxu1 %v6804_v28  ;;  %v6862_v29 = vunpack.c.l.s8.bf16 %v6861_v16  ;;  %v6863_v42 = vld [vmem:[#allocation88_spill] sm:$0xff]  ;;  %v6865_v28 = vld [vmem:[#allocation85_spill] sm:$0xff] }
 0x33d   :  { %v6864_v38 = vunpack.c.l.s8.bf16 %v6863_v42  ;;  %v6866_v37 = vunpack.c.l.s8.bf16 %v6865_v28 }
 0x33f   :  { %2101 = vmatpush1.bf16.msra.mxu0 %v6806_v1  ;;  %2224 = vmatpush1.bf16.msra.mxu1 %v6808_v57  ;;  %v6867_v1 = vld [vmem:[#allocation87_spill] sm:$0xff]  ;;  %v6869_v57 = vunpack.c.h.s8.bf16 %v6861_v16 }
 0x340   :  { %2102 = vmatprep.subr.bf16.mxu0 %v6809_v36  ;;  %2225 = vmatprep.subr.bf16.mxu1 %v6810_v56  ;;  %v6868_v18 = vunpack.c.l.s8.bf16 %v6867_v1  ;;  %v6870_v36 = vunpack.c.h.s8.bf16 %v6863_v42  ;;  %v6871_v56 = vunpack.c.h.s8.bf16 %v6865_v28 }
 0x343   :  { %2103 = vmatpush1.bf16.msra.mxu0 %v6811_v53  ;;  %2226 = vmatpush1.bf16.msra.mxu1 %v6812_v59  ;;  %v6872_v53 = vunpack.c.h.s8.bf16 %v6867_v1  ;;  %v6873_v59 = vld [vmem:[#allocation94_spill] sm:$0xff] }
 0x344   :  { %2104 = vmatprep.subr.bf16.mxu0 %v6814_v58  ;;  %2227 = vmatprep.subr.bf16.mxu1 %v6816_v5  ;;  %v6874_v52 = vunpack.c.l.s8.bf16 %v6873_v59  ;;  %v6875_v58 = vld [vmem:[#allocation96_spill] sm:$0xff]  ;;  %v6877_v5 = vld [vmem:[#allocation93_spill] sm:$0xff] }
 0x345   :  { %v6876_v12 = vunpack.c.l.s8.bf16 %v6875_v58  ;;  %v6878_v21 = vunpack.c.l.s8.bf16 %v6877_v5 }
 0x347   :  { %2105 = vmatpush1.bf16.msra.mxu0 %v6818_v48  ;;  %2228 = vmatpush1.bf16.msra.mxu1 %v6820_v35  ;;  %v6879_v48 = vld [vmem:[#allocation95_spill] sm:$0xff]  ;;  %v6881_v35 = vunpack.c.h.s8.bf16 %v6873_v59 }
 0x348   :  { %2106 = vmatprep.subr.bf16.mxu0 %v6821_v11  ;;  %2229 = vmatprep.subr.bf16.mxu1 %v6822_v63  ;;  %v6880_v61 = vunpack.c.l.s8.bf16 %v6879_v48  ;;  %v6882_v11 = vunpack.c.h.s8.bf16 %v6875_v58  ;;  %v6883_v63 = vunpack.c.h.s8.bf16 %v6877_v5 }
 0x34b   :  { %2107 = vmatpush1.bf16.msra.mxu0 %v6823_v51  ;;  %2230 = vmatpush1.bf16.msra.mxu1 %v6824_v32  ;;  %v6884_v51 = vunpack.c.h.s8.bf16 %v6879_v48  ;;  %v6885_v32 = vld [vmem:[#allocation102_spill] sm:$0xff] }
 0x34c   :  { %2108 = vmatprep.subr.bf16.mxu0 %v6826_v27  ;;  %2231 = vmatprep.subr.bf16.mxu1 %v6828_v34  ;;  %v6886_v4 = vunpack.c.l.s8.bf16 %v6885_v32  ;;  %v6887_v27 = vld [vmem:[#allocation104_spill] sm:$0xff]  ;;  %v6889_v34 = vld [vmem:[#allocation101_spill] sm:$0xff] }
 0x34d   :  { %v6888_v6 = vunpack.c.l.s8.bf16 %v6887_v27  ;;  %v6890_v9 = vunpack.c.l.s8.bf16 %v6889_v34 }
 0x34f   :  { %2109 = vmatpush1.bf16.msra.mxu0 %v6830_v10  ;;  %2232 = vmatpush1.bf16.msra.mxu1 %v6832_v41  ;;  %v6891_v10 = vld [vmem:[#allocation103_spill] sm:$0xff]  ;;  %v6893_v41 = vunpack.c.h.s8.bf16 %v6885_v32  ;;  %v6947_v32 = vld [vmem:[#allocation144_spill] sm:$0xff] }
 0x350   :  { %2110 = vmatprep.subr.bf16.mxu0 %v6833_v22  ;;  %2233 = vmatprep.subr.bf16.mxu1 %v6834_v40  ;;  %v6892_v24 = vunpack.c.l.s8.bf16 %v6891_v10  ;;  %v6894_v22 = vunpack.c.h.s8.bf16 %v6887_v27  ;;  %v6895_v40 = vunpack.c.h.s8.bf16 %v6889_v34  ;;  %v6949_v27 = vld [vmem:[#allocation141_spill] sm:$0xff]  ;;  %v6951_v34 = vld [vmem:[#allocation143_spill] sm:$0xff] }
 0x353   :  { %2111 = vmatpush1.bf16.msra.mxu0 %v6835_v62  ;;  %2234 = vmatpush1.bf16.msra.mxu1 %v6836_v45  ;;  %v6896_v62 = vunpack.c.h.s8.bf16 %v6891_v10  ;;  %v6897_v45 = vld [vmem:[#allocation110_spill] sm:$0xff]  ;;  %v6954_v10 = vunpack.c.h.s8.bf16 %v6947_v32 }
 0x354   :  { %2121 = vmatprep.subr.bf16.mxu0 %v6838_v39  ;;  %2244 = vmatprep.subr.bf16.mxu1 %v6840_v47  ;;  %v6898_v46 = vunpack.c.l.s8.bf16 %v6897_v45  ;;  %v6899_v39 = vld [vmem:[#allocation112_spill] sm:$0xff]  ;;  %v6901_v47 = vld [vmem:[#allocation109_spill] sm:$0xff] }
 0x355   :  { %v6900_v49 = vunpack.c.l.s8.bf16 %v6899_v39  ;;  %v6902_v7 = vunpack.c.l.s8.bf16 %v6901_v47 }
 0x356   :  { %2113 = vmatmul.mubr.bf16.vlgmr.msra.gmra.mrb[4].mxu0 %v4253_v25  ;;  %2236 = vmatmul.mubr.bf16.vlgmr.msra.gmra.mrb[4].mxu1 %v4253_v25  ;;  %v6848_v25 = vunpack.c.h.s8.bf16 %v6843_v55 }
 0x357   :  { %2122 = vmatpush1.bf16.msra.mxu0 %v6842_v33  ;;  %2245 = vmatpush1.bf16.msra.mxu1 %v6844_v3  ;;  %v6903_v33 = vld [vmem:[#allocation111_spill] sm:$0xff]  ;;  %v6905_v3 = vunpack.c.h.s8.bf16 %v6897_v45 }
 0x358   :  { %2123 = vmatprep.subr.bf16.mxu0 %v6845_v23  ;;  %2246 = vmatprep.subr.bf16.mxu1 %v6846_v50  ;;  %v6904_v55 = vunpack.c.l.s8.bf16 %v6903_v33  ;;  %v6906_v23 = vunpack.c.h.s8.bf16 %v6899_v39  ;;  %v6907_v50 = vunpack.c.h.s8.bf16 %v6901_v47 }
 0x359   :  { %2153 = vmatprep.mubr.bf16.mxu0 %v6556_v8  ;;  %2276 = vmatprep.mubr.bf16.mxu1 %v6556_v8  ;;  %v6857_v8 = vunpack.c.h.s8.bf16 %v6849_v15 }
 0x35b   :  { %2124 = vmatpush1.bf16.msra.mxu0 %v6847_v13  ;;  %2247 = vmatpush1.bf16.msra.mxu1 %v6848_v25  ;;  %v6908_v13 = vunpack.c.h.s8.bf16 %v6903_v33  ;;  %v6909_v25 = vld [vmem:[#allocation118_spill] sm:$0xff] }
 0x35c   :  { %2125 = vmatprep.subr.bf16.mxu0 %v6850_v2  ;;  %2248 = vmatprep.subr.bf16.mxu1 %v6852_v26  ;;  %v6910_v15 = vunpack.c.l.s8.bf16 %v6909_v25  ;;  %v6911_v2 = vld [vmem:[#allocation120_spill] sm:$0xff]  ;;  %v6913_v26 = vld [vmem:[#allocation117_spill] sm:$0xff] }
 0x35d   :  { %v6912_v20 = vunpack.c.l.s8.bf16 %v6911_v2  ;;  %v6914_v30 = vunpack.c.l.s8.bf16 %v6913_v26 }
 0x35f   :  { %2126 = vmatpush1.bf16.msra.mxu0 %v6854_v17  ;;  %2249 = vmatpush1.bf16.msra.mxu1 %v6856_v14  ;;  %v6915_v17 = vld [vmem:[#allocation119_spill] sm:$0xff]  ;;  %v6917_v14 = vunpack.c.h.s8.bf16 %v6909_v25 }
 0x360   :  { %2127 = vmatprep.subr.bf16.mxu0 %v6857_v8  ;;  %2250 = vmatprep.subr.bf16.mxu1 %v6858_v0  ;;  %v6916_v60 = vunpack.c.l.s8.bf16 %v6915_v17  ;;  %v6918_v8 = vunpack.c.h.s8.bf16 %v6911_v2  ;;  %v6919_v0 = vunpack.c.h.s8.bf16 %v6913_v26 }
 0x363   :  { %2128 = vmatpush1.bf16.msra.mxu0 %v6859_v43  ;;  %2251 = vmatpush1.bf16.msra.mxu1 %v6860_v19  ;;  %v6920_v43 = vunpack.c.h.s8.bf16 %v6915_v17  ;;  %v6921_v19 = vld [vmem:[#allocation126_spill] sm:$0xff] }
 0x364   :  { %2129 = vmatprep.subr.bf16.mxu0 %v6862_v29  ;;  %2252 = vmatprep.subr.bf16.mxu1 %v6864_v38  ;;  %v6922_v16 = vunpack.c.l.s8.bf16 %v6921_v19  ;;  %v6923_v29 = vld [vmem:[#allocation128_spill] sm:$0xff]  ;;  %v6925_v38 = vld [vmem:[#allocation125_spill] sm:$0xff] }
 0x365   :  { %v6924_v42 = vunpack.c.l.s8.bf16 %v6923_v29  ;;  %v6926_v28 = vunpack.c.l.s8.bf16 %v6925_v38 }
 0x367   :  { %2130 = vmatpush1.bf16.msra.mxu0 %v6866_v37  ;;  %2253 = vmatpush1.bf16.msra.mxu1 %v6868_v18  ;;  %v6927_v37 = vld [vmem:[#allocation127_spill] sm:$0xff]  ;;  %v6929_v18 = vunpack.c.h.s8.bf16 %v6921_v19 }
 0x368   :  { %2131 = vmatprep.subr.bf16.mxu0 %v6869_v57  ;;  %2254 = vmatprep.subr.bf16.mxu1 %v6870_v36  ;;  %v6928_v1 = vunpack.c.l.s8.bf16 %v6927_v37  ;;  %v6930_v57 = vunpack.c.h.s8.bf16 %v6923_v29  ;;  %v6931_v36 = vunpack.c.h.s8.bf16 %v6925_v38 }
 0x36b   :  { %2132 = vmatpush1.bf16.msra.mxu0 %v6871_v56  ;;  %2255 = vmatpush1.bf16.msra.mxu1 %v6872_v53  ;;  %v6932_v56 = vunpack.c.h.s8.bf16 %v6927_v37  ;;  %v6933_v53 = vld [vmem:[#allocation134_spill] sm:$0xff] }
 0x36c   :  { %2133 = vmatprep.subr.bf16.mxu0 %v6874_v52  ;;  %2256 = vmatprep.subr.bf16.mxu1 %v6876_v12  ;;  %v6934_v59 = vunpack.c.l.s8.bf16 %v6933_v53  ;;  %v6935_v52 = vld [vmem:[#allocation136_spill] sm:$0xff]  ;;  %v6937_v12 = vld [vmem:[#allocation133_spill] sm:$0xff] }
 0x36d   :  { %v6936_v58 = vunpack.c.l.s8.bf16 %v6935_v52  ;;  %v6938_v5 = vunpack.c.l.s8.bf16 %v6937_v12 }
 0x36f   :  { %2134 = vmatpush1.bf16.msra.mxu0 %v6878_v21  ;;  %2257 = vmatpush1.bf16.msra.mxu1 %v6880_v61  ;;  %v6939_v21 = vld [vmem:[#allocation135_spill] sm:$0xff]  ;;  %v6941_v61 = vunpack.c.h.s8.bf16 %v6933_v53 }
 0x370   :  { %2135 = vmatprep.subr.bf16.mxu0 %v6881_v35  ;;  %2258 = vmatprep.subr.bf16.mxu1 %v6882_v11  ;;  %v6940_v48 = vunpack.c.l.s8.bf16 %v6939_v21  ;;  %v6942_v35 = vunpack.c.h.s8.bf16 %v6935_v52  ;;  %v6943_v11 = vunpack.c.h.s8.bf16 %v6937_v12 }
 0x373   :  { %2136 = vmatpush1.bf16.msra.mxu0 %v6883_v63  ;;  %2259 = vmatpush1.bf16.msra.mxu1 %v6884_v51  ;;  %v6945_v63 = vld [vmem:[#allocation142_spill] sm:$0xff] }
 0x374   :  { %2137 = vmatprep.subr.bf16.mxu0 %v6886_v4  ;;  %2260 = vmatprep.subr.bf16.mxu1 %v6888_v6  ;;  %v6946_v51 = vunpack.c.l.s8.bf16 %v6945_v63  ;;  %v6948_v4 = vunpack.c.l.s8.bf16 %v6947_v32  ;;  %v6950_v6 = vunpack.c.l.s8.bf16 %v6949_v27 }
 0x377   :  { %2138 = vmatpush1.bf16.msra.mxu0 %v6890_v9  ;;  %2261 = vmatpush1.bf16.msra.mxu1 %v6892_v24  ;;  %v6952_v9 = vunpack.c.l.s8.bf16 %v6951_v34  ;;  %v6955_v24 = vunpack.c.h.s8.bf16 %v6949_v27 }
 0x378   :  { %2139 = vmatprep.subr.bf16.mxu0 %v6893_v41  ;;  %2262 = vmatprep.subr.bf16.mxu1 %v6894_v22  ;;  %v6956_v41 = vunpack.c.h.s8.bf16 %v6951_v34  ;;  %v6957_v22 = vld [vmem:[#allocation150_spill] sm:$0xff] }
 0x37b   :  { %2140 = vmatpush1.bf16.msra.mxu0 %v6895_v40  ;;  %2263 = vmatpush1.bf16.msra.mxu1 %v6896_v62  ;;  %v6958_v40 = vunpack.c.l.s8.bf16 %v6957_v22  ;;  %v6959_v62 = vld [vmem:[#allocation152_spill] sm:$0xff] }
 0x37c   :  { %2141 = vmatprep.subr.bf16.mxu0 %v6898_v46  ;;  %2264 = vmatprep.subr.bf16.mxu1 %v6900_v49  ;;  %v6960_v45 = vunpack.c.l.s8.bf16 %v6959_v62  ;;  %v6961_v46 = vld [vmem:[#allocation149_spill] sm:$0xff]  ;;  %v6963_v49 = vld [vmem:[#allocation151_spill] sm:$0xff]  ;;  %v6966_v33 = vunpack.c.h.s8.bf16 %v6959_v62 }
 0x37d   :  { %v6962_v39 = vunpack.c.l.s8.bf16 %v6961_v46  ;;  %v6964_v47 = vunpack.c.l.s8.bf16 %v6963_v49 }
 0x37f   :  { %2142 = vmatpush1.bf16.msra.mxu0 %v6902_v7  ;;  %2265 = vmatpush1.bf16.msra.mxu1 %v6904_v55  ;;  %v6965_v7 = vunpack.c.h.s8.bf16 %v6957_v22  ;;  %v6967_v55 = vunpack.c.h.s8.bf16 %v6961_v46 }
 0x380   :  { %2143 = vmatprep.subr.bf16.mxu0 %v6905_v3  ;;  %2266 = vmatprep.subr.bf16.mxu1 %v6906_v23  ;;  %v6968_v3 = vunpack.c.h.s8.bf16 %v6963_v49  ;;  %v6969_v23 = vld [vmem:[#allocation158_spill] sm:$0xff] }
 0x383   :  { %2144 = vmatpush1.bf16.msra.mxu0 %v6907_v50  ;;  %2267 = vmatpush1.bf16.msra.mxu1 %v6908_v13  ;;  %v6970_v50 = vunpack.c.l.s8.bf16 %v6969_v23  ;;  %v6971_v13 = vld [vmem:[#allocation160_spill] sm:$0xff] }
 0x384   :  { %2145 = vmatprep.subr.bf16.mxu0 %v6910_v15  ;;  %2268 = vmatprep.subr.bf16.mxu1 %v6912_v20  ;;  %v6972_v25 = vunpack.c.l.s8.bf16 %v6971_v13  ;;  %v6973_v15 = vld [vmem:[#allocation157_spill] sm:$0xff]  ;;  %v6975_v20 = vld [vmem:[#allocation159_spill] sm:$0xff]  ;;  %v6978_v17 = vunpack.c.h.s8.bf16 %v6971_v13 }
 0x385   :  { %v6974_v2 = vunpack.c.l.s8.bf16 %v6973_v15  ;;  %v6976_v26 = vunpack.c.l.s8.bf16 %v6975_v20 }
 0x387   :  { %2146 = vmatpush1.bf16.msra.mxu0 %v6914_v30  ;;  %2269 = vmatpush1.bf16.msra.mxu1 %v6916_v60  ;;  %v6977_v30 = vunpack.c.h.s8.bf16 %v6969_v23  ;;  %v6979_v60 = vunpack.c.h.s8.bf16 %v6973_v15  ;;  %v2327_v23 = vld [vmem:[#allocation12 + $0x1] ss:$2 sm:$0xff] }
 0x388   :  { %2147 = vmatprep.subr.bf16.mxu0 %v6917_v14  ;;  %2270 = vmatprep.subr.bf16.mxu1 %v6918_v8  ;;  %v6980_v14 = vunpack.c.h.s8.bf16 %v6975_v20  ;;  %v6981_v8 = vld [vmem:[#allocation166_spill] sm:$0xff] }
 0x38b   :  { %2148 = vmatpush1.bf16.msra.mxu0 %v6919_v0  ;;  %2271 = vmatpush1.bf16.msra.mxu1 %v6920_v43  ;;  %v6982_v0 = vunpack.c.l.s8.bf16 %v6981_v8  ;;  %v6983_v43 = vld [vmem:[#allocation168_spill] sm:$0xff] }
 0x38c   :  { %2149 = vmatprep.subr.bf16.mxu0 %v6922_v16  ;;  %2272 = vmatprep.subr.bf16.mxu1 %v6924_v42  ;;  %v6984_v19 = vunpack.c.l.s8.bf16 %v6983_v43  ;;  %v6985_v16 = vld [vmem:[#allocation165_spill] sm:$0xff]  ;;  %v6987_v42 = vld [vmem:[#allocation167_spill] sm:$0xff]  ;;  %v6990_v37 = vunpack.c.h.s8.bf16 %v6983_v43 }
 0x38d   :  { %v6986_v29 = vunpack.c.l.s8.bf16 %v6985_v16  ;;  %v6988_v38 = vunpack.c.l.s8.bf16 %v6987_v42 }
 0x38f   :  { %2150 = vmatpush1.bf16.msra.mxu0 %v6926_v28  ;;  %2273 = vmatpush1.bf16.msra.mxu1 %v6928_v1  ;;  %v6989_v28 = vunpack.c.h.s8.bf16 %v6981_v8  ;;  %v6991_v1 = vunpack.c.h.s8.bf16 %v6985_v16 }
 0x390   :  { %2151 = vmatprep.subr.bf16.mxu0 %v6929_v18  ;;  %2274 = vmatprep.subr.bf16.mxu1 %v6930_v57  ;;  %v6992_v18 = vunpack.c.h.s8.bf16 %v6987_v42  ;;  %v6993_v57 = vld [vmem:[#allocation174_spill] sm:$0xff] }
 0x393   :  { %2152 = vmatpush1.bf16.msra.mxu0 %v6931_v36  ;;  %2275 = vmatpush1.bf16.msra.mxu1 %v6932_v56  ;;  %v6994_v36 = vunpack.c.l.s8.bf16 %v6993_v57  ;;  %v6995_v56 = vld [vmem:[#allocation176_spill] sm:$0xff] }
 0x394   :  { %2162 = vmatprep.subr.bf16.mxu0 %v6934_v59  ;;  %2285 = vmatprep.subr.bf16.mxu1 %v6936_v58  ;;  %v6996_v53 = vunpack.c.l.s8.bf16 %v6995_v56  ;;  %v6997_v59 = vld [vmem:[#allocation173_spill] sm:$0xff]  ;;  %v6999_v58 = vld [vmem:[#allocation175_spill] sm:$0xff] }
 0x395   :  { %v6998_v52 = vunpack.c.l.s8.bf16 %v6997_v59  ;;  %v7000_v12 = vunpack.c.l.s8.bf16 %v6999_v58 }
 0x396   :  { %2154 = vmatmul.mubr.bf16.vlgmr.msra.gmra.mrb[4].mxu0 %v6647_v44  ;;  %2277 = vmatmul.mubr.bf16.vlgmr.msra.gmra.mrb[4].mxu1 %v6647_v44  ;;  %v6944_v44 = vunpack.c.h.s8.bf16 %v6939_v21  ;;  %v7002_v21 = vunpack.c.h.s8.bf16 %v6995_v56 }
 0x397   :  { %2163 = vmatpush1.bf16.msra.mxu0 %v6938_v5  ;;  %2286 = vmatpush1.bf16.msra.mxu1 %v6940_v48  ;;  %v7001_v5 = vunpack.c.h.s8.bf16 %v6993_v57  ;;  %v7003_v48 = vunpack.c.h.s8.bf16 %v6997_v59 }
 0x398   :  { %2164 = vmatprep.subr.bf16.mxu0 %v6941_v61  ;;  %2287 = vmatprep.subr.bf16.mxu1 %v6942_v35  ;;  %v7004_v61 = vunpack.c.h.s8.bf16 %v6999_v58  ;;  %v7005_v35 = vld [vmem:[#allocation181_spill] sm:$0xff] }
 0x399   :  { %2194 = vmatprep.mubr.bf16.mxu0 %v6654_v54  ;;  %2317 = vmatprep.mubr.bf16.mxu1 %v6654_v54  ;;  %v6953_v54 = vunpack.c.h.s8.bf16 %v6945_v63 }
 0x39b   :  { %2165 = vmatpush1.bf16.msra.mxu0 %v6943_v11  ;;  %2288 = vmatpush1.bf16.msra.mxu1 %v6944_v44  ;;  %v7006_v11 = vunpack.c.l.s8.bf16 %v7005_v35  ;;  %v7007_v44 = vld [vmem:[#allocation183_spill] sm:$0xff] }
 0x39c   :  { %2166 = vmatprep.subr.bf16.mxu0 %v6946_v51  ;;  %2289 = vmatprep.subr.bf16.mxu1 %v6948_v4  ;;  %v7008_v63 = vunpack.c.l.s8.bf16 %v7007_v44  ;;  %v7009_v51 = vld [vmem:[#allocation180_spill] sm:$0xff]  ;;  %v7011_v4 = vld [vmem:[#allocation182_spill] sm:$0xff]  ;;  %v7014_v34 = vunpack.c.h.s8.bf16 %v7007_v44 }
 0x39d   :  { %v7010_v32 = vunpack.c.l.s8.bf16 %v7009_v51  ;;  %v7012_v27 = vunpack.c.l.s8.bf16 %v7011_v4 }
 0x39f   :  { %2167 = vmatpush1.bf16.msra.mxu0 %v6950_v6  ;;  %2290 = vmatpush1.bf16.msra.mxu1 %v6952_v9  ;;  %v7013_v6 = vunpack.c.h.s8.bf16 %v7005_v35  ;;  %v7015_v9 = vunpack.c.h.s8.bf16 %v7009_v51 }
 0x3a0   :  { %2168 = vmatprep.subr.bf16.mxu0 %v6953_v54  ;;  %2291 = vmatprep.subr.bf16.mxu1 %v6954_v10  ;;  %v7016_v54 = vunpack.c.h.s8.bf16 %v7011_v4  ;;  %v7017_v10 = vld [vmem:[#allocation189_spill] sm:$0xff] }
 0x3a3   :  { %2169 = vmatpush1.bf16.msra.mxu0 %v6955_v24  ;;  %2292 = vmatpush1.bf16.msra.mxu1 %v6956_v41  ;;  %v7018_v24 = vunpack.c.l.s8.bf16 %v7017_v10  ;;  %v7019_v41 = vld [vmem:[#allocation191_spill] sm:$0xff] }
 0x3a4   :  { %2170 = vmatprep.subr.bf16.mxu0 %v6958_v40  ;;  %2293 = vmatprep.subr.bf16.mxu1 %v6960_v45  ;;  %v7020_v22 = vunpack.c.l.s8.bf16 %v7019_v41  ;;  %v7021_v40 = vld [vmem:[#allocation188_spill] sm:$0xff]  ;;  %v7023_v45 = vld [vmem:[#allocation190_spill] sm:$0xff]  ;;  %v7026_v49 = vunpack.c.h.s8.bf16 %v7019_v41 }
 0x3a5   :  { %v7022_v62 = vunpack.c.l.s8.bf16 %v7021_v40  ;;  %v7024_v46 = vunpack.c.l.s8.bf16 %v7023_v45 }
 0x3a7   :  { %2171 = vmatpush1.bf16.msra.mxu0 %v6962_v39  ;;  %2294 = vmatpush1.bf16.msra.mxu1 %v6964_v47  ;;  %v7025_v39 = vunpack.c.h.s8.bf16 %v7017_v10  ;;  %v7027_v47 = vunpack.c.h.s8.bf16 %v7021_v40 }
 0x3a8   :  { %2172 = vmatprep.subr.bf16.mxu0 %v6965_v7  ;;  %2295 = vmatprep.subr.bf16.mxu1 %v6966_v33  ;;  %v7028_v7 = vunpack.c.h.s8.bf16 %v7023_v45  ;;  %v7029_v33 = vld [vmem:[#allocation31_spill] sm:$0xff] }
 0x3a9   :  { %v5876_v13 = vsub.s32 3, %v7029_v33 }
 0x3ab   :  { %2173 = vmatpush1.bf16.msra.mxu0 %v6967_v55  ;;  %2296 = vmatpush1.bf16.msra.mxu1 %v6968_v3  ;;  %v5867_v55 = vsub.s32 0, %v7029_v33  ;;  %v5870_v3 = vsub.s32 2, %v7029_v33  ;;  %v2344_v20 = vrot.slane %v2327_v23, %v5876_v13 }
 0x3ac   :  { %2174 = vmatprep.subr.bf16.mxu0 %v6970_v50  ;;  %2297 = vmatprep.subr.bf16.mxu1 %v6972_v25  ;;  %v5873_v50 = vsub.s32 1, %v7029_v33  ;;  %v2377_v25 = vld [vmem:[#allocation12] ss:$2 sm:$0xff] }
 0x3ad   :  { %v2332_v15 = vrot.slane %v2327_v23, %v5867_v55  ;;  %v2394_v8 = vrot.slane %v2377_v25, %v5876_v13 }
 0x3af   :  { %2175 = vmatpush1.bf16.msra.mxu0 %v6974_v2  ;;  %2298 = vmatpush1.bf16.msra.mxu1 %v6976_v26  ;;  %v2340_v2 = vrot.slane %v2327_v23, %v5870_v3  ;;  %v2382_v26 = vrot.slane %v2377_v25, %v5867_v55 }
 0x3b0   :  { %2176 = vmatprep.subr.bf16.mxu0 %v6977_v30  ;;  %2299 = vmatprep.subr.bf16.mxu1 %v6978_v17  ;;  %v2390_v30 = vrot.slane %v2377_v25, %v5870_v3 }
 0x3b3   :  { %2177 = vmatpush1.bf16.msra.mxu0 %v6979_v60  ;;  %2300 = vmatpush1.bf16.msra.mxu1 %v6980_v14  ;;  %v2386_v14 = vrot.slane %v2377_v25, %v5873_v50 }
 0x3b4   :  { %2178 = vmatprep.subr.bf16.mxu0 %v6982_v0  ;;  %2301 = vmatprep.subr.bf16.mxu1 %v6984_v19 }
 0x3b7   :  { %2179 = vmatpush1.bf16.msra.mxu0 %v6986_v29  ;;  %2302 = vmatpush1.bf16.msra.mxu1 %v6988_v38 }
 0x3b8   :  { %2180 = vmatprep.subr.bf16.mxu0 %v6989_v28  ;;  %2303 = vmatprep.subr.bf16.mxu1 %v6990_v37 }
 0x3bb   :  { %2181 = vmatpush1.bf16.msra.mxu0 %v6991_v1  ;;  %2304 = vmatpush1.bf16.msra.mxu1 %v6992_v18 }
 0x3bc   :  { %2182 = vmatprep.subr.bf16.mxu0 %v6994_v36  ;;  %2305 = vmatprep.subr.bf16.mxu1 %v6996_v53 }
 0x3bf   :  { %2183 = vmatpush1.bf16.msra.mxu0 %v6998_v52  ;;  %2306 = vmatpush1.bf16.msra.mxu1 %v7000_v12  ;;  %v2347_v12 = vsub.s32 4, %v7029_v33 }
 0x3c0   :  { %2184 = vmatprep.subr.bf16.mxu0 %v7001_v5  ;;  %2307 = vmatprep.subr.bf16.mxu1 %v7002_v21  ;;  %v2355_v5 = vsub.s32 6, %v7029_v33  ;;  %v2351_v21 = vsub.s32 5, %v7029_v33 }
 0x3c2   :  { %v2356_v35 = vrot.slane %v2327_v23, %v2355_v5  ;;  %v2406_v51 = vrot.slane %v2377_v25, %v2355_v5 }
 0x3c3   :  { %2185 = vmatpush1.bf16.msra.mxu0 %v7003_v48  ;;  %2308 = vmatpush1.bf16.msra.mxu1 %v7004_v61  ;;  %v2359_v48 = vsub.s32 7, %v7029_v33  ;;  %v2348_v61 = vrot.slane %v2327_v23, %v2347_v12 }
 0x3c4   :  { %2186 = vmatprep.subr.bf16.mxu0 %v7006_v11  ;;  %2309 = vmatprep.subr.bf16.mxu1 %v7008_v63  ;;  %v2352_v11 = vrot.slane %v2327_v23, %v2351_v21  ;;  %v2398_v63 = vrot.slane %v2377_v25, %v2347_v12 }
 0x3c5   :  { %v2360_v44 = vrot.slane %v2327_v23, %v2359_v48 }
 0x3c7   :  { %2187 = vmatpush1.bf16.msra.mxu0 %v7010_v32  ;;  %2310 = vmatpush1.bf16.msra.mxu1 %v7012_v27  ;;  %v2402_v27 = vrot.slane %v2377_v25, %v2351_v21 }
 0x3c8   :  { %2188 = vmatprep.subr.bf16.mxu0 %v7013_v6  ;;  %2311 = vmatprep.subr.bf16.mxu1 %v7014_v34  ;;  %v2410_v6 = vrot.slane %v2377_v25, %v2359_v48 }
 0x3cb   :  { %2189 = vmatpush1.bf16.msra.mxu0 %v7015_v9  ;;  %2312 = vmatpush1.bf16.msra.mxu1 %v7016_v54 }
 0x3cc   :  { %2190 = vmatprep.subr.bf16.mxu0 %v7018_v24  ;;  %2313 = vmatprep.subr.bf16.mxu1 %v7020_v22 }
 0x3cf   :  { %2191 = vmatpush1.bf16.msra.mxu0 %v7022_v62  ;;  %2314 = vmatpush1.bf16.msra.mxu1 %v7024_v46 }
 0x3d0   :  { %2192 = vmatprep.subr.bf16.mxu0 %v7025_v39  ;;  %2315 = vmatprep.subr.bf16.mxu1 %v7026_v49 }
 0x3d3   :  { %2193 = vmatpush1.bf16.msra.mxu0 %v7027_v47  ;;  %2316 = vmatpush1.bf16.msra.mxu1 %v7028_v7 }
 0x3d6   :  { %2195 = vmatmul.mubr.bf16.vlgmr.msra.gmra.mrb[4].mxu0 %v6744_v31  ;;  %2318 = vmatmul.mubr.bf16.vlgmr.msra.gmra.mrb[4].mxu1 %v6744_v31  ;;  %v2336_v31 = vrot.slane %v2327_v23, %v5873_v50 }
 0x3e9   :  { %v1950_v17 = vpop.f32.mrb[0].mxu0  ;;  %v2073_v60 = vpop.f32.mrb[0].mxu1 }
 0x3ea   :  { %v2369_v0 = vmul.f32 %v2332_v15, %v1950_v17  ;;  %v2371_v43 = vmul.f32 %v2340_v2, %v2073_v60  ;;  %v1952_v19 = vpop.f32.mrb[1].mxu0  ;;  %v2075_v16 = vpop.f32.mrb[1].mxu1 }
 0x3eb   :  { %v2370_v29 = vmul.f32 %v2336_v31, %v1952_v19  ;;  %v2372_v42 = vmul.f32 %v2344_v20, %v2075_v16  ;;  %v1954_v38 = vpop.f32.mrb[2].mxu0  ;;  %v2077_v28 = vpop.f32.mrb[2].mxu1 }
 0x3ec   :  { %v5886_v37 = vadd.f32 %v2382_v26, %v2369_v0  ;;  %v5888_v1 = vadd.f32 %v2390_v30, %v2371_v43  ;;  %v1955_v18 = vpop.f32.mrb[3].mxu0  ;;  %v2078_v57 = vpop.f32.mrb[3].mxu1 }
 0x3ed   :  { %v2420_v36 = vadd.f32 %v2386_v14, %v2370_v29  ;;  %v5890_v56 = vadd.f32 %v2394_v8, %v2372_v42 }
 0x3ee   :  { %v2427_v53 = vmax.f32 %v5886_v37, 0.0  ;;  %v2429_v59 = vmax.f32 %v5888_v1, 0.0 }
 0x3ef   :  { %v2428_v52 = vmax.f32 %v2420_v36, 0.0  ;;  %v2430_v58 = vmax.f32 %v5890_v56, 0.0 }
 0x4a9   :  { %v2196_v32 = vpop.f32.mrb[4].mxu0  ;;  %v2319_v4 = vpop.f32.mrb[4].mxu1 }
 0x4aa   :  { %v2373_v34 = vmul.f32 %v2348_v61, %v2196_v32  ;;  %v2375_v9 = vmul.f32 %v2356_v35, %v2319_v4  ;;  %v2198_v54 = vpop.f32.mrb[5].mxu0  ;;  %v2321_v10 = vpop.f32.mrb[5].mxu1 }
 0x4ab   :  { %v2374_v24 = vmul.f32 %v2352_v11, %v2198_v54  ;;  %v2376_v41 = vmul.f32 %v2360_v44, %v2321_v10  ;;  %v2200_v22 = vpop.f32.mrb[6].mxu0  ;;  %v2323_v40 = vpop.f32.mrb[6].mxu1 }
 0x4ac   :  { %v5899_v62 = vadd.f32 %v2398_v63, %v2373_v34  ;;  %v5901_v45 = vadd.f32 %v2406_v51, %v2375_v9  ;;  %v2201_v46 = vpop.f32.mrb[7].mxu0  ;;  %v2324_v39 = vpop.f32.mrb[7].mxu1 }
 0x4ad   :  { %v5903_v49 = vadd.f32 %v2402_v27, %v2374_v24  ;;  %v5905_v47 = vadd.f32 %v2410_v6, %v2376_v41 }
 0x4ae   :  { %v2431_v7 = vmax.f32 %v5899_v62, 0.0  ;;  %v2433_v33 = vmax.f32 %v5901_v45, 0.0 }
 0x4af   :  { %v2432_v23 = vmax.f32 %v5903_v49, 0.0  ;;  %v2434_v25 = vmax.f32 %v5905_v47, 0.0 }
 0x4b0   :  { %4085 = dma.done.wait [#allocation6 + $0x2], 16384 }
 0x4b1   :  { %4086 = vsyncadd [#allocation6 + $0x2], 4294950912  ;;  %v2440_v15 = vpack.c.bf16 %v2428_v52, %v2428_v52  ;;  %v2448_v2 = vld [vmem:[#allocation4 + $0x8] sm:$0xff]  ;;  %v2450_v31 = vld [vmem:[#allocation4 + $0x18] sm:$0xff] }
 0x4b2   :  { %v2447_v20 = vld [vmem:[#allocation4] sm:$0xff]  ;;  %v2576_v26 = vunpack.c.l.s8.bf16 %v2448_v2  ;;  %v2580_v30 = vunpack.c.h.s8.bf16 %v2448_v2  ;;  %v2578_v17 = vunpack.c.l.s8.bf16 %v2450_v31  ;;  %v2582_v60 = vunpack.c.h.s8.bf16 %v2450_v31  ;;  %v2449_v14 = vld [vmem:[#allocation4 + $0x10] sm:$0xff]  ;;  %v2452_v43 = vld [vmem:[#allocation4 + $0x28] sm:$0xff] }
 0x4b3   :  { %2863 = vmatprep.mubr.bf16.mxu0 %v2440_v15  ;;  %3027 = vmatprep.mubr.bf16.mxu1 %v2440_v15  ;;  %v2575_v8 = vunpack.c.l.s8.bf16 %v2447_v20  ;;  %v2577_v0 = vunpack.c.l.s8.bf16 %v2449_v14  ;;  %v2454_v19 = vld [vmem:[#allocation4 + $0x38] sm:$0xff]  ;;  %v2579_v16 = vunpack.c.h.s8.bf16 %v2447_v20  ;;  %v2581_v29 = vunpack.c.h.s8.bf16 %v2449_v14  ;;  %v2451_v28 = vld [vmem:[#allocation4 + $0x20] sm:$0xff]  ;;  %v2453_v18 = vld [vmem:[#allocation4 + $0x30] sm:$0xff] }
 0x4b4   :  { %2831 = vmatprep.subr.bf16.mxu0 %v2576_v26  ;;  %2995 = vmatprep.subr.bf16.mxu1 %v2578_v17  ;;  %v2584_v42 = vunpack.c.l.s8.bf16 %v2452_v43  ;;  %v2586_v38 = vunpack.c.l.s8.bf16 %v2454_v19  ;;  %v2583_v57 = vunpack.c.l.s8.bf16 %v2451_v28  ;;  %v2585_v36 = vunpack.c.l.s8.bf16 %v2453_v18  ;;  %v2456_v5 = vld [vmem:[#allocation4 + $0x48] sm:$0xff]  ;;  %v2458_v21 = vld [vmem:[#allocation4 + $0x58] sm:$0xff]  ;;  %v2455_v44 = vld [vmem:[#allocation4 + $0x40] sm:$0xff] }
 0x4b5   :  { %2832 = vmatpush1.bf16.msra.mxu0 %v2575_v8  ;;  %2996 = vmatpush1.bf16.msra.mxu1 %v2577_v0  ;;  %v2588_v52 = vunpack.c.h.s8.bf16 %v2452_v43  ;;  %v2590_v12 = vunpack.c.h.s8.bf16 %v2454_v19  ;;  %v2587_v48 = vunpack.c.h.s8.bf16 %v2451_v28  ;;  %v2589_v61 = vunpack.c.h.s8.bf16 %v2453_v18  ;;  %v2457_v63 = vld [vmem:[#allocation4 + $0x50] sm:$0xff]  ;;  %v2460_v6 = vld [vmem:[#allocation4 + $0x68] sm:$0xff]  ;;  %v2462_v34 = vld [vmem:[#allocation4 + $0x78] sm:$0xff] }
 0x4b6   :  { %2833 = vmatprep.subr.bf16.mxu0 %v2580_v30  ;;  %2997 = vmatprep.subr.bf16.mxu1 %v2582_v60  ;;  %v2592_v35 = vunpack.c.l.s8.bf16 %v2456_v5  ;;  %v2594_v11 = vunpack.c.l.s8.bf16 %v2458_v21  ;;  %v2591_v51 = vunpack.c.l.s8.bf16 %v2455_v44  ;;  %v2593_v32 = vunpack.c.l.s8.bf16 %v2457_v63  ;;  %v2459_v41 = vld [vmem:[#allocation4 + $0x60] sm:$0xff]  ;;  %v2461_v22 = vld [vmem:[#allocation4 + $0x70] sm:$0xff]  ;;  %v2464_v2 = vld [vmem:[#allocation4 + $0x88] sm:$0xff] }
 0x4b7   :  { %v2596_v4 = vunpack.c.h.s8.bf16 %v2456_v5  ;;  %v2598_v27 = vunpack.c.h.s8.bf16 %v2458_v21  ;;  %v2595_v9 = vunpack.c.h.s8.bf16 %v2455_v44  ;;  %v2597_v54 = vunpack.c.h.s8.bf16 %v2457_v63  ;;  %v2466_v31 = vld [vmem:[#allocation4 + $0x98] sm:$0xff]  ;;  %v2463_v60 = vld [vmem:[#allocation4 + $0x80] sm:$0xff]  ;;  %v2465_v14 = vld [vmem:[#allocation4 + $0x90] sm:$0xff] }
 0x4b8   :  { %v2600_v10 = vunpack.c.l.s8.bf16 %v2460_v6  ;;  %v2602_v24 = vunpack.c.l.s8.bf16 %v2462_v34  ;;  %v2599_v40 = vunpack.c.l.s8.bf16 %v2459_v41  ;;  %v2601_v46 = vunpack.c.l.s8.bf16 %v2461_v22 }
 0x4b9   :  { %2834 = vmatpush1.bf16.msra.mxu0 %v2579_v16  ;;  %2998 = vmatpush1.bf16.msra.mxu1 %v2581_v29  ;;  %v2604_v39 = vunpack.c.h.s8.bf16 %v2460_v6  ;;  %v2606_v15 = vunpack.c.h.s8.bf16 %v2462_v34  ;;  %v2603_v20 = vunpack.c.h.s8.bf16 %v2459_v41  ;;  %v2605_v26 = vunpack.c.h.s8.bf16 %v2461_v22  ;;  %v2468_v16 = vld [vmem:[#allocation4 + $0xa8] sm:$0xff]  ;;  %v2470_v29 = vld [vmem:[#allocation4 + $0xb8] sm:$0xff] }
 0x4ba   :  { %2835 = vmatprep.subr.bf16.mxu0 %v2584_v42  ;;  %2999 = vmatprep.subr.bf16.mxu1 %v2586_v38  ;;  %v2608_v30 = vunpack.c.l.s8.bf16 %v2464_v2  ;;  %v2610_v17 = vunpack.c.l.s8.bf16 %v2466_v31  ;;  %v2607_v8 = vunpack.c.l.s8.bf16 %v2463_v60  ;;  %v2609_v0 = vunpack.c.l.s8.bf16 %v2465_v14 }
 0x4bb   :  { %v2612_v43 = vunpack.c.h.s8.bf16 %v2464_v2  ;;  %v2614_v19 = vunpack.c.h.s8.bf16 %v2466_v31  ;;  %v2611_v42 = vunpack.c.h.s8.bf16 %v2463_v60  ;;  %v2613_v38 = vunpack.c.h.s8.bf16 %v2465_v14 }
 0x4bc   :  { %v2616_v28 = vunpack.c.l.s8.bf16 %v2468_v16  ;;  %v2618_v18 = vunpack.c.l.s8.bf16 %v2470_v29  ;;  %v2620_v5 = vunpack.c.h.s8.bf16 %v2468_v16  ;;  %v2622_v21 = vunpack.c.h.s8.bf16 %v2470_v29 }
 0x4bd   :  { %2836 = vmatpush1.bf16.msra.mxu0 %v2583_v57  ;;  %3000 = vmatpush1.bf16.msra.mxu1 %v2585_v36  ;;  %v2467_v57 = vld [vmem:[#allocation4 + $0xa0] sm:$0xff]  ;;  %v2469_v36 = vld [vmem:[#allocation4 + $0xb0] sm:$0xff] }
 0x4be   :  { %2837 = vmatprep.subr.bf16.mxu0 %v2588_v52  ;;  %3001 = vmatprep.subr.bf16.mxu1 %v2590_v12  ;;  %v2615_v52 = vunpack.c.l.s8.bf16 %v2467_v57  ;;  %v2617_v12 = vunpack.c.l.s8.bf16 %v2469_v36 }
 0x4c1   :  { %2838 = vmatpush1.bf16.msra.mxu0 %v2587_v48  ;;  %3002 = vmatpush1.bf16.msra.mxu1 %v2589_v61  ;;  %v2472_v48 = vld [vmem:[#allocation4 + $0xc8] sm:$0xff]  ;;  %v2474_v61 = vld [vmem:[#allocation4 + $0xd8] sm:$0xff] }
 0x4c2   :  { %2839 = vmatprep.subr.bf16.mxu0 %v2592_v35  ;;  %3003 = vmatprep.subr.bf16.mxu1 %v2594_v11  ;;  %v2619_v35 = vunpack.c.h.s8.bf16 %v2467_v57  ;;  %v2621_v11 = vunpack.c.h.s8.bf16 %v2469_v36  ;;  %v2624_v44 = vunpack.c.l.s8.bf16 %v2472_v48  ;;  %v2626_v63 = vunpack.c.l.s8.bf16 %v2474_v61 }
 0x4c3   :  { %v2628_v6 = vunpack.c.h.s8.bf16 %v2472_v48  ;;  %v2630_v34 = vunpack.c.h.s8.bf16 %v2474_v61  ;;  %v2488_v48 = vld [vmem:[#allocation4 + $0x148] sm:$0xff]  ;;  %v2490_v61 = vld [vmem:[#allocation4 + $0x158] sm:$0xff] }
 0x4c5   :  { %2840 = vmatpush1.bf16.msra.mxu0 %v2591_v51  ;;  %3004 = vmatpush1.bf16.msra.mxu1 %v2593_v32  ;;  %v2471_v51 = vld [vmem:[#allocation4 + $0xc0] sm:$0xff]  ;;  %v2473_v32 = vld [vmem:[#allocation4 + $0xd0] sm:$0xff] }
 0x4c6   :  { %2841 = vmatprep.subr.bf16.mxu0 %v2596_v4  ;;  %3005 = vmatprep.subr.bf16.mxu1 %v2598_v27  ;;  %v2623_v4 = vunpack.c.l.s8.bf16 %v2471_v51  ;;  %v2625_v27 = vunpack.c.l.s8.bf16 %v2473_v32 }
 0x4c9   :  { %2842 = vmatpush1.bf16.msra.mxu0 %v2595_v9  ;;  %3006 = vmatpush1.bf16.msra.mxu1 %v2597_v54  ;;  %v2476_v9 = vld [vmem:[#allocation4 + $0xe8] sm:$0xff]  ;;  %v2478_v54 = vld [vmem:[#allocation4 + $0xf8] sm:$0xff] }
 0x4ca   :  { %2843 = vmatprep.subr.bf16.mxu0 %v2600_v10  ;;  %3007 = vmatprep.subr.bf16.mxu1 %v2602_v24  ;;  %v2627_v10 = vunpack.c.h.s8.bf16 %v2471_v51  ;;  %v2629_v24 = vunpack.c.h.s8.bf16 %v2473_v32  ;;  %v2632_v41 = vunpack.c.l.s8.bf16 %v2476_v9  ;;  %v2634_v22 = vunpack.c.l.s8.bf16 %v2478_v54  ;;  %v2487_v51 = vld [vmem:[#allocation4 + $0x140] sm:$0xff]  ;;  %v2489_v32 = vld [vmem:[#allocation4 + $0x150] sm:$0xff] }
 0x4cb   :  { %v2636_v2 = vunpack.c.h.s8.bf16 %v2476_v9  ;;  %v2638_v31 = vunpack.c.h.s8.bf16 %v2478_v54  ;;  %v2492_v9 = vld [vmem:[#allocation4 + $0x168] sm:$0xff]  ;;  %v2494_v54 = vld [vmem:[#allocation4 + $0x178] sm:$0xff] }
 0x4cd   :  { %2844 = vmatpush1.bf16.msra.mxu0 %v2599_v40  ;;  %3008 = vmatpush1.bf16.msra.mxu1 %v2601_v46  ;;  %v2475_v40 = vld [vmem:[#allocation4 + $0xe0] sm:$0xff]  ;;  %v2477_v46 = vld [vmem:[#allocation4 + $0xf0] sm:$0xff] }
 0x4ce   :  { %2845 = vmatprep.subr.bf16.mxu0 %v2604_v39  ;;  %3009 = vmatprep.subr.bf16.mxu1 %v2606_v15  ;;  %v2631_v39 = vunpack.c.l.s8.bf16 %v2475_v40  ;;  %v2633_v15 = vunpack.c.l.s8.bf16 %v2477_v46 }
 0x4d1   :  { %2846 = vmatpush1.bf16.msra.mxu0 %v2603_v20  ;;  %3010 = vmatpush1.bf16.msra.mxu1 %v2605_v26  ;;  %v2480_v20 = vld [vmem:[#allocation4 + $0x108] sm:$0xff]  ;;  %v2482_v26 = vld [vmem:[#allocation4 + $0x118] sm:$0xff] }
 0x4d2   :  { %2847 = vmatprep.subr.bf16.mxu0 %v2608_v30  ;;  %3011 = vmatprep.subr.bf16.mxu1 %v2610_v17  ;;  %v2635_v30 = vunpack.c.h.s8.bf16 %v2475_v40  ;;  %v2637_v17 = vunpack.c.h.s8.bf16 %v2477_v46  ;;  %v2640_v60 = vunpack.c.l.s8.bf16 %v2480_v20  ;;  %v2642_v14 = vunpack.c.l.s8.bf16 %v2482_v26  ;;  %v2491_v40 = vld [vmem:[#allocation4 + $0x160] sm:$0xff]  ;;  %v2493_v46 = vld [vmem:[#allocation4 + $0x170] sm:$0xff] }
 0x4d3   :  { %v2644_v29 = vunpack.c.h.s8.bf16 %v2480_v20  ;;  %v2496_v20 = vld [vmem:[#allocation4 + $0x188] sm:$0xff] }
 0x4d5   :  { %2848 = vmatpush1.bf16.msra.mxu0 %v2607_v8  ;;  %3012 = vmatpush1.bf16.msra.mxu1 %v2609_v0  ;;  %v2479_v8 = vld [vmem:[#allocation4 + $0x100] sm:$0xff]  ;;  %v2481_v0 = vld [vmem:[#allocation4 + $0x110] sm:$0xff] }
 0x4d6   :  { %2849 = vmatprep.subr.bf16.mxu0 %v2612_v43  ;;  %3013 = vmatprep.subr.bf16.mxu1 %v2614_v19  ;;  %v2439_v43 = vpack.c.bf16 %v2427_v53, %v2427_v53  ;;  %v2639_v19 = vunpack.c.l.s8.bf16 %v2479_v8  ;;  %v2641_v16 = vunpack.c.l.s8.bf16 %v2481_v0  ;;  %v2643_v37 = vunpack.c.h.s8.bf16 %v2479_v8  ;;  %v2495_v8 = vld [vmem:[#allocation4 + $0x180] sm:$0xff] }
 0x4d7   :  { %v2645_v53 = vunpack.c.h.s8.bf16 %v2481_v0  ;;  %v2497_v0 = vld [vmem:[#allocation4 + $0x190] sm:$0xff] }
 0x4d9   :  { %2850 = vmatpush1.bf16.msra.mxu0 %v2611_v42  ;;  %3014 = vmatpush1.bf16.msra.mxu1 %v2613_v38  ;;  %v2646_v42 = vunpack.c.h.s8.bf16 %v2482_v26  ;;  %v2484_v38 = vld [vmem:[#allocation4 + $0x128] sm:$0xff]  ;;  %v2498_v26 = vld [vmem:[#allocation4 + $0x198] sm:$0xff] }
 0x4da   :  { %2851 = vmatprep.subr.bf16.mxu0 %v2616_v28  ;;  %3015 = vmatprep.subr.bf16.mxu1 %v2618_v18  ;;  %v2486_v28 = vld [vmem:[#allocation4 + $0x138] sm:$0xff]  ;;  %v2442_v18 = vpack.c.bf16 %v2430_v58, %v2430_v58  ;;  %v2648_v57 = vunpack.c.l.s8.bf16 %v2484_v38  ;;  %v2652_v58 = vunpack.c.h.s8.bf16 %v2484_v38 }
 0x4db   :  { %v2650_v36 = vunpack.c.l.s8.bf16 %v2486_v28  ;;  %v2502_v38 = vld [vmem:[#allocation4 + $0x1b8] sm:$0xff] }
 0x4dd   :  { %2852 = vmatpush1.bf16.msra.mxu0 %v2615_v52  ;;  %3016 = vmatpush1.bf16.msra.mxu1 %v2617_v12  ;;  %v2483_v52 = vld [vmem:[#allocation4 + $0x120] sm:$0xff]  ;;  %v2485_v12 = vld [vmem:[#allocation4 + $0x130] sm:$0xff] }
 0x4de   :  { %2853 = vmatprep.subr.bf16.mxu0 %v2620_v5  ;;  %3017 = vmatprep.subr.bf16.mxu1 %v2622_v21  ;;  %v2647_v5 = vunpack.c.l.s8.bf16 %v2483_v52  ;;  %v2649_v56 = vunpack.c.l.s8.bf16 %v2485_v12  ;;  %v2654_v21 = vunpack.c.h.s8.bf16 %v2486_v28  ;;  %v2675_v28 = vunpack.c.h.s8.bf16 %v2495_v8 }
 0x4e1   :  { %2854 = vmatpush1.bf16.msra.mxu0 %v2619_v35  ;;  %3018 = vmatpush1.bf16.msra.mxu1 %v2621_v11  ;;  %v2651_v35 = vunpack.c.h.s8.bf16 %v2483_v52  ;;  %v2653_v11 = vunpack.c.h.s8.bf16 %v2485_v12 }
 0x4e2   :  { %2855 = vmatprep.subr.bf16.mxu0 %v2624_v44  ;;  %3019 = vmatprep.subr.bf16.mxu1 %v2626_v63  ;;  %v2656_v44 = vunpack.c.l.s8.bf16 %v2488_v48  ;;  %v2658_v63 = vunpack.c.l.s8.bf16 %v2490_v61 }
 0x4e5   :  { %2856 = vmatpush1.bf16.msra.mxu0 %v2623_v4  ;;  %3020 = vmatpush1.bf16.msra.mxu1 %v2625_v27  ;;  %v2655_v4 = vunpack.c.l.s8.bf16 %v2487_v51  ;;  %v2657_v27 = vunpack.c.l.s8.bf16 %v2489_v32 }
 0x4e6   :  { %2857 = vmatprep.subr.bf16.mxu0 %v2628_v6  ;;  %3021 = vmatprep.subr.bf16.mxu1 %v2630_v34  ;;  %v2660_v6 = vunpack.c.h.s8.bf16 %v2488_v48  ;;  %v2662_v34 = vunpack.c.h.s8.bf16 %v2490_v61 }
 0x4e9   :  { %2858 = vmatpush1.bf16.msra.mxu0 %v2627_v10  ;;  %3022 = vmatpush1.bf16.msra.mxu1 %v2629_v24  ;;  %v2659_v10 = vunpack.c.h.s8.bf16 %v2487_v51  ;;  %v2661_v24 = vunpack.c.h.s8.bf16 %v2489_v32 }
 0x4ea   :  { %2859 = vmatprep.subr.bf16.mxu0 %v2632_v41  ;;  %3023 = vmatprep.subr.bf16.mxu1 %v2634_v22  ;;  %v2664_v41 = vunpack.c.l.s8.bf16 %v2492_v9  ;;  %v2666_v22 = vunpack.c.l.s8.bf16 %v2494_v54 }
 0x4ed   :  { %2860 = vmatpush1.bf16.msra.mxu0 %v2631_v39  ;;  %3024 = vmatpush1.bf16.msra.mxu1 %v2633_v15  ;;  %v2663_v39 = vunpack.c.l.s8.bf16 %v2491_v40  ;;  %v2665_v15 = vunpack.c.l.s8.bf16 %v2493_v46 }
 0x4ee   :  { %2861 = vmatprep.subr.bf16.mxu0 %v2636_v2  ;;  %3025 = vmatprep.subr.bf16.mxu1 %v2638_v31  ;;  %v2668_v2 = vunpack.c.h.s8.bf16 %v2492_v9  ;;  %v2670_v31 = vunpack.c.h.s8.bf16 %v2494_v54 }
 0x4f1   :  { %2862 = vmatpush1.bf16.msra.mxu0 %v2635_v30  ;;  %3026 = vmatpush1.bf16.msra.mxu1 %v2637_v17  ;;  %v2667_v30 = vunpack.c.h.s8.bf16 %v2491_v40  ;;  %v2669_v17 = vunpack.c.h.s8.bf16 %v2493_v46 }
 0x4f2   :  { %2872 = vmatprep.subr.bf16.mxu0 %v2640_v60  ;;  %3036 = vmatprep.subr.bf16.mxu1 %v2642_v14  ;;  %v2672_v60 = vunpack.c.l.s8.bf16 %v2496_v20  ;;  %v2674_v14 = vunpack.c.l.s8.bf16 %v2498_v26 }
 0x4f4   :  { %2864 = vmatmul.mubr.bf16.vlgmr.msra.gmra.mrb[8].mxu0 %v2439_v43  ;;  %3028 = vmatmul.mubr.bf16.vlgmr.msra.gmra.mrb[8].mxu1 %v2439_v43  ;;  %v2671_v43 = vunpack.c.l.s8.bf16 %v2495_v8  ;;  %v2441_v8 = vpack.c.bf16 %v2429_v59, %v2429_v59 }
 0x4f5   :  { %2873 = vmatpush1.bf16.msra.mxu0 %v2639_v19  ;;  %3037 = vmatpush1.bf16.msra.mxu1 %v2641_v16  ;;  %v2673_v19 = vunpack.c.l.s8.bf16 %v2497_v0  ;;  %v2676_v16 = vunpack.c.h.s8.bf16 %v2496_v20 }
 0x4f6   :  { %2874 = vmatprep.subr.bf16.mxu0 %v2644_v29  ;;  %3038 = vmatprep.subr.bf16.mxu1 %v2646_v42  ;;  %v2678_v29 = vunpack.c.h.s8.bf16 %v2498_v26  ;;  %v2500_v42 = vld [vmem:[#allocation4 + $0x1a8] sm:$0xff] }
 0x4f7   :  { %2904 = vmatprep.mubr.bf16.mxu0 %v2442_v18  ;;  %3068 = vmatprep.mubr.bf16.mxu1 %v2442_v18  ;;  %v2677_v18 = vunpack.c.h.s8.bf16 %v2497_v0 }
 0x4f9   :  { %2875 = vmatpush1.bf16.msra.mxu0 %v2643_v37  ;;  %3039 = vmatpush1.bf16.msra.mxu1 %v2645_v53  ;;  %v2680_v37 = vunpack.c.l.s8.bf16 %v2500_v42  ;;  %v2682_v53 = vunpack.c.l.s8.bf16 %v2502_v38 }
 0x4fa   :  { %2876 = vmatprep.subr.bf16.mxu0 %v2648_v57  ;;  %3040 = vmatprep.subr.bf16.mxu1 %v2650_v36  ;;  %v2499_v57 = vld [vmem:[#allocation4 + $0x1a0] sm:$0xff]  ;;  %v2501_v36 = vld [vmem:[#allocation4 + $0x1b0] sm:$0xff] }
 0x4fb   :  { %v2679_v52 = vunpack.c.l.s8.bf16 %v2499_v57  ;;  %v2681_v12 = vunpack.c.l.s8.bf16 %v2501_v36  ;;  %v2683_v48 = vunpack.c.h.s8.bf16 %v2499_v57  ;;  %v2685_v61 = vunpack.c.h.s8.bf16 %v2501_v36 }
 0x4fd   :  { %2877 = vmatpush1.bf16.msra.mxu0 %v2647_v5  ;;  %3041 = vmatpush1.bf16.msra.mxu1 %v2649_v56  ;;  %v2684_v5 = vunpack.c.h.s8.bf16 %v2500_v42  ;;  %v2686_v56 = vunpack.c.h.s8.bf16 %v2502_v38  ;;  %v2518_v42 = vld [vmem:[#allocation4 + $0x238] sm:$0xff]  ;;  %v2444_v38 = vpack.c.bf16 %v2432_v23, %v2432_v23 }
 0x4fe   :  { %2878 = vmatprep.subr.bf16.mxu0 %v2652_v58  ;;  %3042 = vmatprep.subr.bf16.mxu1 %v2654_v21  ;;  %v2504_v58 = vld [vmem:[#allocation4 + $0x1c8] sm:$0xff]  ;;  %v2506_v21 = vld [vmem:[#allocation4 + $0x1d8] sm:$0xff]  ;;  %v2718_v36 = vunpack.c.h.s8.bf16 %v2518_v42 }
 0x501   :  { %2879 = vmatpush1.bf16.msra.mxu0 %v2651_v35  ;;  %3043 = vmatpush1.bf16.msra.mxu1 %v2653_v11  ;;  %v2688_v35 = vunpack.c.l.s8.bf16 %v2504_v58  ;;  %v2690_v11 = vunpack.c.l.s8.bf16 %v2506_v21 }
 0x502   :  { %2880 = vmatprep.subr.bf16.mxu0 %v2656_v44  ;;  %3044 = vmatprep.subr.bf16.mxu1 %v2658_v63  ;;  %v2503_v44 = vld [vmem:[#allocation4 + $0x1c0] sm:$0xff]  ;;  %v2505_v63 = vld [vmem:[#allocation4 + $0x1d0] sm:$0xff] }
 0x503   :  { %v2687_v51 = vunpack.c.l.s8.bf16 %v2503_v44  ;;  %v2689_v32 = vunpack.c.l.s8.bf16 %v2505_v63  ;;  %v2691_v9 = vunpack.c.h.s8.bf16 %v2503_v44  ;;  %v2693_v54 = vunpack.c.h.s8.bf16 %v2505_v63 }
 0x505   :  { %2881 = vmatpush1.bf16.msra.mxu0 %v2655_v4  ;;  %3045 = vmatpush1.bf16.msra.mxu1 %v2657_v27  ;;  %v2692_v4 = vunpack.c.h.s8.bf16 %v2504_v58  ;;  %v2694_v27 = vunpack.c.h.s8.bf16 %v2506_v21 }
 0x506   :  { %2882 = vmatprep.subr.bf16.mxu0 %v2660_v6  ;;  %3046 = vmatprep.subr.bf16.mxu1 %v2662_v34  ;;  %v2508_v6 = vld [vmem:[#allocation4 + $0x1e8] sm:$0xff]  ;;  %v2510_v34 = vld [vmem:[#allocation4 + $0x1f8] sm:$0xff] }
 0x509   :  { %2883 = vmatpush1.bf16.msra.mxu0 %v2659_v10  ;;  %3047 = vmatpush1.bf16.msra.mxu1 %v2661_v24  ;;  %v2696_v10 = vunpack.c.l.s8.bf16 %v2508_v6  ;;  %v2698_v24 = vunpack.c.l.s8.bf16 %v2510_v34 }
 0x50a   :  { %2884 = vmatprep.subr.bf16.mxu0 %v2664_v41  ;;  %3048 = vmatprep.subr.bf16.mxu1 %v2666_v22  ;;  %v2507_v41 = vld [vmem:[#allocation4 + $0x1e0] sm:$0xff]  ;;  %v2509_v22 = vld [vmem:[#allocation4 + $0x1f0] sm:$0xff] }
 0x50b   :  { %v2695_v40 = vunpack.c.l.s8.bf16 %v2507_v41  ;;  %v2697_v46 = vunpack.c.l.s8.bf16 %v2509_v22  ;;  %v2699_v20 = vunpack.c.h.s8.bf16 %v2507_v41  ;;  %v2701_v26 = vunpack.c.h.s8.bf16 %v2509_v22 }
 0x50d   :  { %2885 = vmatpush1.bf16.msra.mxu0 %v2663_v39  ;;  %3049 = vmatpush1.bf16.msra.mxu1 %v2665_v15  ;;  %v2700_v39 = vunpack.c.h.s8.bf16 %v2508_v6  ;;  %v2702_v15 = vunpack.c.h.s8.bf16 %v2510_v34 }
 0x50e   :  { %2886 = vmatprep.subr.bf16.mxu0 %v2668_v2  ;;  %3050 = vmatprep.subr.bf16.mxu1 %v2670_v31  ;;  %v2512_v2 = vld [vmem:[#allocation4 + $0x208] sm:$0xff]  ;;  %v2514_v31 = vld [vmem:[#allocation4 + $0x218] sm:$0xff] }
 0x511   :  { %2887 = vmatpush1.bf16.msra.mxu0 %v2667_v30  ;;  %3051 = vmatpush1.bf16.msra.mxu1 %v2669_v17  ;;  %v2704_v30 = vunpack.c.l.s8.bf16 %v2512_v2  ;;  %v2706_v17 = vunpack.c.l.s8.bf16 %v2514_v31 }
 0x512   :  { %2888 = vmatprep.subr.bf16.mxu0 %v2672_v60  ;;  %3052 = vmatprep.subr.bf16.mxu1 %v2674_v14  ;;  %v2511_v60 = vld [vmem:[#allocation4 + $0x200] sm:$0xff]  ;;  %v2513_v14 = vld [vmem:[#allocation4 + $0x210] sm:$0xff] }
 0x513   :  { %v2703_v0 = vunpack.c.l.s8.bf16 %v2511_v60  ;;  %v2707_v1 = vunpack.c.h.s8.bf16 %v2511_v60  ;;  %v2709_v59 = vunpack.c.h.s8.bf16 %v2513_v14 }
 0x515   :  { %2889 = vmatpush1.bf16.msra.mxu0 %v2671_v43  ;;  %3053 = vmatpush1.bf16.msra.mxu1 %v2673_v19  ;;  %v2705_v43 = vunpack.c.l.s8.bf16 %v2513_v14  ;;  %v2708_v19 = vunpack.c.h.s8.bf16 %v2512_v2 }
 0x516   :  { %2890 = vmatprep.subr.bf16.mxu0 %v2676_v16  ;;  %3054 = vmatprep.subr.bf16.mxu1 %v2678_v29  ;;  %v2710_v16 = vunpack.c.h.s8.bf16 %v2514_v31  ;;  %v2516_v29 = vld [vmem:[#allocation4 + $0x228] sm:$0xff] }
 0x517   :  { %v2716_v23 = vunpack.c.h.s8.bf16 %v2516_v29 }
 0x519   :  { %2891 = vmatpush1.bf16.msra.mxu0 %v2675_v28  ;;  %3055 = vmatpush1.bf16.msra.mxu1 %v2677_v18  ;;  %v2712_v28 = vunpack.c.l.s8.bf16 %v2516_v29  ;;  %v2714_v18 = vunpack.c.l.s8.bf16 %v2518_v42  ;;  %v2531_v42 = vld [vmem:[#allocation4 + $0x2a0] sm:$0xff] }
 0x51a   :  { %2892 = vmatprep.subr.bf16.mxu0 %v2680_v37  ;;  %3056 = vmatprep.subr.bf16.mxu1 %v2682_v53  ;;  %v2515_v37 = vld [vmem:[#allocation4 + $0x220] sm:$0xff]  ;;  %v2517_v53 = vld [vmem:[#allocation4 + $0x230] sm:$0xff] }
 0x51b   :  { %v2711_v57 = vunpack.c.l.s8.bf16 %v2515_v37  ;;  %v2713_v49 = vunpack.c.l.s8.bf16 %v2517_v53 }
 0x51d   :  { %2893 = vmatpush1.bf16.msra.mxu0 %v2679_v52  ;;  %3057 = vmatpush1.bf16.msra.mxu1 %v2681_v12  ;;  %v2520_v52 = vld [vmem:[#allocation4 + $0x248] sm:$0xff]  ;;  %v2522_v12 = vld [vmem:[#allocation4 + $0x258] sm:$0xff] }
 0x51e   :  { %2894 = vmatprep.subr.bf16.mxu0 %v2684_v5  ;;  %3058 = vmatprep.subr.bf16.mxu1 %v2686_v56  ;;  %v2715_v5 = vunpack.c.h.s8.bf16 %v2515_v37  ;;  %v2717_v56 = vunpack.c.h.s8.bf16 %v2517_v53  ;;  %v2720_v58 = vunpack.c.l.s8.bf16 %v2520_v52  ;;  %v2722_v21 = vunpack.c.l.s8.bf16 %v2522_v12  ;;  %v2536_v37 = vld [vmem:[#allocation4 + $0x2c8] sm:$0xff]  ;;  %v2538_v53 = vld [vmem:[#allocation4 + $0x2d8] sm:$0xff] }
 0x51f   :  { %v2724_v44 = vunpack.c.h.s8.bf16 %v2520_v52  ;;  %v2726_v63 = vunpack.c.h.s8.bf16 %v2522_v12  ;;  %v2535_v52 = vld [vmem:[#allocation4 + $0x2c0] sm:$0xff]  ;;  %v2537_v12 = vld [vmem:[#allocation4 + $0x2d0] sm:$0xff] }
 0x521   :  { %2895 = vmatpush1.bf16.msra.mxu0 %v2683_v48  ;;  %3059 = vmatpush1.bf16.msra.mxu1 %v2685_v61  ;;  %v2519_v48 = vld [vmem:[#allocation4 + $0x240] sm:$0xff]  ;;  %v2521_v61 = vld [vmem:[#allocation4 + $0x250] sm:$0xff] }
 0x522   :  { %2896 = vmatprep.subr.bf16.mxu0 %v2688_v35  ;;  %3060 = vmatprep.subr.bf16.mxu1 %v2690_v11  ;;  %v2719_v35 = vunpack.c.l.s8.bf16 %v2519_v48  ;;  %v2721_v11 = vunpack.c.l.s8.bf16 %v2521_v61 }
 0x525   :  { %2897 = vmatpush1.bf16.msra.mxu0 %v2687_v51  ;;  %3061 = vmatpush1.bf16.msra.mxu1 %v2689_v32  ;;  %v2524_v51 = vld [vmem:[#allocation4 + $0x268] sm:$0xff]  ;;  %v2526_v32 = vld [vmem:[#allocation4 + $0x278] sm:$0xff] }
 0x526   :  { %2898 = vmatprep.subr.bf16.mxu0 %v2692_v4  ;;  %3062 = vmatprep.subr.bf16.mxu1 %v2694_v27  ;;  %v2723_v4 = vunpack.c.h.s8.bf16 %v2519_v48  ;;  %v2725_v27 = vunpack.c.h.s8.bf16 %v2521_v61  ;;  %v2728_v6 = vunpack.c.l.s8.bf16 %v2524_v51  ;;  %v2730_v34 = vunpack.c.l.s8.bf16 %v2526_v32  ;;  %v2540_v48 = vld [vmem:[#allocation4 + $0x2e8] sm:$0xff]  ;;  %v2542_v61 = vld [vmem:[#allocation4 + $0x2f8] sm:$0xff] }
 0x527   :  { %v2732_v41 = vunpack.c.h.s8.bf16 %v2524_v51  ;;  %v2734_v22 = vunpack.c.h.s8.bf16 %v2526_v32  ;;  %v2539_v51 = vld [vmem:[#allocation4 + $0x2e0] sm:$0xff]  ;;  %v2541_v32 = vld [vmem:[#allocation4 + $0x2f0] sm:$0xff] }
 0x529   :  { %2899 = vmatpush1.bf16.msra.mxu0 %v2691_v9  ;;  %3063 = vmatpush1.bf16.msra.mxu1 %v2693_v54  ;;  %v2523_v9 = vld [vmem:[#allocation4 + $0x260] sm:$0xff]  ;;  %v2525_v54 = vld [vmem:[#allocation4 + $0x270] sm:$0xff] }
 0x52a   :  { %2900 = vmatprep.subr.bf16.mxu0 %v2696_v10  ;;  %3064 = vmatprep.subr.bf16.mxu1 %v2698_v24  ;;  %v2727_v10 = vunpack.c.l.s8.bf16 %v2523_v9  ;;  %v2729_v24 = vunpack.c.l.s8.bf16 %v2525_v54 }
 0x52d   :  { %2901 = vmatpush1.bf16.msra.mxu0 %v2695_v40  ;;  %3065 = vmatpush1.bf16.msra.mxu1 %v2697_v46  ;;  %v2528_v40 = vld [vmem:[#allocation4 + $0x288] sm:$0xff]  ;;  %v2530_v46 = vld [vmem:[#allocation4 + $0x298] sm:$0xff] }
 0x52e   :  { %2902 = vmatprep.subr.bf16.mxu0 %v2700_v39  ;;  %3066 = vmatprep.subr.bf16.mxu1 %v2702_v15  ;;  %v2731_v39 = vunpack.c.h.s8.bf16 %v2523_v9  ;;  %v2733_v15 = vunpack.c.h.s8.bf16 %v2525_v54  ;;  %v2736_v2 = vunpack.c.l.s8.bf16 %v2528_v40  ;;  %v2738_v31 = vunpack.c.l.s8.bf16 %v2530_v46  ;;  %v2544_v9 = vld [vmem:[#allocation4 + $0x308] sm:$0xff]  ;;  %v2546_v54 = vld [vmem:[#allocation4 + $0x318] sm:$0xff] }
 0x52f   :  { %v2740_v60 = vunpack.c.h.s8.bf16 %v2528_v40  ;;  %v2742_v14 = vunpack.c.h.s8.bf16 %v2530_v46  ;;  %v2543_v40 = vld [vmem:[#allocation4 + $0x300] sm:$0xff]  ;;  %v2545_v46 = vld [vmem:[#allocation4 + $0x310] sm:$0xff] }
 0x530   :  { %v2771_v62 = vunpack.c.h.s8.bf16 %v2543_v40 }
 0x531   :  { %2903 = vmatpush1.bf16.msra.mxu0 %v2699_v20  ;;  %3067 = vmatpush1.bf16.msra.mxu1 %v2701_v26  ;;  %v2527_v20 = vld [vmem:[#allocation4 + $0x280] sm:$0xff]  ;;  %v2529_v26 = vld [vmem:[#allocation4 + $0x290] sm:$0xff] }
 0x532   :  { %2913 = vmatprep.subr.bf16.mxu0 %v2704_v30  ;;  %3077 = vmatprep.subr.bf16.mxu1 %v2706_v17  ;;  %v2735_v30 = vunpack.c.l.s8.bf16 %v2527_v20  ;;  %v2737_v17 = vunpack.c.l.s8.bf16 %v2529_v26 }
 0x534   :  { %2905 = vmatmul.mubr.bf16.vlgmr.msra.gmra.mrb[8].mxu0 %v2441_v8  ;;  %3069 = vmatmul.mubr.bf16.vlgmr.msra.gmra.mrb[8].mxu1 %v2441_v8  ;;  %v2532_v8 = vld [vmem:[#allocation4 + $0x2a8] sm:$0xff] }
 0x535   :  { %2914 = vmatpush1.bf16.msra.mxu0 %v2703_v0  ;;  %3078 = vmatpush1.bf16.msra.mxu1 %v2705_v43  ;;  %v2534_v0 = vld [vmem:[#allocation4 + $0x2b8] sm:$0xff]  ;;  %v2739_v43 = vunpack.c.h.s8.bf16 %v2527_v20  ;;  %v2774_v20 = vunpack.c.h.s8.bf16 %v2546_v54 }
 0x536   :  { %2915 = vmatprep.subr.bf16.mxu0 %v2708_v19  ;;  %3079 = vmatprep.subr.bf16.mxu1 %v2710_v16  ;;  %v2741_v19 = vunpack.c.h.s8.bf16 %v2529_v26  ;;  %v2744_v16 = vunpack.c.l.s8.bf16 %v2532_v8  ;;  %v2746_v29 = vunpack.c.l.s8.bf16 %v2534_v0  ;;  %v2548_v26 = vld [vmem:[#allocation4 + $0x328] sm:$0xff] }
 0x537   :  { %2945 = vmatprep.mubr.bf16.mxu0 %v2444_v38  ;;  %3109 = vmatprep.mubr.bf16.mxu1 %v2444_v38  ;;  %v2533_v38 = vld [vmem:[#allocation4 + $0x2b0] sm:$0xff] }
 0x539   :  { %2916 = vmatpush1.bf16.msra.mxu0 %v2707_v1  ;;  %3080 = vmatpush1.bf16.msra.mxu1 %v2709_v59  ;;  %v2743_v1 = vunpack.c.l.s8.bf16 %v2531_v42  ;;  %v2745_v59 = vunpack.c.l.s8.bf16 %v2533_v38 }
 0x53a   :  { %2917 = vmatprep.subr.bf16.mxu0 %v2712_v28  ;;  %3081 = vmatprep.subr.bf16.mxu1 %v2714_v18  ;;  %v2748_v28 = vunpack.c.h.s8.bf16 %v2532_v8  ;;  %v2750_v18 = vunpack.c.h.s8.bf16 %v2534_v0  ;;  %v2547_v8 = vld [vmem:[#allocation4 + $0x320] sm:$0xff]  ;;  %v2549_v0 = vld [vmem:[#allocation4 + $0x330] sm:$0xff] }
 0x53b   :  { %v2777_v47 = vunpack.c.l.s8.bf16 %v2549_v0 }
 0x53d   :  { %2918 = vmatpush1.bf16.msra.mxu0 %v2711_v57  ;;  %3082 = vmatpush1.bf16.msra.mxu1 %v2713_v49  ;;  %v2747_v57 = vunpack.c.h.s8.bf16 %v2531_v42  ;;  %v2749_v49 = vunpack.c.h.s8.bf16 %v2533_v38  ;;  %v2779_v42 = vunpack.c.h.s8.bf16 %v2547_v8  ;;  %v2781_v38 = vunpack.c.h.s8.bf16 %v2549_v0 }
 0x53e   :  { %2919 = vmatprep.subr.bf16.mxu0 %v2716_v23  ;;  %3083 = vmatprep.subr.bf16.mxu1 %v2718_v36  ;;  %v2752_v23 = vunpack.c.l.s8.bf16 %v2536_v37  ;;  %v2754_v36 = vunpack.c.l.s8.bf16 %v2538_v53 }
 0x541   :  { %2920 = vmatpush1.bf16.msra.mxu0 %v2715_v5  ;;  %3084 = vmatpush1.bf16.msra.mxu1 %v2717_v56  ;;  %v2751_v5 = vunpack.c.l.s8.bf16 %v2535_v52  ;;  %v2753_v56 = vunpack.c.l.s8.bf16 %v2537_v12 }
 0x542   :  { %2921 = vmatprep.subr.bf16.mxu0 %v2720_v58  ;;  %3085 = vmatprep.subr.bf16.mxu1 %v2722_v21  ;;  %v2756_v58 = vunpack.c.h.s8.bf16 %v2536_v37  ;;  %v2758_v21 = vunpack.c.h.s8.bf16 %v2538_v53 }
 0x545   :  { %2922 = vmatpush1.bf16.msra.mxu0 %v2719_v35  ;;  %3086 = vmatpush1.bf16.msra.mxu1 %v2721_v11  ;;  %v2755_v35 = vunpack.c.h.s8.bf16 %v2535_v52  ;;  %v2757_v11 = vunpack.c.h.s8.bf16 %v2537_v12 }
 0x546   :  { %2923 = vmatprep.subr.bf16.mxu0 %v2724_v44  ;;  %3087 = vmatprep.subr.bf16.mxu1 %v2726_v63  ;;  %v2760_v44 = vunpack.c.l.s8.bf16 %v2540_v48  ;;  %v2762_v63 = vunpack.c.l.s8.bf16 %v2542_v61 }
 0x549   :  { %2924 = vmatpush1.bf16.msra.mxu0 %v2723_v4  ;;  %3088 = vmatpush1.bf16.msra.mxu1 %v2725_v27  ;;  %v2759_v4 = vunpack.c.l.s8.bf16 %v2539_v51  ;;  %v2761_v27 = vunpack.c.l.s8.bf16 %v2541_v32 }
 0x54a   :  { %2925 = vmatprep.subr.bf16.mxu0 %v2728_v6  ;;  %3089 = vmatprep.subr.bf16.mxu1 %v2730_v34  ;;  %v2764_v6 = vunpack.c.h.s8.bf16 %v2540_v48  ;;  %v2766_v34 = vunpack.c.h.s8.bf16 %v2542_v61 }
 0x54d   :  { %2926 = vmatpush1.bf16.msra.mxu0 %v2727_v10  ;;  %3090 = vmatpush1.bf16.msra.mxu1 %v2729_v24  ;;  %v2763_v10 = vunpack.c.h.s8.bf16 %v2539_v51  ;;  %v2765_v24 = vunpack.c.h.s8.bf16 %v2541_v32 }
 0x54e   :  { %2927 = vmatprep.subr.bf16.mxu0 %v2732_v41  ;;  %3091 = vmatprep.subr.bf16.mxu1 %v2734_v22  ;;  %v2768_v41 = vunpack.c.l.s8.bf16 %v2544_v9  ;;  %v2770_v22 = vunpack.c.l.s8.bf16 %v2546_v54 }
 0x551   :  { %2928 = vmatpush1.bf16.msra.mxu0 %v2731_v39  ;;  %3092 = vmatpush1.bf16.msra.mxu1 %v2733_v15  ;;  %v2443_v39 = vpack.c.bf16 %v2431_v7, %v2431_v7  ;;  %v2767_v15 = vunpack.c.l.s8.bf16 %v2543_v40  ;;  %v2773_v7 = vunpack.c.h.s8.bf16 %v2545_v46 }
 0x552   :  { %2929 = vmatprep.subr.bf16.mxu0 %v2736_v2  ;;  %3093 = vmatprep.subr.bf16.mxu1 %v2738_v31  ;;  %v2769_v2 = vunpack.c.l.s8.bf16 %v2545_v46  ;;  %v2772_v31 = vunpack.c.h.s8.bf16 %v2544_v9 }
 0x555   :  { %2930 = vmatpush1.bf16.msra.mxu0 %v2735_v30  ;;  %3094 = vmatpush1.bf16.msra.mxu1 %v2737_v17  ;;  %v2550_v30 = vld [vmem:[#allocation4 + $0x338] sm:$0xff]  ;;  %v2446_v17 = vpack.c.bf16 %v2434_v25, %v2434_v25  ;;  %v2780_v25 = vunpack.c.h.s8.bf16 %v2548_v26 }
 0x556   :  { %2931 = vmatprep.subr.bf16.mxu0 %v2740_v60  ;;  %3095 = vmatprep.subr.bf16.mxu1 %v2742_v14  ;;  %v2776_v60 = vunpack.c.l.s8.bf16 %v2548_v26  ;;  %v2778_v14 = vunpack.c.l.s8.bf16 %v2550_v30 }
 0x559   :  { %2932 = vmatpush1.bf16.msra.mxu0 %v2739_v43  ;;  %3096 = vmatpush1.bf16.msra.mxu1 %v2741_v19  ;;  %v2775_v43 = vunpack.c.l.s8.bf16 %v2547_v8  ;;  %v2782_v19 = vunpack.c.h.s8.bf16 %v2550_v30 }
 0x55a   :  { %2933 = vmatprep.subr.bf16.mxu0 %v2744_v16  ;;  %3097 = vmatprep.subr.bf16.mxu1 %v2746_v29  ;;  %v2552_v16 = vld [vmem:[#allocation4 + $0x348] sm:$0xff]  ;;  %v2554_v29 = vld [vmem:[#allocation4 + $0x358] sm:$0xff] }
 0x55d   :  { %2934 = vmatpush1.bf16.msra.mxu0 %v2743_v1  ;;  %3098 = vmatpush1.bf16.msra.mxu1 %v2745_v59  ;;  %v2784_v1 = vunpack.c.l.s8.bf16 %v2552_v16  ;;  %v2786_v59 = vunpack.c.l.s8.bf16 %v2554_v29 }
 0x55e   :  { %2935 = vmatprep.subr.bf16.mxu0 %v2748_v28  ;;  %3099 = vmatprep.subr.bf16.mxu1 %v2750_v18  ;;  %v2551_v28 = vld [vmem:[#allocation4 + $0x340] sm:$0xff]  ;;  %v2553_v18 = vld [vmem:[#allocation4 + $0x350] sm:$0xff] }
 0x55f   :  { %v2783_v37 = vunpack.c.l.s8.bf16 %v2551_v28  ;;  %v2785_v53 = vunpack.c.l.s8.bf16 %v2553_v18  ;;  %v2787_v52 = vunpack.c.h.s8.bf16 %v2551_v28  ;;  %v2789_v12 = vunpack.c.h.s8.bf16 %v2553_v18 }
 0x561   :  { %2936 = vmatpush1.bf16.msra.mxu0 %v2747_v57  ;;  %3100 = vmatpush1.bf16.msra.mxu1 %v2749_v49  ;;  %v2788_v57 = vunpack.c.h.s8.bf16 %v2552_v16  ;;  %v2790_v49 = vunpack.c.h.s8.bf16 %v2554_v29 }
 0x562   :  { %2937 = vmatprep.subr.bf16.mxu0 %v2752_v23  ;;  %3101 = vmatprep.subr.bf16.mxu1 %v2754_v36  ;;  %v2556_v23 = vld [vmem:[#allocation4 + $0x368] sm:$0xff]  ;;  %v2558_v36 = vld [vmem:[#allocation4 + $0x378] sm:$0xff] }
 0x565   :  { %2938 = vmatpush1.bf16.msra.mxu0 %v2751_v5  ;;  %3102 = vmatpush1.bf16.msra.mxu1 %v2753_v56  ;;  %v2792_v5 = vunpack.c.l.s8.bf16 %v2556_v23  ;;  %v2794_v56 = vunpack.c.l.s8.bf16 %v2558_v36 }
 0x566   :  { %2939 = vmatprep.subr.bf16.mxu0 %v2756_v58  ;;  %3103 = vmatprep.subr.bf16.mxu1 %v2758_v21  ;;  %v2555_v58 = vld [vmem:[#allocation4 + $0x360] sm:$0xff]  ;;  %v2557_v21 = vld [vmem:[#allocation4 + $0x370] sm:$0xff] }
 0x567   :  { %v2791_v48 = vunpack.c.l.s8.bf16 %v2555_v58  ;;  %v2793_v61 = vunpack.c.l.s8.bf16 %v2557_v21  ;;  %v2795_v51 = vunpack.c.h.s8.bf16 %v2555_v58  ;;  %v2797_v32 = vunpack.c.h.s8.bf16 %v2557_v21  ;;  %v3187_v58 = vld [vmem:[#allocation12 + $0x10] ss:$2 sm:$0xf] }
 0x568   :  { %v3200_v45 = vrot.slane %v3187_v58, %v5870_v3 }
 0x569   :  { %2940 = vmatpush1.bf16.msra.mxu0 %v2755_v35  ;;  %3104 = vmatpush1.bf16.msra.mxu1 %v2757_v11  ;;  %v2796_v35 = vunpack.c.h.s8.bf16 %v2556_v23  ;;  %v2798_v11 = vunpack.c.h.s8.bf16 %v2558_v36 }
 0x56a   :  { %2941 = vmatprep.subr.bf16.mxu0 %v2760_v44  ;;  %3105 = vmatprep.subr.bf16.mxu1 %v2762_v63  ;;  %v2560_v44 = vld [vmem:[#allocation4 + $0x388] sm:$0xff]  ;;  %v2562_v63 = vld [vmem:[#allocation4 + $0x398] sm:$0xff] }
 0x56d   :  { %2942 = vmatpush1.bf16.msra.mxu0 %v2759_v4  ;;  %3106 = vmatpush1.bf16.msra.mxu1 %v2761_v27  ;;  %v2800_v4 = vunpack.c.l.s8.bf16 %v2560_v44  ;;  %v2802_v27 = vunpack.c.l.s8.bf16 %v2562_v63 }
 0x56e   :  { %2943 = vmatprep.subr.bf16.mxu0 %v2764_v6  ;;  %3107 = vmatprep.subr.bf16.mxu1 %v2766_v34  ;;  %v2559_v6 = vld [vmem:[#allocation4 + $0x380] sm:$0xff]  ;;  %v2561_v34 = vld [vmem:[#allocation4 + $0x390] sm:$0xff] }
 0x56f   :  { %v2799_v9 = vunpack.c.l.s8.bf16 %v2559_v6  ;;  %v2801_v54 = vunpack.c.l.s8.bf16 %v2561_v34  ;;  %v2803_v40 = vunpack.c.h.s8.bf16 %v2559_v6  ;;  %v2805_v46 = vunpack.c.h.s8.bf16 %v2561_v34 }
 0x571   :  { %2944 = vmatpush1.bf16.msra.mxu0 %v2763_v10  ;;  %3108 = vmatpush1.bf16.msra.mxu1 %v2765_v24  ;;  %v2804_v10 = vunpack.c.h.s8.bf16 %v2560_v44  ;;  %v2806_v24 = vunpack.c.h.s8.bf16 %v2562_v63  ;;  %v3196_v63 = vrot.slane %v3187_v58, %v5873_v50 }
 0x572   :  { %2954 = vmatprep.subr.bf16.mxu0 %v2768_v41  ;;  %3118 = vmatprep.subr.bf16.mxu1 %v2770_v22  ;;  %v2564_v41 = vld [vmem:[#allocation4 + $0x3a8] sm:$0xff]  ;;  %v2566_v22 = vld [vmem:[#allocation4 + $0x3b8] sm:$0xff] }
 0x573   :  { %v2812_v30 = vunpack.c.h.s8.bf16 %v2564_v41 }
 0x574   :  { %2946 = vmatmul.mubr.bf16.vlgmr.msra.gmra.mrb[8].mxu0 %v2443_v39  ;;  %3110 = vmatmul.mubr.bf16.vlgmr.msra.gmra.mrb[8].mxu1 %v2443_v39  ;;  %v2808_v39 = vunpack.c.l.s8.bf16 %v2564_v41 }
 0x575   :  { %2955 = vmatpush1.bf16.msra.mxu0 %v2767_v15  ;;  %3119 = vmatpush1.bf16.msra.mxu1 %v2769_v2  ;;  %v2810_v15 = vunpack.c.l.s8.bf16 %v2566_v22  ;;  %v2563_v2 = vld [vmem:[#allocation4 + $0x3a0] sm:$0xff] }
 0x576   :  { %2956 = vmatprep.subr.bf16.mxu0 %v2772_v31  ;;  %3120 = vmatprep.subr.bf16.mxu1 %v2774_v20  ;;  %v2565_v31 = vld [vmem:[#allocation4 + $0x3b0] sm:$0xff]  ;;  %v2807_v20 = vunpack.c.l.s8.bf16 %v2563_v2 }
 0x577   :  { %2986 = vmatprep.mubr.bf16.mxu0 %v2446_v17  ;;  %3150 = vmatprep.mubr.bf16.mxu1 %v2446_v17  ;;  %v2809_v26 = vunpack.c.l.s8.bf16 %v2565_v31  ;;  %v2814_v17 = vunpack.c.h.s8.bf16 %v2566_v22 }
 0x579   :  { %2957 = vmatpush1.bf16.msra.mxu0 %v2771_v62  ;;  %3121 = vmatpush1.bf16.msra.mxu1 %v2773_v7  ;;  %v2568_v62 = vld [vmem:[#allocation4 + $0x3c8] sm:$0xff]  ;;  %v2570_v7 = vld [vmem:[#allocation4 + $0x3d8] sm:$0xff] }
 0x57a   :  { %2958 = vmatprep.subr.bf16.mxu0 %v2776_v60  ;;  %3122 = vmatprep.subr.bf16.mxu1 %v2778_v14  ;;  %v2811_v60 = vunpack.c.h.s8.bf16 %v2563_v2  ;;  %v2813_v14 = vunpack.c.h.s8.bf16 %v2565_v31  ;;  %v2816_v8 = vunpack.c.l.s8.bf16 %v2568_v62  ;;  %v2818_v0 = vunpack.c.l.s8.bf16 %v2570_v7 }
 0x57b   :  { %v2820_v16 = vunpack.c.h.s8.bf16 %v2568_v62  ;;  %v2822_v29 = vunpack.c.h.s8.bf16 %v2570_v7 }
 0x57d   :  { %2959 = vmatpush1.bf16.msra.mxu0 %v2775_v43  ;;  %3123 = vmatpush1.bf16.msra.mxu1 %v2777_v47  ;;  %v2567_v43 = vld [vmem:[#allocation4 + $0x3c0] sm:$0xff]  ;;  %v2569_v47 = vld [vmem:[#allocation4 + $0x3d0] sm:$0xff] }
 0x57e   :  { %2960 = vmatprep.subr.bf16.mxu0 %v2780_v25  ;;  %3124 = vmatprep.subr.bf16.mxu1 %v2782_v19  ;;  %v2815_v25 = vunpack.c.l.s8.bf16 %v2567_v43  ;;  %v2817_v19 = vunpack.c.l.s8.bf16 %v2569_v47 }
 0x581   :  { %2961 = vmatpush1.bf16.msra.mxu0 %v2779_v42  ;;  %3125 = vmatpush1.bf16.msra.mxu1 %v2781_v38  ;;  %v2572_v42 = vld [vmem:[#allocation4 + $0x3e8] sm:$0xff]  ;;  %v2574_v38 = vld [vmem:[#allocation4 + $0x3f8] sm:$0xff] }
 0x582   :  { %2962 = vmatprep.subr.bf16.mxu0 %v2784_v1  ;;  %3126 = vmatprep.subr.bf16.mxu1 %v2786_v59  ;;  %v2819_v1 = vunpack.c.h.s8.bf16 %v2567_v43  ;;  %v2821_v59 = vunpack.c.h.s8.bf16 %v2569_v47  ;;  %v2824_v28 = vunpack.c.l.s8.bf16 %v2572_v42  ;;  %v2826_v18 = vunpack.c.l.s8.bf16 %v2574_v38 }
 0x583   :  { %v2828_v23 = vunpack.c.h.s8.bf16 %v2572_v42  ;;  %v2830_v36 = vunpack.c.h.s8.bf16 %v2574_v38 }
 0x585   :  { %2963 = vmatpush1.bf16.msra.mxu0 %v2783_v37  ;;  %3127 = vmatpush1.bf16.msra.mxu1 %v2785_v53  ;;  %v2571_v37 = vld [vmem:[#allocation4 + $0x3e0] sm:$0xff]  ;;  %v2573_v53 = vld [vmem:[#allocation4 + $0x3f0] sm:$0xff] }
 0x586   :  { %2964 = vmatprep.subr.bf16.mxu0 %v2788_v57  ;;  %3128 = vmatprep.subr.bf16.mxu1 %v2790_v49  ;;  %v2823_v57 = vunpack.c.l.s8.bf16 %v2571_v37  ;;  %v2825_v49 = vunpack.c.l.s8.bf16 %v2573_v53 }
 0x589   :  { %2965 = vmatpush1.bf16.msra.mxu0 %v2787_v52  ;;  %3129 = vmatpush1.bf16.msra.mxu1 %v2789_v12  ;;  %v2827_v52 = vunpack.c.h.s8.bf16 %v2571_v37  ;;  %v2829_v12 = vunpack.c.h.s8.bf16 %v2573_v53 }
 0x58a   :  { %2966 = vmatprep.subr.bf16.mxu0 %v2792_v5  ;;  %3130 = vmatprep.subr.bf16.mxu1 %v2794_v56  ;;  %v2445_v5 = vpack.c.bf16 %v2433_v33, %v2433_v33  ;;  %v3160_v56 = vld [vmem:[#allocation12 + $0x11] ss:$2 sm:$0xf] }
 0x58b   :  { %v3165_v21 = vrot.slane %v3160_v56, %v5867_v55 }
 0x58d   :  { %2967 = vmatpush1.bf16.msra.mxu0 %v2791_v48  ;;  %3131 = vmatpush1.bf16.msra.mxu1 %v2793_v61  ;;  %v3173_v48 = vrot.slane %v3160_v56, %v5870_v3  ;;  %v3169_v61 = vrot.slane %v3160_v56, %v5873_v50 }
 0x58e   :  { %2968 = vmatprep.subr.bf16.mxu0 %v2796_v35  ;;  %3132 = vmatprep.subr.bf16.mxu1 %v2798_v11  ;;  %v3177_v35 = vrot.slane %v3160_v56, %v5876_v13  ;;  %v3192_v11 = vrot.slane %v3187_v58, %v5867_v55 }
 0x591   :  { %2969 = vmatpush1.bf16.msra.mxu0 %v2795_v51  ;;  %3133 = vmatpush1.bf16.msra.mxu1 %v2797_v32  ;;  %v3204_v51 = vrot.slane %v3187_v58, %v5876_v13 }
 0x592   :  { %2970 = vmatprep.subr.bf16.mxu0 %v2800_v4  ;;  %3134 = vmatprep.subr.bf16.mxu1 %v2802_v27 }
 0x595   :  { %2971 = vmatpush1.bf16.msra.mxu0 %v2799_v9  ;;  %3135 = vmatpush1.bf16.msra.mxu1 %v2801_v54 }
 0x596   :  { %2972 = vmatprep.subr.bf16.mxu0 %v2804_v10  ;;  %3136 = vmatprep.subr.bf16.mxu1 %v2806_v24 }
 0x599   :  { %2973 = vmatpush1.bf16.msra.mxu0 %v2803_v40  ;;  %3137 = vmatpush1.bf16.msra.mxu1 %v2805_v46 }
 0x59a   :  { %2974 = vmatprep.subr.bf16.mxu0 %v2808_v39  ;;  %3138 = vmatprep.subr.bf16.mxu1 %v2810_v15 }
 0x59d   :  { %2975 = vmatpush1.bf16.msra.mxu0 %v2807_v20  ;;  %3139 = vmatpush1.bf16.msra.mxu1 %v2809_v26 }
 0x59e   :  { %2976 = vmatprep.subr.bf16.mxu0 %v2812_v30  ;;  %3140 = vmatprep.subr.bf16.mxu1 %v2814_v17 }
 0x5a1   :  { %2977 = vmatpush1.bf16.msra.mxu0 %v2811_v60  ;;  %3141 = vmatpush1.bf16.msra.mxu1 %v2813_v14 }
 0x5a2   :  { %2978 = vmatprep.subr.bf16.mxu0 %v2816_v8  ;;  %3142 = vmatprep.subr.bf16.mxu1 %v2818_v0 }
 0x5a5   :  { %2979 = vmatpush1.bf16.msra.mxu0 %v2815_v25  ;;  %3143 = vmatpush1.bf16.msra.mxu1 %v2817_v19 }
 0x5a6   :  { %2980 = vmatprep.subr.bf16.mxu0 %v2820_v16  ;;  %3144 = vmatprep.subr.bf16.mxu1 %v2822_v29 }
 0x5a9   :  { %2981 = vmatpush1.bf16.msra.mxu0 %v2819_v1  ;;  %3145 = vmatpush1.bf16.msra.mxu1 %v2821_v59 }
 0x5aa   :  { %2982 = vmatprep.subr.bf16.mxu0 %v2824_v28  ;;  %3146 = vmatprep.subr.bf16.mxu1 %v2826_v18 }
 0x5ad   :  { %2983 = vmatpush1.bf16.msra.mxu0 %v2823_v57  ;;  %3147 = vmatpush1.bf16.msra.mxu1 %v2825_v49 }
 0x5ae   :  { %2984 = vmatprep.subr.bf16.mxu0 %v2828_v23  ;;  %3148 = vmatprep.subr.bf16.mxu1 %v2830_v36 }
 0x5b1   :  { %2985 = vmatpush1.bf16.msra.mxu0 %v2827_v52  ;;  %3149 = vmatpush1.bf16.msra.mxu1 %v2829_v12 }
 0x5b4   :  { %2987 = vmatmul.mubr.bf16.vlgmr.msra.gmra.mrb[8].mxu0 %v2445_v5  ;;  %3151 = vmatmul.mubr.bf16.vlgmr.msra.gmra.mrb[8].mxu1 %v2445_v5 }
 0x687   :  { %v2988_v44 = vpop.f32.mrb[8].mxu0  ;;  %v3152_v33 = vpop.f32.mrb[8].mxu1 }
 0x688   :  { %v3182_v32 = vmul.f32 %v3165_v21, %v2988_v44  ;;  %v3184_v4 = vmul.f32 %v3173_v48, %v3152_v33  ;;  %v2990_v27 = vpop.f32.mrb[9].mxu0  ;;  %v3154_v6 = vpop.f32.mrb[9].mxu1 }
 0x689   :  { %v3183_v34 = vmul.f32 %v3169_v61, %v2990_v27  ;;  %v3185_v9 = vmul.f32 %v3177_v35, %v3154_v6  ;;  %v2992_v54 = vpop.f32.mrb[10].mxu0  ;;  %v3156_v10 = vpop.f32.mrb[10].mxu1 }
 0x68a   :  { %v5940_v24 = vadd.f32 %v3192_v11, %v3182_v32  ;;  %v5942_v41 = vadd.f32 %v3200_v45, %v3184_v4  ;;  %v2993_v22 = vpop.f32.mrb[11].mxu0  ;;  %v3157_v3 = vpop.f32.mrb[11].mxu1 }
 0x68b   :  { %v3210_v40 = vadd.f32 %v3196_v63, %v3183_v34  ;;  %v5944_v46 = vadd.f32 %v3204_v51, %v3185_v9 }
 0x68c   :  { %v3213_v39 = vmax.f32 %v5940_v24, 0.0  ;;  %v3215_v13 = vmax.f32 %v5942_v41, 0.0 }
 0x68d   :  { %v3214_v15 = vmax.f32 %v3210_v40, 0.0  ;;  %v3216_v2 = vmax.f32 %v5944_v46, 0.0 }
 0x68e   :  { %4087 = dma.done.wait [#allocation6 + $0x3], 8192 }
 0x68f   :  { %4088 = vsyncadd [#allocation6 + $0x3], 4294959104  ;;  %v3317_v31 = vpack.c.bf16 %v3214_v15, %v3214_v15  ;;  %v3221_v20 = vld [vmem:[#allocation5 + $0x8] sm:$0xff]  ;;  %v3220_v26 = vld [vmem:[#allocation5] sm:$0xff]  ;;  %vm4100_vm0 = vmmov 0   ;;  %s4101_s6 = smov [#allocation13]  }
 0x690   :  { %v3253_v30 = vunpack.c.l.s8.bf16 %v3221_v20  ;;  %v3255_v17 = vunpack.c.h.s8.bf16 %v3221_v20  ;;  %v3252_v62 = vunpack.c.l.s8.bf16 %v3220_v26  ;;  %v3223_v7 = vld [vmem:[#allocation5 + $0x18] sm:$0xff]  ;;  %v3254_v60 = vunpack.c.h.s8.bf16 %v3220_v26  ;;  %v3222_v8 = vld [vmem:[#allocation5 + $0x10] sm:$0xff]  ;;  %v3225_v47 = vld [vmem:[#allocation5 + $0x28] sm:$0xff]  ;;  %s3651_s30 = sshll.u32 %s4101_s6, 4  ;;  %s3652_s30 = int_to_ptr.vmem [resolvable:$true] %s3651_s30 }
 0x691   :  { %3352 = vmatprep.mubr.bf16.mxu0 %v3317_v31  ;;  %v3257_v14 = vunpack.c.l.s8.bf16 %v3223_v7  ;;  %v3256_v0 = vunpack.c.l.s8.bf16 %v3222_v8  ;;  %v3259_v43 = vunpack.c.h.s8.bf16 %v3223_v7  ;;  %v3258_v25 = vunpack.c.h.s8.bf16 %v3222_v8  ;;  %v3224_v16 = vld [vmem:[#allocation5 + $0x20] sm:$0xff]  ;;  %v3227_v37 = vld [vmem:[#allocation5 + $0x38] sm:$0xff]  ;;  %v3439_v53 = vld [vmem:[#allocation5 + $0x150] sm:$0xff]  ;;  %s4055_s8 = scalar_lea.vmem %s3652_s30, 32  ;;  %p4060_p1 = scmp.lt.s32.totalorder %s3652_s30, %s3652_s30 }
 0x692   :  { %3320 = vmatprep.subr.bf16.mxu0 %v3253_v30  ;;  %v3261_v19 = vunpack.c.l.s8.bf16 %v3225_v47  ;;  %v3438_v29 = vld [vmem:[#allocation5 + $0x140] sm:$0xff]  ;;  %v3260_v38 = vunpack.c.l.s8.bf16 %v3224_v16  ;;  %v3263_v1 = vunpack.c.h.s8.bf16 %v3225_v47  ;;  %v3262_v57 = vunpack.c.h.s8.bf16 %v3224_v16  ;;  %v3226_v36 = vld [vmem:[#allocation5 + $0x30] sm:$0xff]  ;;  %v3229_v48 = vld [vmem:[#allocation5 + $0x48] sm:$0xff]  ;;  %p4056_p0 = scmp.ne.s32.totalorder %s3652_s30, %s4055_s8  ;;  %p4061_p2 = scmp.lt.s32.totalorder %s4055_s8, %s4055_s8 }
 0x693   :  { %3321 = vmatpush1.bf16.msra.mxu0 %v3252_v62  ;;  %v3434_v42 = vld [vmem:[#allocation5 + $0x100] sm:$0xff]  ;;  %v3450_v59 = vunpack.c.l.s8.bf16 %v3438_v29  ;;  %v3451_v28 = vunpack.c.h.s8.bf16 %v3438_v29  ;;  %v3265_v23 = vunpack.c.l.s8.bf16 %v3227_v37  ;;  %v3452_v52 = vunpack.c.l.s8.bf16 %v3439_v53  ;;  %v3435_v12 = vld [vmem:[#allocation5 + $0x110] sm:$0xff]  ;;  %v3231_v6 = vld [vmem:[#allocation5 + $0x58] sm:$0xff] }
 0x694   :  { %3322 = vmatprep.subr.bf16.mxu0 %v3255_v17  ;;  %v3442_v18 = vunpack.c.l.s8.bf16 %v3434_v42  ;;  %v3443_v49 = vunpack.c.h.s8.bf16 %v3434_v42  ;;  %v3264_v5 = vunpack.c.l.s8.bf16 %v3226_v36  ;;  %v3444_v56 = vunpack.c.l.s8.bf16 %v3435_v12  ;;  %v3440_v61 = vld [vmem:[#allocation5 + $0x160] sm:$0xff]  ;;  %v3230_v54 = vld [vmem:[#allocation5 + $0x50] sm:$0xff]  ;;  %v3233_v3 = vld [vmem:[#allocation5 + $0x68] sm:$0xff]  ;;  %p4062_p3 = por %p4061_p2, %p4060_p1 }
 0x695   :  { %3700 = vmatprep.subr.bf16.mxu1 %v3450_v59  ;;  %v3267_v58 = vunpack.c.h.s8.bf16 %v3227_v37  ;;  %v3453_v21 = vunpack.c.h.s8.bf16 %v3439_v53  ;;  %v3266_v35 = vunpack.c.h.s8.bf16 %v3226_v36  ;;  %v3445_v11 = vunpack.c.h.s8.bf16 %v3435_v12  ;;  %v3228_v44 = vld [vmem:[#allocation5 + $0x40] sm:$0xff]  ;;  %v3235_v30 = vld [vmem:[#allocation5 + $0x78] sm:$0xff]  ;;  %v3234_v7 = vld [vmem:[#allocation5 + $0x70] sm:$0xff] }
 0x696   :  { %3701 = vmatpush3.bf16.msra.mxu1 %v3442_v18  ;;  %v3269_v45 = vunpack.c.l.s8.bf16 %v3229_v48  ;;  %v3454_v33 = vunpack.c.l.s8.bf16 %v3440_v61  ;;  %v5949_v63 = vld [vmem:[#allocation5 + $0x120] sm:$0xff]  ;;  %v3268_v51 = vunpack.c.l.s8.bf16 %v3228_v44  ;;  %v3271_v4 = vunpack.c.h.s8.bf16 %v3229_v48  ;;  %v3237_v8 = vld [vmem:[#allocation5 + $0x88] sm:$0xff]  ;;  %v3239_v42 = vld [vmem:[#allocation5 + $0x98] sm:$0xff]  ;;  %p4063_p4 = pnand %p4062_p3, %p4056_p0 }
 0x697   :  { %3323 = vmatpush1.bf16.msra.mxu0 %v3254_v60  ;;  %3702 = vmatprep.subr.bf16.mxu1 %v3451_v28  ;;  %v3446_v32 = vunpack.c.l.s8.bf16 %v5949_v63  ;;  %v3455_v27 = vunpack.c.h.s8.bf16 %v3440_v61  ;;  %v3270_v34 = vunpack.c.h.s8.bf16 %v3228_v44  ;;  %v3273_v9 = vunpack.c.l.s8.bf16 %v3231_v6  ;;  %v3232_v31 = vld [vmem:[#allocation5 + $0x60] sm:$0xff]  ;;  %v3238_v59 = vld [vmem:[#allocation5 + $0x90] sm:$0xff]  ;;  %v3241_v28 = vld [vmem:[#allocation5 + $0xa8] sm:$0xff] }
 0x698   :  { %3324 = vmatprep.subr.bf16.mxu0 %v3257_v14  ;;  %v3272_v10 = vunpack.c.l.s8.bf16 %v3230_v54  ;;  %v3275_v22 = vunpack.c.h.s8.bf16 %v3231_v6  ;;  %v3274_v40 = vunpack.c.h.s8.bf16 %v3230_v54  ;;  %v3277_v15 = vunpack.c.l.s8.bf16 %v3233_v3  ;;  %v3236_v47 = vld [vmem:[#allocation5 + $0x80] sm:$0xff]  ;;  %v3242_v36 = vld [vmem:[#allocation5 + $0xb0] sm:$0xff]  ;;  %v3251_v54 = vld [vmem:[#allocation5 + $0xf8] sm:$0xff] }
 0x699   :  { %v3276_v20 = vunpack.c.l.s8.bf16 %v3232_v31  ;;  %v3279_v26 = vunpack.c.h.s8.bf16 %v3233_v3  ;;  %v3278_v17 = vunpack.c.h.s8.bf16 %v3232_v31  ;;  %v3281_v62 = vunpack.c.l.s8.bf16 %v3235_v30  ;;  %v3246_v44 = vld [vmem:[#allocation5 + $0xd0] sm:$0xff]  ;;  %v3248_v6 = vld [vmem:[#allocation5 + $0xe0] sm:$0xff] }
 0x69a   :  { %3703 = vmatpush3.bf16.msra.mxu1 %v3443_v49  ;;  %v3280_v60 = vunpack.c.l.s8.bf16 %v3234_v7  ;;  %v3283_v14 = vunpack.c.h.s8.bf16 %v3235_v30  ;;  %v3319_v16 = vpack.c.bf16 %v3216_v2, %v3216_v2  ;;  %v3287_v29 = vunpack.c.h.s8.bf16 %v3237_v8  ;;  %v3240_v2 = vld [vmem:[#allocation5 + $0xa0] sm:$0xff]  ;;  %v3250_v3 = vld [vmem:[#allocation5 + $0xf0] sm:$0xff] }
 0x69b   :  { %3325 = vmatpush1.bf16.msra.mxu0 %v3256_v0  ;;  %3704 = vmatprep.subr.bf16.mxu1 %v3452_v52  ;;  %v3282_v0 = vunpack.c.h.s8.bf16 %v3234_v7  ;;  %v3288_v24 = vunpack.c.l.s8.bf16 %v3238_v59  ;;  %v3290_v18 = vunpack.c.h.s8.bf16 %v3238_v59  ;;  %v3293_v46 = vunpack.c.l.s8.bf16 %v3241_v28  ;;  %v3441_v30 = vld [vmem:[#allocation5 + $0x170] sm:$0xff] }
 0x69c   :  { %3326 = vmatprep.subr.bf16.mxu0 %v3259_v43  ;;  %v3285_v43 = vunpack.c.l.s8.bf16 %v3237_v8  ;;  %v3292_v37 = vunpack.c.l.s8.bf16 %v3240_v2  ;;  %v3295_v53 = vunpack.c.h.s8.bf16 %v3241_v28  ;;  %v3294_v49 = vunpack.c.h.s8.bf16 %v3240_v2  ;;  %v3403_v41 = vld [vmem:[#allocation12 + $0x19] ss:$2 sm:$0x3] }
 0x69d   :  { %v3296_v52 = vunpack.c.l.s8.bf16 %v3242_v36  ;;  %v3314_v31 = vunpack.c.h.s8.bf16 %v3250_v3  ;;  %v4099_v8 = vmov 0.0  }
 0x69e   :  { %3705 = vmatpush3.bf16.msra.mxu1 %v3444_v56  ;;  %v3298_v56 = vunpack.c.h.s8.bf16 %v3242_v36  ;;  %v3516_v36 = vld [vmem:[#allocation5 + $0x1b0] sm:$0xff] }
 0x69f   :  { %3327 = vmatpush1.bf16.msra.mxu0 %v3258_v25  ;;  %3706 = vmatprep.subr.bf16.mxu1 %v3453_v21  ;;  %v3316_v25 = vpack.c.bf16 %v3213_v39, %v3213_v39  ;;  %v3291_v39 = vunpack.c.h.s8.bf16 %v3239_v42  ;;  %v3244_v21 = vld [vmem:[#allocation5 + $0xc0] sm:$0xff] }
 0x6a0   :  { %3328 = vmatprep.subr.bf16.mxu0 %v3261_v19  ;;  %v3284_v19 = vunpack.c.l.s8.bf16 %v3236_v47  ;;  %v3300_v48 = vunpack.c.l.s8.bf16 %v3244_v21 }
 0x6a2   :  { %3707 = vmatpush3.bf16.msra.mxu1 %v3445_v11  ;;  %v3302_v11 = vunpack.c.h.s8.bf16 %v3244_v21 }
 0x6a3   :  { %3329 = vmatpush1.bf16.msra.mxu0 %v3260_v38  ;;  %3708 = vmatprep.subr.bf16.mxu1 %v3454_v33  ;;  %v3286_v38 = vunpack.c.h.s8.bf16 %v3236_v47  ;;  %v3304_v33 = vunpack.c.l.s8.bf16 %v3246_v44 }
 0x6a4   :  { %3330 = vmatprep.subr.bf16.mxu0 %v3263_v1  ;;  %v3289_v1 = vunpack.c.l.s8.bf16 %v3239_v42 }
 0x6a6   :  { %3709 = vmatpush3.bf16.msra.mxu1 %v3446_v32  ;;  %v3249_v32 = vld [vmem:[#allocation5 + $0xe8] sm:$0xff] }
 0x6a7   :  { %3331 = vmatpush1.bf16.msra.mxu0 %v3262_v57  ;;  %3710 = vmatprep.subr.bf16.mxu1 %v3455_v27  ;;  %v3243_v57 = vld [vmem:[#allocation5 + $0xb8] sm:$0xff]  ;;  %v3309_v27 = vunpack.c.l.s8.bf16 %v3249_v32 }
 0x6a8   :  { %3332 = vmatprep.subr.bf16.mxu0 %v3265_v23  ;;  %v3297_v23 = vunpack.c.l.s8.bf16 %v3243_v57  ;;  %v3299_v12 = vunpack.c.h.s8.bf16 %v3243_v57  ;;  %v3515_v57 = vld [vmem:[#allocation5 + $0x1a0] sm:$0xff] }
 0x6ab   :  { %3333 = vmatpush1.bf16.msra.mxu0 %v3264_v5  ;;  %v3245_v5 = vld [vmem:[#allocation5 + $0xc8] sm:$0xff] }
 0x6ac   :  { %3334 = vmatprep.subr.bf16.mxu0 %v3267_v58  ;;  %v3301_v58 = vunpack.c.l.s8.bf16 %v3245_v5  ;;  %v3303_v61 = vunpack.c.h.s8.bf16 %v3245_v5 }
 0x6af   :  { %3335 = vmatpush1.bf16.msra.mxu0 %v3266_v35  ;;  %v3247_v35 = vld [vmem:[#allocation5 + $0xd8] sm:$0xff] }
 0x6b0   :  { %3336 = vmatprep.subr.bf16.mxu0 %v3269_v45  ;;  %v3305_v45 = vunpack.c.l.s8.bf16 %v3247_v35 }
 0x6b3   :  { %3337 = vmatpush1.bf16.msra.mxu0 %v3268_v51  ;;  %v3307_v51 = vunpack.c.h.s8.bf16 %v3247_v35 }
 0x6b4   :  { %3338 = vmatprep.subr.bf16.mxu0 %v3271_v4  ;;  %v3306_v4 = vunpack.c.h.s8.bf16 %v3246_v44  ;;  %v3579_v44 = vld [vmem:[#allocation5 + $0x1c0] sm:$0xff] }
 0x6b7   :  { %3339 = vmatpush1.bf16.msra.mxu0 %v3270_v34  ;;  %v3308_v34 = vunpack.c.l.s8.bf16 %v3248_v6 }
 0x6b8   :  { %3340 = vmatprep.subr.bf16.mxu0 %v3273_v9  ;;  %v3311_v9 = vunpack.c.h.s8.bf16 %v3249_v32 }
 0x6bb   :  { %3341 = vmatpush1.bf16.msra.mxu0 %v3272_v10  ;;  %v3310_v10 = vunpack.c.h.s8.bf16 %v3248_v6 }
 0x6bc   :  { %3342 = vmatprep.subr.bf16.mxu0 %v3275_v22  ;;  %v3313_v22 = vunpack.c.l.s8.bf16 %v3251_v54 }
 0x6bf   :  { %3343 = vmatpush1.bf16.msra.mxu0 %v3274_v40  ;;  %v3312_v40 = vunpack.c.l.s8.bf16 %v3250_v3 }
 0x6c0   :  { %3344 = vmatprep.subr.bf16.mxu0 %v3277_v15  ;;  %v3315_v15 = vunpack.c.h.s8.bf16 %v3251_v54 }
 0x6c3   :  { %3345 = vmatpush1.bf16.msra.mxu0 %v3276_v20  ;;  %v3318_v20 = vpack.c.bf16 %v3215_v13, %v3215_v13  ;;  %v3418_v13 = vld [vmem:[#allocation12 + $0x18] ss:$2 sm:$0x3] }
 0x6c4   :  { %3346 = vmatprep.subr.bf16.mxu0 %v3279_v26  ;;  %v3447_v26 = vunpack.c.h.s8.bf16 %v5949_v63  ;;  %v3412_v63 = vrot.slane %v3403_v41, %v5873_v50 }
 0x6c6   :  { %3711 = vmatpush3.bf16.msra.mxu1 %v3447_v26 }
 0x6c7   :  { %3347 = vmatpush1.bf16.msra.mxu0 %v3278_v17  ;;  %v3456_v17 = vunpack.c.l.s8.bf16 %v3441_v30 }
 0x6c8   :  { %3348 = vmatprep.subr.bf16.mxu0 %v3281_v62  ;;  %v3437_v62 = vld [vmem:[#allocation5 + $0x130] sm:$0xff] }
 0x6c9   :  { %v3448_v7 = vunpack.c.l.s8.bf16 %v3437_v62  ;;  %3712 = vmatprep.subr.bf16.mxu1 %v3456_v17 }
 0x6cb   :  { %3349 = vmatpush1.bf16.msra.mxu0 %v3280_v60  ;;  %3713 = vmatpush3.bf16.msra.mxu1 %v3448_v7  ;;  %v3457_v60 = vunpack.c.h.s8.bf16 %v3441_v30 }
 0x6cc   :  { %3350 = vmatprep.subr.bf16.mxu0 %v3283_v14  ;;  %v3449_v14 = vunpack.c.h.s8.bf16 %v3437_v62 }
 0x6cd   :  { %3714 = vmatprep.subr.bf16.mxu1 %v3457_v60 }
 0x6cf   :  { %3351 = vmatpush1.bf16.msra.mxu0 %v3282_v0  ;;  %3715 = vmatpush3.bf16.msra.mxu1 %v3449_v14  ;;  %v3408_v0 = vrot.slane %v3403_v41, %v5867_v55  ;;  %v3694_v41 = vld [vmem:[#allocation12 + $0x21] ss:$0 sm:$0xff] }
 0x6d0   :  { %3361 = vmatprep.subr.bf16.mxu0 %v3285_v43  ;;  %3740 = vmatprep.subr.bf16.mxu1 %v4099_v8  ;;  %v3423_v43 = vrot.slane %v3418_v13, %v5867_v55 }
 0x6d2   :  { %3353 = vmatmul.mubr.bf16.vlgmr.msra.gmra.mrb[12].mxu0 %v3316_v25  ;;  %v3427_v25 = vrot.slane %v3418_v13, %v5873_v50  ;;  %v3514_v50 = vld [vmem:[#allocation5 + $0x190] sm:$0xff] }
 0x6d3   :  { %3362 = vmatpush1.bf16.msra.mxu0 %v3284_v19  ;;  %3393 = vmatprep.mubr.bf16.mxu0 %v3319_v16 }
 0x6d4   :  { %3363 = vmatprep.subr.bf16.mxu0 %v3287_v29 }
 0x6d7   :  { %3364 = vmatpush1.bf16.msra.mxu0 %v3286_v38 }
 0x6d8   :  { %3365 = vmatprep.subr.bf16.mxu0 %v3289_v1 }
 0x6db   :  { %3366 = vmatpush1.bf16.msra.mxu0 %v3288_v24 }
 0x6dc   :  { %3367 = vmatprep.subr.bf16.mxu0 %v3291_v39  ;;  %v3513_v39 = vld [vmem:[#allocation5 + $0x180] sm:$0xff] }
 0x6dd   :  { %v3518_v55 = vunpack.c.h.s8.bf16 %v3513_v39 }
 0x6df   :  { %3368 = vmatpush1.bf16.msra.mxu0 %v3290_v18 }
 0x6e0   :  { %3369 = vmatprep.subr.bf16.mxu0 %v3293_v46  ;;  %v3517_v46 = vunpack.c.l.s8.bf16 %v3513_v39 }
 0x6e3   :  { %3370 = vmatpush1.bf16.msra.mxu0 %v3292_v37  ;;  %v3519_v37 = vunpack.c.l.s8.bf16 %v3514_v50 }
 0x6e4   :  { %3371 = vmatprep.subr.bf16.mxu0 %v3295_v53  ;;  %v3520_v53 = vunpack.c.h.s8.bf16 %v3514_v50 }
 0x6e7   :  { %3372 = vmatpush1.bf16.msra.mxu0 %v3294_v49  ;;  %v3521_v49 = vunpack.c.l.s8.bf16 %v3515_v57 }
 0x6e8   :  { %3373 = vmatprep.subr.bf16.mxu0 %v3297_v23  ;;  %v3522_v23 = vunpack.c.h.s8.bf16 %v3515_v57 }
 0x6eb   :  { %3374 = vmatpush1.bf16.msra.mxu0 %v3296_v52  ;;  %v3523_v52 = vunpack.c.l.s8.bf16 %v3516_v36 }
 0x6ec   :  { %3375 = vmatprep.subr.bf16.mxu0 %v3299_v12  ;;  %v3524_v12 = vunpack.c.h.s8.bf16 %v3516_v36 }
 0x6ef   :  { %3376 = vmatpush1.bf16.msra.mxu0 %v3298_v56 }
 0x6f0   :  { %3377 = vmatprep.subr.bf16.mxu0 %v3301_v58  ;;  %v3690_v58 = vld [vmem:[#allocation12 + $0x1d] ss:$0 sm:$0xff] }
 0x6f3   :  { %3378 = vmatpush1.bf16.msra.mxu0 %v3300_v48 }
 0x6f4   :  { %3379 = vmatprep.subr.bf16.mxu0 %v3303_v61  ;;  %v3691_v61 = vld [vmem:[#allocation12 + $0x1c] ss:$0 sm:$0xff] }
 0x6f7   :  { %3380 = vmatpush1.bf16.msra.mxu0 %v3302_v11 }
 0x6f8   :  { %3381 = vmatprep.subr.bf16.mxu0 %v3305_v45 }
 0x6fb   :  { %3382 = vmatpush1.bf16.msra.mxu0 %v3304_v33 }
 0x6fc   :  { %3383 = vmatprep.subr.bf16.mxu0 %v3307_v51  ;;  %v3583_v51 = vunpack.c.l.s8.bf16 %v3579_v44 }
 0x6ff   :  { %3384 = vmatpush1.bf16.msra.mxu0 %v3306_v4  ;;  %v3584_v4 = vunpack.c.h.s8.bf16 %v3579_v44 }
 0x700   :  { %3385 = vmatprep.subr.bf16.mxu0 %v3309_v27  ;;  %v3580_v27 = vld [vmem:[#allocation5 + $0x1d0] sm:$0xff] }
 0x701   :  { %v3585_v6 = vunpack.c.l.s8.bf16 %v3580_v27 }
 0x703   :  { %3386 = vmatpush1.bf16.msra.mxu0 %v3308_v34  ;;  %v3586_v34 = vunpack.c.h.s8.bf16 %v3580_v27 }
 0x704   :  { %3387 = vmatprep.subr.bf16.mxu0 %v3311_v9  ;;  %v3581_v9 = vld [vmem:[#allocation5 + $0x1e0] sm:$0xff] }
 0x705   :  { %v3587_v54 = vunpack.c.l.s8.bf16 %v3581_v9 }
 0x707   :  { %3388 = vmatpush1.bf16.msra.mxu0 %v3310_v10  ;;  %v3588_v10 = vunpack.c.h.s8.bf16 %v3581_v9 }
 0x708   :  { %3389 = vmatprep.subr.bf16.mxu0 %v3313_v22  ;;  %v3582_v22 = vld [vmem:[#allocation5 + $0x1f0] sm:$0xff] }
 0x709   :  { %v3589_v3 = vunpack.c.l.s8.bf16 %v3582_v22 }
 0x70b   :  { %3390 = vmatpush1.bf16.msra.mxu0 %v3312_v40  ;;  %v3590_v40 = vunpack.c.h.s8.bf16 %v3582_v22 }
 0x70c   :  { %3391 = vmatprep.subr.bf16.mxu0 %v3315_v15  ;;  %v3692_v15 = vld [vmem:[#allocation12 + $0x1f] ss:$0 sm:$0xff] }
 0x70f   :  { %3392 = vmatpush1.bf16.msra.mxu0 %v3314_v31 }
 0x712   :  { %3394 = vmatmul.mubr.bf16.vlgmr.msra.gmra.mrb[12].mxu0 %v3318_v20  ;;  %v3693_v20 = vld [vmem:[#allocation12 + $0x1e] ss:$0 sm:$0xff] }
 0x7e5   :  { %v3395_v47 = vpop.f32.mrb[12].mxu0 }
 0x7e6   :  { %v3415_v19 = vmul.f32 %v3408_v0, %v3395_v47  ;;  %v3397_v16 = vpop.f32.mrb[13].mxu0  ;;  %v3695_v0 = vld [vmem:[#allocation12 + $0x20] ss:$0 sm:$0xff] }
 0x7e7   :  { %v3416_v29 = vmul.f32 %v3412_v63, %v3397_v16  ;;  %v3399_v42 = vpop.f32.mrb[14].mxu0 }
 0x7e8   :  { %v3430_v38 = vadd.f32 %v3423_v43, %v3415_v19  ;;  %v3400_v1 = vpop.f32.mrb[15].mxu0 }
 0x7e9   :  { %v3431_v59 = vadd.f32 %v3427_v25, %v3416_v29 }
 0x7ea   :  { %v3432_v24 = vmax.f32 %v3430_v38, 0.0 }
 0x7eb   :  { %v3433_v28 = vmax.f32 %v3431_v59, 0.0 }
 0x7ec   :  { %v3458_v2 = vpack.c.bf16 %v3432_v24, %v3432_v24 }
 0x7ed   :  { %v3459_v18 = vpack.c.bf16 %v3433_v28, %v3433_v28 }
 0x7ef   :  { %3492 = vmatprep.mubr.bf16.mxu1 %v3459_v18 }
 0x7f0   :  { %3493 = vmatmul.mubr.bf16.vlgmr.msra.gmra.mrb[12].mxu1 %v3458_v2 }
 0x7f1   :  { %3741 = vmatpush3.bf16.msra.mxu1 %v3517_v46  ;;  %3756 = vmatprep.mubr.msk.bf16.mxu1 %vm4100_vm0, %v4099_v8 }
 0x7f2   :  { %3742 = vmatprep.subr.bf16.mxu1 %v4099_v8 }
 0x7f5   :  { %3743 = vmatpush3.bf16.msra.mxu1 %v3518_v55 }
 0x7f6   :  { %3744 = vmatprep.subr.bf16.mxu1 %v4099_v8 }
 0x7f9   :  { %3745 = vmatpush3.bf16.msra.mxu1 %v3519_v37 }
 0x7fa   :  { %3746 = vmatprep.subr.bf16.mxu1 %v4099_v8 }
 0x7fd   :  { %3747 = vmatpush3.bf16.msra.mxu1 %v3520_v53 }
 0x7fe   :  { %3748 = vmatprep.subr.bf16.mxu1 %v4099_v8 }
 0x801   :  { %3749 = vmatpush3.bf16.msra.mxu1 %v3521_v49 }
 0x802   :  { %3750 = vmatprep.subr.bf16.mxu1 %v4099_v8 }
 0x805   :  { %3751 = vmatpush3.bf16.msra.mxu1 %v3522_v23 }
 0x806   :  { %3752 = vmatprep.subr.bf16.mxu1 %v4099_v8 }
 0x809   :  { %3753 = vmatpush3.bf16.msra.mxu1 %v3523_v52 }
 0x80a   :  { %3754 = vmatprep.subr.bf16.mxu1 %v4099_v8 }
 0x80d   :  { %3755 = vmatpush3.bf16.msra.mxu1 %v3524_v12 }
 0x80e   :  { %3760 = vmatprep.subr.bf16.mxu1 %v4099_v8 }
 0x8c3   :  { %v3716_v5 = vpop.f32.mrb[12].mxu1 }
 0x8c4   :  { %v3717_v56 = vpop.f32.mrb[13].mxu1 }
 0x8c5   :  { %v3718_v21 = vadd.f32 %v3717_v56, %v3716_v5  ;;  %v3719_v48 = vpop.f32.mrb[14].mxu1 }
 0x8c6   :  { %v3720_v35 = vpop.f32.mrb[15].mxu1 }
 0x8c7   :  { %v3505_v11 = vmul.f32 %v3718_v21, %v3690_v58 }
 0x8c9   :  { %v3511_v45 = vadd.f32 %v3691_v61, %v3505_v11 }
 0x8cb   :  { %v3512_v33 = vmax.f32 %v3511_v45, 0.0 }
 0x8cd   :  { %v3525_v32 = vpack.c.bf16 %v3512_v33, %v3512_v33 }
 0x8cf   :  { %3757 = vmatmul.mubr.bf16.vlgmr.msra.gmra.mrb[16].mxu1 %v3525_v32 }
 0x8d0   :  { %3761 = vmatpush3.bf16.msra.mxu1 %v3583_v51  ;;  %3776 = vmatprep.mubr.msk.bf16.mxu1 %vm4100_vm0, %v4099_v8 }
 0x8d1   :  { %3762 = vmatprep.subr.bf16.mxu1 %v4099_v8 }
 0x8d4   :  { %3763 = vmatpush3.bf16.msra.mxu1 %v3584_v4 }
 0x8d5   :  { %3764 = vmatprep.subr.bf16.mxu1 %v4099_v8 }
 0x8d8   :  { %3765 = vmatpush3.bf16.msra.mxu1 %v3585_v6 }
 0x8d9   :  { %3766 = vmatprep.subr.bf16.mxu1 %v4099_v8 }
 0x8dc   :  { %3767 = vmatpush3.bf16.msra.mxu1 %v3586_v34 }
 0x8dd   :  { %3768 = vmatprep.subr.bf16.mxu1 %v4099_v8 }
 0x8e0   :  { %3769 = vmatpush3.bf16.msra.mxu1 %v3587_v54 }
 0x8e1   :  { %3770 = vmatprep.subr.bf16.mxu1 %v4099_v8 }
 0x8e4   :  { %3771 = vmatpush3.bf16.msra.mxu1 %v3588_v10 }
 0x8e5   :  { %3772 = vmatprep.subr.bf16.mxu1 %v4099_v8 }
 0x8e8   :  { %3773 = vmatpush3.bf16.msra.mxu1 %v3589_v3 }
 0x8e9   :  { %3774 = vmatprep.subr.bf16.mxu1 %v4099_v8 }
 0x8ec   :  { %3775 = vmatpush3.bf16.msra.mxu1 %v3590_v40 }
 0x9a2   :  { %v3560_v31 = vpop.f32.mrb[16].mxu1 }
 0x9a3   :  { %v3571_v26 = vmul.f32 %v3692_v15, %v3560_v31  ;;  %v3758_v30 = vpop.f32.mrb[17].mxu1 }
 0x9a4   :  { %v3563_v17 = vpop.f32.mrb[18].mxu1 }
 0x9a5   :  { %v3577_v62 = vadd.f32 %v3693_v20, %v3571_v26  ;;  %v3759_v7 = vpop.f32.mrb[19].mxu1 }
 0x9a7   :  { %v3578_v60 = vmax.f32 %v3577_v62, 0.0 }
 0x9a9   :  { %v3591_v14 = vpack.c.bf16 %v3578_v60, %v3578_v60 }
 0x9ab   :  { %3777 = vmatmul.mubr.bf16.vlgmr.msra.gmra.mrb[20].mxu1 %v3591_v14 }
 0xa7e   :  { %v3626_v13 = vpop.f32.mrb[20].mxu1 }
 0xa7f   :  { %v3637_v63 = vmul.f32 %v3694_v41, %v3626_v13  ;;  %v3778_v8 = vpop.f32.mrb[21].mxu1 }
 0xa80   :  { %v3629_v43 = vpop.f32.mrb[22].mxu1 }
 0xa81   :  { %v3643_v47 = vadd.f32 %v3695_v0, %v3637_v63  ;;  %v3779_v25 = vpop.f32.mrb[23].mxu1 }
 0xa83   :  { %3644 = vst [vmem:[#allocation13] sm:$0x3] %v3643_v47 }
 0xa84   :  { %4066 = shalt.err (!%p4063_p4)
}
 0xa85   :  { %s4067_s10 = scalar_lea.hbm %s6005_s7, 32 }
 0xa86   :  { %p4068_p5 = scmp.ne.s32.totalorder %s6005_s7, %s4067_s10  ;;  %p4071_p6 = scmp.lt.u32.totalorder %s4067_s10, %s6005_s7 }
 0xa88   :  { %p4073_p7 = pnand %p4071_p6, %p4068_p5 }
 0xa8a   :  { %4076 = shalt.err (!%p4073_p7)
}
 0xa8b   :  { %3654 = dma.vmem_to_hbm [thread:$0]  %s3652_s30, 32, %s6005_s7, [#allocation9]  }
 0xa8c   :  { %4089 = dma.done.wait [#allocation9], 32  }
 0xa8d   :  { %4090 = vsyncadd [#allocation9], 4294967264 }
 0xa8e   :  { %3658 = vsyncpa [#allocation8], 1 }
 0xa8f   :  { %3659 = vsyncpa [#allocation11], 1 }
 0xa90   :  { %3660 = vsyncpa [#allocation9], 1 }
 0xa91   :  { %3661 = vsyncmov [#allocation6] }
 0xa94   :  { %s3662_s16 = vpop.sfrf %3661 }
 0xa95   :  { %p3696_p8 = scmp.ne.s32.totalorder %s3662_s16, 0 }
 0xa97   :  { %3666 = shalt.err (%p3696_p8)  }
 0xa98   :  { %3668 = vsyncmov [#allocation6 + $0x1] }
 0xa9b   :  { %s3669_s17 = vpop.sfrf %3668 }
 0xa9c   :  { %p3697_p9 = scmp.ne.s32.totalorder %s3669_s17, 0 }
 0xa9e   :  { %3673 = shalt.err (%p3697_p9)  }
 0xa9f   :  { %3675 = vsyncmov [#allocation6 + $0x2] }
 0xaa2   :  { %s3676_s18 = vpop.sfrf %3675 }
 0xaa3   :  { %p3698_p10 = scmp.ne.s32.totalorder %s3676_s18, 0 }
 0xaa5   :  { %3680 = shalt.err (%p3698_p10)  }
 0xaa6   :  { %3682 = vsyncmov [#allocation6 + $0x3] }
 0xaa9   :  { %s3683_s19 = vpop.sfrf %3682 }
 0xaaa   :  { %p3699_p11 = scmp.ne.s32.totalorder %s3683_s19, 0 }
 0xaac   :  { %3687 = shalt.err (%p3699_p11)  }

</bundles_post_ra>
